<compile_context>
chip_gen: v5e
topology: v5e:2x2
jax: 0.10.0
libtpu: 0.0.40
codegen_flags: <defaults>
</compile_context>

<pallas_src>
import functools

import jax
import jax.numpy as jnp
from jax import lax
from jax.experimental import pallas as pl
from jax.experimental.pallas import tpu as pltpu


def _round_up(x, m):
    return ((x + m - 1) // m) * m


# ----------------------------------------------------------------------------
# Fused Pallas kernel: GRU over NB sequences + MLP heads on their NB*T states
# ----------------------------------------------------------------------------
def fused_actor_critic_kernel(x_ref, h0_ref,
                              wih_ref, whh_ref, whid_ref, wpv_ref, wout_ref,
                              bias_ref,
                              out_ref, hf_ref,
                              gi_ref, y_ref,
                              *, num_actions, seq_len, hp, hsp, h_logical):
    """Per grid step (one block of NB sequences):

    x_ref   : (NB*T, D)     obs rows (seq-major, time-minor — PyTorch order)
    h0_ref  : (NB, H)       initial hidden states
    wih_ref : (D, 3*HP)     merged/padded input-gate weights   [r|z|n]
    whh_ref : (HP, 3*HP)    merged/padded hidden-gate weights  [r|z|n] (f32)
    whid_ref: (HP, HSP)     lin_hidden
    wpv_ref : (HSP, 2*HSP)  merged [lin_policy | lin_value]
    wout_ref: (2*HSP, OUT_W) block-diag [branch | value], zero-padded
    bias_ref: (8, BW)       packed biases (see pack_params)
    out_ref : (NB*T, OUT_W) [log_probs(A) | value | pad]  (seq-major rows)
    hf_ref  : (NB, HP)      final hidden states (padded lanes are zero)
    gi_ref  : (T, NB, 3*HP) scratch — hoisted input-gate activations, time-major
    y_ref   : (T, NB, HP)   scratch — per-step hidden states, time-major
    """
    NBT, D = x_ref.shape
    T = seq_len
    NB = NBT // T
    HP, HSP, H, A = hp, hsp, h_logical, num_actions
    OUT_W = out_ref.shape[-1]
    f32 = jnp.float32
    cdt = wih_ref.dtype                        # bf16 (fast path) or f32 (exact)

    # --- packed biases (each a lane-tile-aligned slab of one VMEM input) -----
    gbias_i = bias_ref[0:1, 0:3 * HP]          # b_ih with b_hh folded for r,z
    b_hn = bias_ref[1:2, 0:HP]                 # hidden bias of the n gate
    b_hid = bias_ref[2:3, 0:HSP]
    b_pv = bias_ref[3:4, 0:2 * HSP]
    b_out = bias_ref[4:5, 0:OUT_W]

    # --- reorder obs block to time-major ONCE (XLU, off the serial path) -----
    x_sm = x_ref[...].reshape(NB, T, D)                       # layout-free split
    x_tm = pltpu.einshape("ntd->tnd", x_sm)                   # (T, NB, D)

    # --- hoisted input-gate matmul for all timesteps & gates (one MXU dot) ---
    gi = jnp.dot(x_tm.reshape(T * NB, D).astype(cdt), wih_ref[...],
                 preferred_element_type=f32) + gbias_i        # (T*NB, 3*HP)
    gi_ref[...] = gi.reshape(T, NB, 3 * HP)

    # --- initial hidden state, zero-padded from H to HP lanes ----------------
    h0 = h0_ref[...]                                          # (NB, H)
    if HP > H:
        h = jnp.concatenate([h0, jnp.zeros((NB, HP - H), f32)], axis=1)
    else:
        h = h0
    whh = whh_ref[...]                                        # resident (HP,3HP)

    # --- GRU recurrence, fully unrolled; full-slab loads/stores each step ----
    for t in range(T):
        gi_t = gi_ref[t]                                      # (NB, 3*HP) slab
        gh = jnp.dot(h, whh, preferred_element_type=f32)      # serial path, f32
        r = jax.nn.sigmoid(gi_t[:, 0:HP] + gh[:, 0:HP])
        z = jax.nn.sigmoid(gi_t[:, HP:2 * HP] + gh[:, HP:2 * HP])
        n = jnp.tanh(gi_t[:, 2 * HP:3 * HP] + r * (gh[:, 2 * HP:3 * HP] + b_hn))
        h = (1.0 - z) * n + z * h
        y_ref[t] = h                                          # full (NB,HP) slab

    hf_ref[...] = h                                           # final hidden

    # --- heads on all NB*T hidden states (reordered back to seq-major) -------
    y = pltpu.einshape("tnh->nth", y_ref[...]).reshape(NB * T, HP)
    hmid = jnp.maximum(
        jnp.dot(y.astype(cdt), whid_ref[...], preferred_element_type=f32) + b_hid, 0.0)
    pv = jnp.maximum(
        jnp.dot(hmid.astype(cdt), wpv_ref[...], preferred_element_type=f32) + b_pv, 0.0)
    outf = jnp.dot(pv.astype(cdt), wout_ref[...], preferred_element_type=f32) + b_out

    # Masked log-softmax over the first A lanes; lane A carries the raw value.
    lane = lax.broadcasted_iota(jnp.int32, outf.shape, 1)
    is_logit = lane < A
    m = jnp.max(jnp.where(is_logit, outf, -jnp.inf), axis=-1, keepdims=True)
    e = jnp.where(is_logit, jnp.exp(outf - m), 0.0)
    lse = m + jnp.log(jnp.sum(e, axis=-1, keepdims=True))
    out_ref[...] = jnp.where(is_logit, outf - lse, outf)


# ----------------------------------------------------------------------------
# One-time parameter packing (transpose / merge / pad / dtype-cast ONCE)
# ----------------------------------------------------------------------------
def pack_params(params, *, num_actions, use_bf16=True):
    H3, D = params["w_ih"].shape
    H = H3 // 3
    HS = params["w_hidden"].shape[0]
    A = num_actions

    HP = _round_up(H, 128)                 # per-gate lane padding (inert zeros)
    HSP = _round_up(HS, 128)
    OUT_W = _round_up(max(A + 1, 128), 128)

    w_ih, w_hh = params["w_ih"], params["w_hh"]
    b_ih, b_hh = params["b_ih"], params["b_hh"]

    # Per-gate transposed weights, each padded to HP lanes, merged along lanes.
    wih_p = jnp.zeros((D, 3 * HP), jnp.float32)
    whh_p = jnp.zeros((HP, 3 * HP), jnp.float32)
    for g in range(3):                     # gate order r, z, n (PyTorch GRU)
        wih_p = wih_p.at[:, g * HP:g * HP + H].set(w_ih[g * H:(g + 1) * H, :].T)
        whh_p = whh_p.at[:H, g * HP:g * HP + H].set(w_hh[g * H:(g + 1) * H, :].T)

    # Input-gate bias with b_hh folded for r/z (additive before the sigmoid);
    # the n-gate hidden bias stays separate because it is scaled by r.
    gbias_i = jnp.zeros((3 * HP,), jnp.float32)
    gbias_i = gbias_i.at[0 * HP:0 * HP + H].set(b_ih[0:H] + b_hh[0:H])
    gbias_i = gbias_i.at[1 * HP:1 * HP + H].set(b_ih[H:2 * H] + b_hh[H:2 * H])
    gbias_i = gbias_i.at[2 * HP:2 * HP + H].set(b_ih[2 * H:3 * H])
    b_hn = jnp.zeros((HP,), jnp.float32).at[:H].set(b_hh[2 * H:3 * H])

    w_hid = jnp.zeros((HP, HSP), jnp.float32).at[:H, :HS].set(params["w_hidden"].T)
    b_hid = jnp.zeros((HSP,), jnp.float32).at[:HS].set(params["b_hidden"])

    # Merged policy/value trunk: one (HSP, 2*HSP) matmul.
    w_pv = jnp.zeros((HSP, 2 * HSP), jnp.float32)
    w_pv = w_pv.at[:HS, :HS].set(params["w_policy"].T)
    w_pv = w_pv.at[:HS, HSP:HSP + HS].set(params["w_value_h"].T)
    b_pv = jnp.zeros((2 * HSP,), jnp.float32)
    b_pv = b_pv.at[:HS].set(params["b_policy"])
    b_pv = b_pv.at[HSP:HSP + HS].set(params["b_value_h"])

    # Merged [branch | value] projection (block-diagonal), padded to OUT_W.
    w_out = jnp.zeros((2 * HSP, OUT_W), jnp.float32)
    w_out = w_out.at[:HS, :A].set(params["w_branch"].T)          # logits
    w_out = w_out.at[HSP:HSP + HS, A:A + 1].set(params["w_value"].T)  # value
    b_out = jnp.zeros((OUT_W,), jnp.float32)
    b_out = b_out.at[:A].set(params["b_branch"])
    b_out = b_out.at[A].set(params["b_value"][0])

    # One packed (8, BW) bias buffer -> single VMEM input instead of five.
    BW = max(3 * HP, 2 * HSP, OUT_W)
    biases = jnp.zeros((8, BW), jnp.float32)
    biases = biases.at[0, :3 * HP].set(gbias_i)
    biases = biases.at[1, :HP].set(b_hn)
    biases = biases.at[2, :HSP].set(b_hid)
    biases = biases.at[3, :2 * HSP].set(b_pv)
    biases = biases.at[4, :OUT_W].set(b_out)

    mxu_dt = jnp.bfloat16 if use_bf16 else jnp.float32
    return dict(
        wih=wih_p.astype(mxu_dt),          # off-critical-path MXU operands
        whh=whh_p,                         # serial h @ W_hh stays f32
        w_hid=w_hid.astype(mxu_dt),
        w_pv=w_pv.astype(mxu_dt),
        w_out=w_out.astype(mxu_dt),
        biases=biases,
        meta=dict(H=H, HP=HP, HS=HS, HSP=HSP, A=A, OUT_W=OUT_W),
    )


# ----------------------------------------------------------------------------
# JAX wrapper
# ----------------------------------------------------------------------------
def _const_spec(arr):
    zeros = (0,) * arr.ndim
    return pl.BlockSpec(arr.shape, lambda g, _z=zeros: _z)


def _pick_nb(n, nb_target):
    """Largest multiple-of-8 divisor of n, <= nb_target, leaving grid >= 2."""
    cap = max(1, min(nb_target, n // 2 if n >= 16 else n))
    div8 = [d for d in range(8, cap + 1, 8) if n % d == 0]
    if div8:
        return max(div8)
    return 1  # safe fallback (keeps in-kernel reshapes layout-free)


def actor_critic_forward(obs, h0, packed, *, sequence_length, nb_target=64):
    """obs: (B_total, obs_dim) batch-first; h0: (1, N, H) PyTorch-style hidden."""
    B_total, D = obs.shape
    T = sequence_length
    assert B_total % T == 0, "batch size must be a multiple of sequence_length"
    assert T % 8 == 0, "sequence_length must be a multiple of 8 (sublane tile)"
    N = B_total // T

    meta = packed["meta"]
    H, HP, HSP, A, OUT_W = meta["H"], meta["HP"], meta["HSP"], meta["A"], meta["OUT_W"]

    NB = _pick_nb(N, nb_target)
    G = N // NB
    h0s = h0[0]                                   # (N, H)

    kernel = functools.partial(fused_actor_critic_kernel, num_actions=A,
                               seq_len=T, hp=HP, hsp=HSP, h_logical=H)

    weight_bytes = sum(int(packed[k].size) * packed[k].dtype.itemsize
                       for k in ("wih", "whh", "w_hid", "w_pv", "w_out", "biases"))
    block_bytes = (NB * T * D + NB * H + NB * T * OUT_W + NB * HP) * 4
    scratch_bytes = (T * NB * 3 * HP + T * NB * HP) * 4
    # Explicit VMEM budget (v7x: 64 MiB physical, 32 MiB default scoped limit).
    vmem_limit = int(min(max(2 * (weight_bytes + 2 * block_bytes + scratch_bytes),
                             8 << 20), 64 << 20))

    flops = 2 * B_total * (D * 3 * HP + HP * 3 * HP + HP * HSP
                           + HSP * 2 * HSP + 2 * HSP * OUT_W)
    transcendentals = B_total * (3 * HP + OUT_W)
    bytes_accessed = (int(obs.size) + B_total * OUT_W + N * (H + HP)) * 4 + weight_bytes

    out_full, h_final = pl.pallas_call(
        kernel,
        out_shape=(jax.ShapeDtypeStruct((B_total, OUT_W), jnp.float32),
                   jax.ShapeDtypeStruct((N, HP), jnp.float32)),
        grid=(G,),
        in_specs=[
            pl.BlockSpec((NB * T, D), lambda g: (g, 0)),     # obs rows of NB seqs
            pl.BlockSpec((NB, H), lambda g: (g, 0)),         # their h0
            _const_spec(packed["wih"]),
            _const_spec(packed["whh"]),
            _const_spec(packed["w_hid"]),
            _const_spec(packed["w_pv"]),
            _const_spec(packed["w_out"]),
            _const_spec(packed["biases"]),
        ],
        out_specs=(pl.BlockSpec((NB * T, OUT_W), lambda g: (g, 0)),
                   pl.BlockSpec((NB, HP), lambda g: (g, 0))),
        scratch_shapes=[pltpu.VMEM((T, NB, 3 * HP), jnp.float32),
                        pltpu.VMEM((T, NB, HP), jnp.float32)],
        compiler_params=pltpu.CompilerParams(
            dimension_semantics=("parallel",),
            vmem_limit_bytes=vmem_limit),
        cost_estimate=pl.CostEstimate(flops=flops,
                                      transcendentals=transcendentals,
                                      bytes_accessed=bytes_accessed),
    )(obs, h0s,
      packed["wih"], packed["whh"], packed["w_hid"], packed["w_pv"],
      packed["w_out"], packed["biases"])

    log_probs = out_full[:, :A]                    # normalized Categorical log-probs
    value = out_full[:, A]                         # (B_total,)
    recurrent_cell = h_final[:, :H].reshape(1, N, H)
    return [log_probs], value, recurrent_cell


# ----------------------------------------------------------------------------
# Deterministic parameter init (mirrors torch orthogonal_ with gain)
# ----------------------------------------------------------------------------
def orthogonal(key, shape, gain):
    rows, cols = shape
    a = jax.random.normal(key, (max(rows, cols), min(rows, cols)), dtype=jnp.float32)
    q, r = jnp.linalg.qr(a)
    q = q * jnp.sign(jnp.diagonal(r))[None, :]
    if rows < cols:
        q = q.T
    return (gain * q[:rows, :cols]).astype(jnp.float32)


def init_params(key, obs_dim, rnn_hidden, hidden_size, num_actions):
    g2 = 2.0 ** 0.5
    keys = jax.random.split(key, 8)
    return {
        "w_ih": orthogonal(keys[0], (3 * rnn_hidden, obs_dim), g2),
        "w_hh": orthogonal(keys[1], (3 * rnn_hidden, rnn_hidden), g2),
        "b_ih": jnp.zeros((3 * rnn_hidden,), jnp.float32),
        "b_hh": jnp.zeros((3 * rnn_hidden,), jnp.float32),
        "w_hidden": orthogonal(keys[2], (hidden_size, rnn_hidden), g2),
        "b_hidden": jnp.zeros((hidden_size,), jnp.float32),
        "w_policy": orthogonal(keys[3], (hidden_size, hidden_size), g2),
        "b_policy": jnp.zeros((hidden_size,), jnp.float32),
        "w_value_h": orthogonal(keys[4], (hidden_size, hidden_size), g2),
        "b_value_h": jnp.zeros((hidden_size,), jnp.float32),
        "w_branch": orthogonal(keys[5], (num_actions, hidden_size), 0.01 ** 0.5),
        "b_branch": jnp.zeros((num_actions,), jnp.float32),
        "w_value": orthogonal(keys[6], (1, hidden_size), 1.0),
        "b_value": jnp.zeros((1,), jnp.float32),
    }


# ----------------------------------------------------------------------------
# Pure-JAX reference (mirrors the PyTorch module exactly) for validation
# ----------------------------------------------------------------------------
def reference_forward(obs, h0, params, *, sequence_length):
    B, D = obs.shape
    T = sequence_length
    N = B // T
    H = params["w_hh"].shape[1]
    x = obs.reshape(N, T, D)
    h = h0[0]                                              # (N, H)
    ys = []
    for t in range(T):
        gi = x[:, t, :] @ params["w_ih"].T + params["b_ih"]
        gh = h @ params["w_hh"].T + params["b_hh"]
        i_r, i_z, i_n = jnp.split(gi, 3, axis=1)
        h_r, h_z, h_n = jnp.split(gh, 3, axis=1)
        r = jax.nn.sigmoid(i_r + h_r)
        z = jax.nn.sigmoid(i_z + h_z)
        n = jnp.tanh(i_n + r * h_n)
        h = (1.0 - z) * n + z * h
        ys.append(h)
    y = jnp.stack(ys, axis=1).reshape(B, H)
    hmid = jax.nn.relu(y @ params["w_hidden"].T + params["b_hidden"])
    hp = jax.nn.relu(hmid @ params["w_policy"].T + params["b_policy"])
    hv = jax.nn.relu(hmid @ params["w_value_h"].T + params["b_value_h"])
    value = (hv @ params["w_value"].T + params["b_value"]).reshape(-1)
    logits = hp @ params["w_branch"].T + params["b_branch"]
    return jax.nn.log_softmax(logits, axis=-1), value, h[None]


# ----------------------------------------------------------------------------
if __name__ == "__main__":
    OBS_DIM = 64          # observation_space.shape == (64,)
    RNN_HIDDEN = 64       # recurrence['hidden_state_size']
    HIDDEN = 64           # config['hidden_layer_size']
    NUM_ACTIONS = 5       # action_space_shape == (5,) -> one policy branch
    SEQ_LEN = 8           # sequence_length
    NUM_SEQ = 16          # number of sequences -> NB=8, grid=(2,)
    B_TOTAL = NUM_SEQ * SEQ_LEN

    key = jax.random.PRNGKey(0)
    k_obs, k_param = jax.random.split(key)

    obs = jax.random.normal(k_obs, (B_TOTAL, OBS_DIM), dtype=jnp.float32)
    # init_recurrent_cell_states: zeros, shape (1, num_sequences, H)
    h0 = jnp.zeros((1, NUM_SEQ, RNN_HIDDEN), jnp.float32)

    params = init_params(k_param, OBS_DIM, RNN_HIDDEN, HIDDEN, NUM_ACTIONS)
    ref_logp, ref_value, ref_cell = reference_forward(
        obs, h0, params, sequence_length=SEQ_LEN)

    # --- exact f32 path: tight validation against the PyTorch-equivalent ref ---
    packed_f32 = pack_params(params, num_actions=NUM_ACTIONS, use_bf16=False)
    pi, value, cell = actor_critic_forward(obs, h0, packed_f32,
                                           sequence_length=SEQ_LEN)
    jax.block_until_ready((pi, value, cell))
    assert pi[0].shape == (B_TOTAL, NUM_ACTIONS)
    assert value.shape == (B_TOTAL,)
    assert cell.shape == (1, NUM_SEQ, RNN_HIDDEN)
    assert jnp.allclose(jnp.sum(jnp.exp(pi[0]), axis=-1), 1.0, atol=1e-5)
    assert jnp.allclose(pi[0], ref_logp, atol=1e-3, rtol=1e-3)
    assert jnp.allclose(value, ref_value, atol=1e-3, rtol=1e-3)
    assert jnp.allclose(cell, ref_cell, atol=1e-3, rtol=1e-3)

    # --- fast path: bf16 operands on off-critical-path matmuls (f32 accumulate,
    #     f32 recurrence); looser tolerance accounts for bf16 operand rounding.
    packed_bf16 = pack_params(params, num_actions=NUM_ACTIONS, use_bf16=True)
    pi_b, value_b, cell_b = actor_critic_forward(obs, h0, packed_bf16,
                                                 sequence_length=SEQ_LEN)
    jax.block_until_ready((pi_b, value_b, cell_b))
    assert jnp.allclose(jnp.sum(jnp.exp(pi_b[0]), axis=-1), 1.0, atol=1e-5)
    assert jnp.allclose(pi_b[0], ref_logp, atol=5e-2, rtol=5e-2)
    assert jnp.allclose(value_b, ref_value, atol=5e-2, rtol=5e-2)
    assert jnp.allclose(cell_b, ref_cell, atol=5e-2, rtol=5e-2)

    print("KERNEL_OK")
</pallas_src>

<mosaic_0001>
module attributes {stable_mosaic.version = 11 : i64} {
  func.func @fused_actor_critic_kernel(%arg0: i32, %arg1: memref<64x64xf32, #tpu.memory_space<vmem>>, %arg2: memref<8x64xf32, #tpu.memory_space<vmem>>, %arg3: memref<64x384xf32, #tpu.memory_space<vmem>>, %arg4: memref<128x384xf32, #tpu.memory_space<vmem>>, %arg5: memref<128x128xf32, #tpu.memory_space<vmem>>, %arg6: memref<128x256xf32, #tpu.memory_space<vmem>>, %arg7: memref<256x128xf32, #tpu.memory_space<vmem>>, %arg8: memref<8x384xf32, #tpu.memory_space<vmem>>, %arg9: memref<64x128xf32, #tpu.memory_space<vmem>>, %arg10: memref<8x128xf32, #tpu.memory_space<vmem>>, %arg11: memref<8x8x384xf32, #tpu.memory_space<vmem>>, %arg12: memref<8x8x128xf32, #tpu.memory_space<vmem>>) attributes {dimension_semantics = [#tpu.dimension_semantics<parallel>], iteration_bounds = array<i64: 2>, scalar_prefetch = 0 : i64, scratch_operands = 2 : i64, tpu.core_type = #tpu.core_type<tc>, window_params = [{transform_indices = @transform_0, window_bounds = array<i64: 64, 64>}, {transform_indices = @transform_1, window_bounds = array<i64: 8, 64>}, {pipeline_mode = #tpu.pipeline_mode<synchronous>, transform_indices = @transform_2, window_bounds = array<i64: 64, 384>}, {pipeline_mode = #tpu.pipeline_mode<synchronous>, transform_indices = @transform_3, window_bounds = array<i64: 128, 384>}, {pipeline_mode = #tpu.pipeline_mode<synchronous>, transform_indices = @transform_4, window_bounds = array<i64: 128, 128>}, {pipeline_mode = #tpu.pipeline_mode<synchronous>, transform_indices = @transform_5, window_bounds = array<i64: 128, 256>}, {pipeline_mode = #tpu.pipeline_mode<synchronous>, transform_indices = @transform_6, window_bounds = array<i64: 256, 128>}, {pipeline_mode = #tpu.pipeline_mode<synchronous>, transform_indices = @transform_7, window_bounds = array<i64: 8, 384>}, {transform_indices = @transform_8, window_bounds = array<i64: 64, 128>}, {transform_indices = @transform_9, window_bounds = array<i64: 8, 128>}]} {
    %c0 = arith.constant 0 : index
    %c0_0 = arith.constant 0 : index
    %0 = vector.load %arg8[%c0, %c0_0] : memref<8x384xf32, #tpu.memory_space<vmem>>, vector<1x384xf32>
    %c1 = arith.constant 1 : index
    %c0_1 = arith.constant 0 : index
    %1 = vector.load %arg8[%c1, %c0_1] : memref<8x384xf32, #tpu.memory_space<vmem>>, vector<1x128xf32>
    %c2 = arith.constant 2 : index
    %c0_2 = arith.constant 0 : index
    %2 = vector.load %arg8[%c2, %c0_2] : memref<8x384xf32, #tpu.memory_space<vmem>>, vector<1x128xf32>
    %c3 = arith.constant 3 : index
    %c0_3 = arith.constant 0 : index
    %3 = vector.load %arg8[%c3, %c0_3] : memref<8x384xf32, #tpu.memory_space<vmem>>, vector<1x256xf32>
    %c4 = arith.constant 4 : index
    %c0_4 = arith.constant 0 : index
    %4 = vector.load %arg8[%c4, %c0_4] : memref<8x384xf32, #tpu.memory_space<vmem>>, vector<1x128xf32>
    %c0_5 = arith.constant 0 : index
    %c0_6 = arith.constant 0 : index
    %5 = vector.load %arg1[%c0_5, %c0_6] : memref<64x64xf32, #tpu.memory_space<vmem>>, vector<64x64xf32>
    %6 = vector.shape_cast %5 : vector<64x64xf32> to vector<8x8x64xf32>
    %7 = tpu.transpose %6, [1, 0, 2] : vector<8x8x64xf32> -> vector<8x8x64xf32>
    %8 = vector.shape_cast %7 : vector<8x8x64xf32> to vector<64x64xf32>
    %c0_7 = arith.constant 0 : index
    %c0_8 = arith.constant 0 : index
    %9 = vector.load %arg3[%c0_7, %c0_8] : memref<64x384xf32, #tpu.memory_space<vmem>>, vector<64x384xf32>
    %cst = arith.constant dense<0.000000e+00> : vector<64x384xf32>
    %10 = tpu.matmul %8, %9, %cst {dimension_numbers = #tpu.dot_dimension_numbers<[1], [0], [0], [1], [0, 0, 1, 1], [], []>} : vector<64x64xf32>, vector<64x384xf32>, vector<64x384xf32> -> vector<64x384xf32>
    %11 = vector.broadcast %0 : vector<1x384xf32> to vector<64x384xf32>
    %12 = arith.addf %10, %11 : vector<64x384xf32>
    %13 = vector.shape_cast %12 : vector<64x384xf32> to vector<8x8x384xf32>
    %c0_9 = arith.constant 0 : index
    %c0_10 = arith.constant 0 : index
    %c0_11 = arith.constant 0 : index
    %14 = vector.load %arg11[%c0_9, %c0_10, %c0_11] : memref<8x8x384xf32, #tpu.memory_space<vmem>>, vector<8x8x384xf32>
    tpu.vector_store %arg11[%c0_9, %c0_10, %c0_11], %13 {strides = array<i32>} : memref<8x8x384xf32, #tpu.memory_space<vmem>>, vector<8x8x384xf32>,
    %c0_12 = arith.constant 0 : index
    %c0_13 = arith.constant 0 : index
    %15 = vector.load %arg2[%c0_12, %c0_13] : memref<8x64xf32, #tpu.memory_space<vmem>>, vector<8x64xf32>
    %cst_14 = arith.constant 0.000000e+00 : f32
    %16 = vector.broadcast %cst_14 : f32 to vector<8x64xf32>
    %17 = tpu.concatenate %15, %16 in 1 : vector<8x64xf32>, vector<8x64xf32> -> vector<8x128xf32>
    %c0_15 = arith.constant 0 : index
    %c0_16 = arith.constant 0 : index
    %18 = vector.load %arg4[%c0_15, %c0_16] : memref<128x384xf32, #tpu.memory_space<vmem>>, vector<128x384xf32>
    %c0_17 = arith.constant 0 : index
    %c0_18 = arith.constant 0 : index
    %c0_19 = arith.constant 0 : index
    %19 = vector.load %arg11[%c0_17, %c0_18, %c0_19] : memref<8x8x384xf32, #tpu.memory_space<vmem>>, vector<1x8x384xf32>
    %20 = vector.shape_cast %19 : vector<1x8x384xf32> to vector<8x384xf32>
    %cst_20 = arith.constant dense<0.000000e+00> : vector<8x384xf32>
    %21 = tpu.matmul %17, %18, %cst_20 {dimension_numbers = #tpu.dot_dimension_numbers<[1], [0], [0], [1], [0, 0, 1, 1], [], []>} : vector<8x128xf32>, vector<128x384xf32>, vector<8x384xf32> -> vector<8x384xf32>
    %22 = vector.extract_strided_slice %20 {offsets = [0, 0], sizes = [8, 128], strides = [1, 1]} : vector<8x384xf32> to vector<8x128xf32>
    %23 = vector.extract_strided_slice %21 {offsets = [0, 0], sizes = [8, 128], strides = [1, 1]} : vector<8x384xf32> to vector<8x128xf32>
    %24 = arith.addf %22, %23 : vector<8x128xf32>
    %25 = arith.negf %24 : vector<8x128xf32>
    %26 = math.exp %25 : vector<8x128xf32>
    %cst_21 = arith.constant 1.000000e+00 : f32
    %27 = vector.broadcast %cst_21 : f32 to vector<8x128xf32>
    %28 = arith.addf %27, %26 : vector<8x128xf32>
    %29 = arith.divf %27, %28 : vector<8x128xf32>
    %30 = vector.extract_strided_slice %20 {offsets = [0, 128], sizes = [8, 128], strides = [1, 1]} : vector<8x384xf32> to vector<8x128xf32>
    %31 = vector.extract_strided_slice %21 {offsets = [0, 128], sizes = [8, 128], strides = [1, 1]} : vector<8x384xf32> to vector<8x128xf32>
    %32 = arith.addf %30, %31 : vector<8x128xf32>
    %33 = arith.negf %32 : vector<8x128xf32>
    %34 = math.exp %33 : vector<8x128xf32>
    %cst_22 = arith.constant 1.000000e+00 : f32
    %35 = vector.broadcast %cst_22 : f32 to vector<8x128xf32>
    %36 = arith.addf %35, %34 : vector<8x128xf32>
    %37 = arith.divf %35, %36 : vector<8x128xf32>
    %38 = vector.extract_strided_slice %20 {offsets = [0, 256], sizes = [8, 128], strides = [1, 1]} : vector<8x384xf32> to vector<8x128xf32>
    %39 = vector.extract_strided_slice %21 {offsets = [0, 256], sizes = [8, 128], strides = [1, 1]} : vector<8x384xf32> to vector<8x128xf32>
    %40 = vector.broadcast %1 : vector<1x128xf32> to vector<8x128xf32>
    %41 = arith.addf %39, %40 : vector<8x128xf32>
    %42 = arith.mulf %29, %41 : vector<8x128xf32>
    %43 = arith.addf %38, %42 : vector<8x128xf32>
    %44 = math.tanh %43 : vector<8x128xf32>
    %cst_23 = arith.constant 1.000000e+00 : f32
    %45 = vector.broadcast %cst_23 : f32 to vector<8x128xf32>
    %46 = arith.subf %45, %37 : vector<8x128xf32>
    %47 = arith.mulf %46, %44 : vector<8x128xf32>
    %48 = arith.mulf %37, %17 : vector<8x128xf32>
    %49 = arith.addf %47, %48 : vector<8x128xf32>
    %c0_24 = arith.constant 0 : index
    %c0_25 = arith.constant 0 : index
    %c0_26 = arith.constant 0 : index
    %50 = vector.load %arg12[%c0_24, %c0_25, %c0_26] : memref<8x8x128xf32, #tpu.memory_space<vmem>>, vector<1x8x128xf32>
    %51 = vector.shape_cast %50 : vector<1x8x128xf32> to vector<8x128xf32>
    %52 = vector.shape_cast %49 : vector<8x128xf32> to vector<1x8x128xf32>
    tpu.vector_store %arg12[%c0_24, %c0_25, %c0_26], %52 {strides = array<i32>} : memref<8x8x128xf32, #tpu.memory_space<vmem>>, vector<1x8x128xf32>,
    %c1_27 = arith.constant 1 : index
    %c0_28 = arith.constant 0 : index
    %c0_29 = arith.constant 0 : index
    %53 = vector.load %arg11[%c1_27, %c0_28, %c0_29] : memref<8x8x384xf32, #tpu.memory_space<vmem>>, vector<1x8x384xf32>
    %54 = vector.shape_cast %53 : vector<1x8x384xf32> to vector<8x384xf32>
    %cst_30 = arith.constant dense<0.000000e+00> : vector<8x384xf32>
    %55 = tpu.matmul %49, %18, %cst_30 {dimension_numbers = #tpu.dot_dimension_numbers<[1], [0], [0], [1], [0, 0, 1, 1], [], []>} : vector<8x128xf32>, vector<128x384xf32>, vector<8x384xf32> -> vector<8x384xf32>
    %56 = vector.extract_strided_slice %54 {offsets = [0, 0], sizes = [8, 128], strides = [1, 1]} : vector<8x384xf32> to vector<8x128xf32>
    %57 = vector.extract_strided_slice %55 {offsets = [0, 0], sizes = [8, 128], strides = [1, 1]} : vector<8x384xf32> to vector<8x128xf32>
    %58 = arith.addf %56, %57 : vector<8x128xf32>
    %59 = arith.negf %58 : vector<8x128xf32>
    %60 = math.exp %59 : vector<8x128xf32>
    %cst_31 = arith.constant 1.000000e+00 : f32
    %61 = vector.broadcast %cst_31 : f32 to vector<8x128xf32>
    %62 = arith.addf %61, %60 : vector<8x128xf32>
    %63 = arith.divf %61, %62 : vector<8x128xf32>
    %64 = vector.extract_strided_slice %54 {offsets = [0, 128], sizes = [8, 128], strides = [1, 1]} : vector<8x384xf32> to vector<8x128xf32>
    %65 = vector.extract_strided_slice %55 {offsets = [0, 128], sizes = [8, 128], strides = [1, 1]} : vector<8x384xf32> to vector<8x128xf32>
    %66 = arith.addf %64, %65 : vector<8x128xf32>
    %67 = arith.negf %66 : vector<8x128xf32>
    %68 = math.exp %67 : vector<8x128xf32>
    %cst_32 = arith.constant 1.000000e+00 : f32
    %69 = vector.broadcast %cst_32 : f32 to vector<8x128xf32>
    %70 = arith.addf %69, %68 : vector<8x128xf32>
    %71 = arith.divf %69, %70 : vector<8x128xf32>
    %72 = vector.extract_strided_slice %54 {offsets = [0, 256], sizes = [8, 128], strides = [1, 1]} : vector<8x384xf32> to vector<8x128xf32>
    %73 = vector.extract_strided_slice %55 {offsets = [0, 256], sizes = [8, 128], strides = [1, 1]} : vector<8x384xf32> to vector<8x128xf32>
    %74 = vector.broadcast %1 : vector<1x128xf32> to vector<8x128xf32>
    %75 = arith.addf %73, %74 : vector<8x128xf32>
    %76 = arith.mulf %63, %75 : vector<8x128xf32>
    %77 = arith.addf %72, %76 : vector<8x128xf32>
    %78 = math.tanh %77 : vector<8x128xf32>
    %cst_33 = arith.constant 1.000000e+00 : f32
    %79 = vector.broadcast %cst_33 : f32 to vector<8x128xf32>
    %80 = arith.subf %79, %71 : vector<8x128xf32>
    %81 = arith.mulf %80, %78 : vector<8x128xf32>
    %82 = arith.mulf %71, %49 : vector<8x128xf32>
    %83 = arith.addf %81, %82 : vector<8x128xf32>
    %c1_34 = arith.constant 1 : index
    %c0_35 = arith.constant 0 : index
    %c0_36 = arith.constant 0 : index
    %84 = vector.load %arg12[%c1_34, %c0_35, %c0_36] : memref<8x8x128xf32, #tpu.memory_space<vmem>>, vector<1x8x128xf32>
    %85 = vector.shape_cast %84 : vector<1x8x128xf32> to vector<8x128xf32>
    %86 = vector.shape_cast %83 : vector<8x128xf32> to vector<1x8x128xf32>
    tpu.vector_store %arg12[%c1_34, %c0_35, %c0_36], %86 {strides = array<i32>} : memref<8x8x128xf32, #tpu.memory_space<vmem>>, vector<1x8x128xf32>,
    %c2_37 = arith.constant 2 : index
    %c0_38 = arith.constant 0 : index
    %c0_39 = arith.constant 0 : index
    %87 = vector.load %arg11[%c2_37, %c0_38, %c0_39] : memref<8x8x384xf32, #tpu.memory_space<vmem>>, vector<1x8x384xf32>
    %88 = vector.shape_cast %87 : vector<1x8x384xf32> to vector<8x384xf32>
    %cst_40 = arith.constant dense<0.000000e+00> : vector<8x384xf32>
    %89 = tpu.matmul %83, %18, %cst_40 {dimension_numbers = #tpu.dot_dimension_numbers<[1], [0], [0], [1], [0, 0, 1, 1], [], []>} : vector<8x128xf32>, vector<128x384xf32>, vector<8x384xf32> -> vector<8x384xf32>
    %90 = vector.extract_strided_slice %88 {offsets = [0, 0], sizes = [8, 128], strides = [1, 1]} : vector<8x384xf32> to vector<8x128xf32>
    %91 = vector.extract_strided_slice %89 {offsets = [0, 0], sizes = [8, 128], strides = [1, 1]} : vector<8x384xf32> to vector<8x128xf32>
    %92 = arith.addf %90, %91 : vector<8x128xf32>
    %93 = arith.negf %92 : vector<8x128xf32>
    %94 = math.exp %93 : vector<8x128xf32>
    %cst_41 = arith.constant 1.000000e+00 : f32
    %95 = vector.broadcast %cst_41 : f32 to vector<8x128xf32>
    %96 = arith.addf %95, %94 : vector<8x128xf32>
    %97 = arith.divf %95, %96 : vector<8x128xf32>
    %98 = vector.extract_strided_slice %88 {offsets = [0, 128], sizes = [8, 128], strides = [1, 1]} : vector<8x384xf32> to vector<8x128xf32>
    %99 = vector.extract_strided_slice %89 {offsets = [0, 128], sizes = [8, 128], strides = [1, 1]} : vector<8x384xf32> to vector<8x128xf32>
    %100 = arith.addf %98, %99 : vector<8x128xf32>
    %101 = arith.negf %100 : vector<8x128xf32>
    %102 = math.exp %101 : vector<8x128xf32>
    %cst_42 = arith.constant 1.000000e+00 : f32
    %103 = vector.broadcast %cst_42 : f32 to vector<8x128xf32>
    %104 = arith.addf %103, %102 : vector<8x128xf32>
    %105 = arith.divf %103, %104 : vector<8x128xf32>
    %106 = vector.extract_strided_slice %88 {offsets = [0, 256], sizes = [8, 128], strides = [1, 1]} : vector<8x384xf32> to vector<8x128xf32>
    %107 = vector.extract_strided_slice %89 {offsets = [0, 256], sizes = [8, 128], strides = [1, 1]} : vector<8x384xf32> to vector<8x128xf32>
    %108 = vector.broadcast %1 : vector<1x128xf32> to vector<8x128xf32>
    %109 = arith.addf %107, %108 : vector<8x128xf32>
    %110 = arith.mulf %97, %109 : vector<8x128xf32>
    %111 = arith.addf %106, %110 : vector<8x128xf32>
    %112 = math.tanh %111 : vector<8x128xf32>
    %cst_43 = arith.constant 1.000000e+00 : f32
    %113 = vector.broadcast %cst_43 : f32 to vector<8x128xf32>
    %114 = arith.subf %113, %105 : vector<8x128xf32>
    %115 = arith.mulf %114, %112 : vector<8x128xf32>
    %116 = arith.mulf %105, %83 : vector<8x128xf32>
    %117 = arith.addf %115, %116 : vector<8x128xf32>
    %c2_44 = arith.constant 2 : index
    %c0_45 = arith.constant 0 : index
    %c0_46 = arith.constant 0 : index
    %118 = vector.load %arg12[%c2_44, %c0_45, %c0_46] : memref<8x8x128xf32, #tpu.memory_space<vmem>>, vector<1x8x128xf32>
    %119 = vector.shape_cast %118 : vector<1x8x128xf32> to vector<8x128xf32>
    %120 = vector.shape_cast %117 : vector<8x128xf32> to vector<1x8x128xf32>
    tpu.vector_store %arg12[%c2_44, %c0_45, %c0_46], %120 {strides = array<i32>} : memref<8x8x128xf32, #tpu.memory_space<vmem>>, vector<1x8x128xf32>,
    %c3_47 = arith.constant 3 : index
    %c0_48 = arith.constant 0 : index
    %c0_49 = arith.constant 0 : index
    %121 = vector.load %arg11[%c3_47, %c0_48, %c0_49] : memref<8x8x384xf32, #tpu.memory_space<vmem>>, vector<1x8x384xf32>
    %122 = vector.shape_cast %121 : vector<1x8x384xf32> to vector<8x384xf32>
    %cst_50 = arith.constant dense<0.000000e+00> : vector<8x384xf32>
    %123 = tpu.matmul %117, %18, %cst_50 {dimension_numbers = #tpu.dot_dimension_numbers<[1], [0], [0], [1], [0, 0, 1, 1], [], []>} : vector<8x128xf32>, vector<128x384xf32>, vector<8x384xf32> -> vector<8x384xf32>
    %124 = vector.extract_strided_slice %122 {offsets = [0, 0], sizes = [8, 128], strides = [1, 1]} : vector<8x384xf32> to vector<8x128xf32>
    %125 = vector.extract_strided_slice %123 {offsets = [0, 0], sizes = [8, 128], strides = [1, 1]} : vector<8x384xf32> to vector<8x128xf32>
    %126 = arith.addf %124, %125 : vector<8x128xf32>
    %127 = arith.negf %126 : vector<8x128xf32>
    %128 = math.exp %127 : vector<8x128xf32>
    %cst_51 = arith.constant 1.000000e+00 : f32
    %129 = vector.broadcast %cst_51 : f32 to vector<8x128xf32>
    %130 = arith.addf %129, %128 : vector<8x128xf32>
    %131 = arith.divf %129, %130 : vector<8x128xf32>
    %132 = vector.extract_strided_slice %122 {offsets = [0, 128], sizes = [8, 128], strides = [1, 1]} : vector<8x384xf32> to vector<8x128xf32>
    %133 = vector.extract_strided_slice %123 {offsets = [0, 128], sizes = [8, 128], strides = [1, 1]} : vector<8x384xf32> to vector<8x128xf32>
    %134 = arith.addf %132, %133 : vector<8x128xf32>
    %135 = arith.negf %134 : vector<8x128xf32>
    %136 = math.exp %135 : vector<8x128xf32>
    %cst_52 = arith.constant 1.000000e+00 : f32
    %137 = vector.broadcast %cst_52 : f32 to vector<8x128xf32>
    %138 = arith.addf %137, %136 : vector<8x128xf32>
    %139 = arith.divf %137, %138 : vector<8x128xf32>
    %140 = vector.extract_strided_slice %122 {offsets = [0, 256], sizes = [8, 128], strides = [1, 1]} : vector<8x384xf32> to vector<8x128xf32>
    %141 = vector.extract_strided_slice %123 {offsets = [0, 256], sizes = [8, 128], strides = [1, 1]} : vector<8x384xf32> to vector<8x128xf32>
    %142 = vector.broadcast %1 : vector<1x128xf32> to vector<8x128xf32>
    %143 = arith.addf %141, %142 : vector<8x128xf32>
    %144 = arith.mulf %131, %143 : vector<8x128xf32>
    %145 = arith.addf %140, %144 : vector<8x128xf32>
    %146 = math.tanh %145 : vector<8x128xf32>
    %cst_53 = arith.constant 1.000000e+00 : f32
    %147 = vector.broadcast %cst_53 : f32 to vector<8x128xf32>
    %148 = arith.subf %147, %139 : vector<8x128xf32>
    %149 = arith.mulf %148, %146 : vector<8x128xf32>
    %150 = arith.mulf %139, %117 : vector<8x128xf32>
    %151 = arith.addf %149, %150 : vector<8x128xf32>
    %c3_54 = arith.constant 3 : index
    %c0_55 = arith.constant 0 : index
    %c0_56 = arith.constant 0 : index
    %152 = vector.load %arg12[%c3_54, %c0_55, %c0_56] : memref<8x8x128xf32, #tpu.memory_space<vmem>>, vector<1x8x128xf32>
    %153 = vector.shape_cast %152 : vector<1x8x128xf32> to vector<8x128xf32>
    %154 = vector.shape_cast %151 : vector<8x128xf32> to vector<1x8x128xf32>
    tpu.vector_store %arg12[%c3_54, %c0_55, %c0_56], %154 {strides = array<i32>} : memref<8x8x128xf32, #tpu.memory_space<vmem>>, vector<1x8x128xf32>,
    %c4_57 = arith.constant 4 : index
    %c0_58 = arith.constant 0 : index
    %c0_59 = arith.constant 0 : index
    %155 = vector.load %arg11[%c4_57, %c0_58, %c0_59] : memref<8x8x384xf32, #tpu.memory_space<vmem>>, vector<1x8x384xf32>
    %156 = vector.shape_cast %155 : vector<1x8x384xf32> to vector<8x384xf32>
    %cst_60 = arith.constant dense<0.000000e+00> : vector<8x384xf32>
    %157 = tpu.matmul %151, %18, %cst_60 {dimension_numbers = #tpu.dot_dimension_numbers<[1], [0], [0], [1], [0, 0, 1, 1], [], []>} : vector<8x128xf32>, vector<128x384xf32>, vector<8x384xf32> -> vector<8x384xf32>
    %158 = vector.extract_strided_slice %156 {offsets = [0, 0], sizes = [8, 128], strides = [1, 1]} : vector<8x384xf32> to vector<8x128xf32>
    %159 = vector.extract_strided_slice %157 {offsets = [0, 0], sizes = [8, 128], strides = [1, 1]} : vector<8x384xf32> to vector<8x128xf32>
    %160 = arith.addf %158, %159 : vector<8x128xf32>
    %161 = arith.negf %160 : vector<8x128xf32>
    %162 = math.exp %161 : vector<8x128xf32>
    %cst_61 = arith.constant 1.000000e+00 : f32
    %163 = vector.broadcast %cst_61 : f32 to vector<8x128xf32>
    %164 = arith.addf %163, %162 : vector<8x128xf32>
    %165 = arith.divf %163, %164 : vector<8x128xf32>
    %166 = vector.extract_strided_slice %156 {offsets = [0, 128], sizes = [8, 128], strides = [1, 1]} : vector<8x384xf32> to vector<8x128xf32>
    %167 = vector.extract_strided_slice %157 {offsets = [0, 128], sizes = [8, 128], strides = [1, 1]} : vector<8x384xf32> to vector<8x128xf32>
    %168 = arith.addf %166, %167 : vector<8x128xf32>
    %169 = arith.negf %168 : vector<8x128xf32>
    %170 = math.exp %169 : vector<8x128xf32>
    %cst_62 = arith.constant 1.000000e+00 : f32
    %171 = vector.broadcast %cst_62 : f32 to vector<8x128xf32>
    %172 = arith.addf %171, %170 : vector<8x128xf32>
    %173 = arith.divf %171, %172 : vector<8x128xf32>
    %174 = vector.extract_strided_slice %156 {offsets = [0, 256], sizes = [8, 128], strides = [1, 1]} : vector<8x384xf32> to vector<8x128xf32>
    %175 = vector.extract_strided_slice %157 {offsets = [0, 256], sizes = [8, 128], strides = [1, 1]} : vector<8x384xf32> to vector<8x128xf32>
    %176 = vector.broadcast %1 : vector<1x128xf32> to vector<8x128xf32>
    %177 = arith.addf %175, %176 : vector<8x128xf32>
    %178 = arith.mulf %165, %177 : vector<8x128xf32>
    %179 = arith.addf %174, %178 : vector<8x128xf32>
    %180 = math.tanh %179 : vector<8x128xf32>
    %cst_63 = arith.constant 1.000000e+00 : f32
    %181 = vector.broadcast %cst_63 : f32 to vector<8x128xf32>
    %182 = arith.subf %181, %173 : vector<8x128xf32>
    %183 = arith.mulf %182, %180 : vector<8x128xf32>
    %184 = arith.mulf %173, %151 : vector<8x128xf32>
    %185 = arith.addf %183, %184 : vector<8x128xf32>
    %c4_64 = arith.constant 4 : index
    %c0_65 = arith.constant 0 : index
    %c0_66 = arith.constant 0 : index
    %186 = vector.load %arg12[%c4_64, %c0_65, %c0_66] : memref<8x8x128xf32, #tpu.memory_space<vmem>>, vector<1x8x128xf32>
    %187 = vector.shape_cast %186 : vector<1x8x128xf32> to vector<8x128xf32>
    %188 = vector.shape_cast %185 : vector<8x128xf32> to vector<1x8x128xf32>
    tpu.vector_store %arg12[%c4_64, %c0_65, %c0_66], %188 {strides = array<i32>} : memref<8x8x128xf32, #tpu.memory_space<vmem>>, vector<1x8x128xf32>,
    %c5 = arith.constant 5 : index
    %c0_67 = arith.constant 0 : index
    %c0_68 = arith.constant 0 : index
    %189 = vector.load %arg11[%c5, %c0_67, %c0_68] : memref<8x8x384xf32, #tpu.memory_space<vmem>>, vector<1x8x384xf32>
    %190 = vector.shape_cast %189 : vector<1x8x384xf32> to vector<8x384xf32>
    %cst_69 = arith.constant dense<0.000000e+00> : vector<8x384xf32>
    %191 = tpu.matmul %185, %18, %cst_69 {dimension_numbers = #tpu.dot_dimension_numbers<[1], [0], [0], [1], [0, 0, 1, 1], [], []>} : vector<8x128xf32>, vector<128x384xf32>, vector<8x384xf32> -> vector<8x384xf32>
    %192 = vector.extract_strided_slice %190 {offsets = [0, 0], sizes = [8, 128], strides = [1, 1]} : vector<8x384xf32> to vector<8x128xf32>
    %193 = vector.extract_strided_slice %191 {offsets = [0, 0], sizes = [8, 128], strides = [1, 1]} : vector<8x384xf32> to vector<8x128xf32>
    %194 = arith.addf %192, %193 : vector<8x128xf32>
    %195 = arith.negf %194 : vector<8x128xf32>
    %196 = math.exp %195 : vector<8x128xf32>
    %cst_70 = arith.constant 1.000000e+00 : f32
    %197 = vector.broadcast %cst_70 : f32 to vector<8x128xf32>
    %198 = arith.addf %197, %196 : vector<8x128xf32>
    %199 = arith.divf %197, %198 : vector<8x128xf32>
    %200 = vector.extract_strided_slice %190 {offsets = [0, 128], sizes = [8, 128], strides = [1, 1]} : vector<8x384xf32> to vector<8x128xf32>
    %201 = vector.extract_strided_slice %191 {offsets = [0, 128], sizes = [8, 128], strides = [1, 1]} : vector<8x384xf32> to vector<8x128xf32>
    %202 = arith.addf %200, %201 : vector<8x128xf32>
    %203 = arith.negf %202 : vector<8x128xf32>
    %204 = math.exp %203 : vector<8x128xf32>
    %cst_71 = arith.constant 1.000000e+00 : f32
    %205 = vector.broadcast %cst_71 : f32 to vector<8x128xf32>
    %206 = arith.addf %205, %204 : vector<8x128xf32>
    %207 = arith.divf %205, %206 : vector<8x128xf32>
    %208 = vector.extract_strided_slice %190 {offsets = [0, 256], sizes = [8, 128], strides = [1, 1]} : vector<8x384xf32> to vector<8x128xf32>
    %209 = vector.extract_strided_slice %191 {offsets = [0, 256], sizes = [8, 128], strides = [1, 1]} : vector<8x384xf32> to vector<8x128xf32>
    %210 = vector.broadcast %1 : vector<1x128xf32> to vector<8x128xf32>
    %211 = arith.addf %209, %210 : vector<8x128xf32>
    %212 = arith.mulf %199, %211 : vector<8x128xf32>
    %213 = arith.addf %208, %212 : vector<8x128xf32>
    %214 = math.tanh %213 : vector<8x128xf32>
    %cst_72 = arith.constant 1.000000e+00 : f32
    %215 = vector.broadcast %cst_72 : f32 to vector<8x128xf32>
    %216 = arith.subf %215, %207 : vector<8x128xf32>
    %217 = arith.mulf %216, %214 : vector<8x128xf32>
    %218 = arith.mulf %207, %185 : vector<8x128xf32>
    %219 = arith.addf %217, %218 : vector<8x128xf32>
    %c5_73 = arith.constant 5 : index
    %c0_74 = arith.constant 0 : index
    %c0_75 = arith.constant 0 : index
    %220 = vector.load %arg12[%c5_73, %c0_74, %c0_75] : memref<8x8x128xf32, #tpu.memory_space<vmem>>, vector<1x8x128xf32>
    %221 = vector.shape_cast %220 : vector<1x8x128xf32> to vector<8x128xf32>
    %222 = vector.shape_cast %219 : vector<8x128xf32> to vector<1x8x128xf32>
    tpu.vector_store %arg12[%c5_73, %c0_74, %c0_75], %222 {strides = array<i32>} : memref<8x8x128xf32, #tpu.memory_space<vmem>>, vector<1x8x128xf32>,
    %c6 = arith.constant 6 : index
    %c0_76 = arith.constant 0 : index
    %c0_77 = arith.constant 0 : index
    %223 = vector.load %arg11[%c6, %c0_76, %c0_77] : memref<8x8x384xf32, #tpu.memory_space<vmem>>, vector<1x8x384xf32>
    %224 = vector.shape_cast %223 : vector<1x8x384xf32> to vector<8x384xf32>
    %cst_78 = arith.constant dense<0.000000e+00> : vector<8x384xf32>
    %225 = tpu.matmul %219, %18, %cst_78 {dimension_numbers = #tpu.dot_dimension_numbers<[1], [0], [0], [1], [0, 0, 1, 1], [], []>} : vector<8x128xf32>, vector<128x384xf32>, vector<8x384xf32> -> vector<8x384xf32>
    %226 = vector.extract_strided_slice %224 {offsets = [0, 0], sizes = [8, 128], strides = [1, 1]} : vector<8x384xf32> to vector<8x128xf32>
    %227 = vector.extract_strided_slice %225 {offsets = [0, 0], sizes = [8, 128], strides = [1, 1]} : vector<8x384xf32> to vector<8x128xf32>
    %228 = arith.addf %226, %227 : vector<8x128xf32>
    %229 = arith.negf %228 : vector<8x128xf32>
    %230 = math.exp %229 : vector<8x128xf32>
    %cst_79 = arith.constant 1.000000e+00 : f32
    %231 = vector.broadcast %cst_79 : f32 to vector<8x128xf32>
    %232 = arith.addf %231, %230 : vector<8x128xf32>
    %233 = arith.divf %231, %232 : vector<8x128xf32>
    %234 = vector.extract_strided_slice %224 {offsets = [0, 128], sizes = [8, 128], strides = [1, 1]} : vector<8x384xf32> to vector<8x128xf32>
    %235 = vector.extract_strided_slice %225 {offsets = [0, 128], sizes = [8, 128], strides = [1, 1]} : vector<8x384xf32> to vector<8x128xf32>
    %236 = arith.addf %234, %235 : vector<8x128xf32>
    %237 = arith.negf %236 : vector<8x128xf32>
    %238 = math.exp %237 : vector<8x128xf32>
    %cst_80 = arith.constant 1.000000e+00 : f32
    %239 = vector.broadcast %cst_80 : f32 to vector<8x128xf32>
    %240 = arith.addf %239, %238 : vector<8x128xf32>
    %241 = arith.divf %239, %240 : vector<8x128xf32>
    %242 = vector.extract_strided_slice %224 {offsets = [0, 256], sizes = [8, 128], strides = [1, 1]} : vector<8x384xf32> to vector<8x128xf32>
    %243 = vector.extract_strided_slice %225 {offsets = [0, 256], sizes = [8, 128], strides = [1, 1]} : vector<8x384xf32> to vector<8x128xf32>
    %244 = vector.broadcast %1 : vector<1x128xf32> to vector<8x128xf32>
    %245 = arith.addf %243, %244 : vector<8x128xf32>
    %246 = arith.mulf %233, %245 : vector<8x128xf32>
    %247 = arith.addf %242, %246 : vector<8x128xf32>
    %248 = math.tanh %247 : vector<8x128xf32>
    %cst_81 = arith.constant 1.000000e+00 : f32
    %249 = vector.broadcast %cst_81 : f32 to vector<8x128xf32>
    %250 = arith.subf %249, %241 : vector<8x128xf32>
    %251 = arith.mulf %250, %248 : vector<8x128xf32>
    %252 = arith.mulf %241, %219 : vector<8x128xf32>
    %253 = arith.addf %251, %252 : vector<8x128xf32>
    %c6_82 = arith.constant 6 : index
    %c0_83 = arith.constant 0 : index
    %c0_84 = arith.constant 0 : index
    %254 = vector.load %arg12[%c6_82, %c0_83, %c0_84] : memref<8x8x128xf32, #tpu.memory_space<vmem>>, vector<1x8x128xf32>
    %255 = vector.shape_cast %254 : vector<1x8x128xf32> to vector<8x128xf32>
    %256 = vector.shape_cast %253 : vector<8x128xf32> to vector<1x8x128xf32>
    tpu.vector_store %arg12[%c6_82, %c0_83, %c0_84], %256 {strides = array<i32>} : memref<8x8x128xf32, #tpu.memory_space<vmem>>, vector<1x8x128xf32>,
    %c7 = arith.constant 7 : index
    %c0_85 = arith.constant 0 : index
    %c0_86 = arith.constant 0 : index
    %257 = vector.load %arg11[%c7, %c0_85, %c0_86] : memref<8x8x384xf32, #tpu.memory_space<vmem>>, vector<1x8x384xf32>
    %258 = vector.shape_cast %257 : vector<1x8x384xf32> to vector<8x384xf32>
    %cst_87 = arith.constant dense<0.000000e+00> : vector<8x384xf32>
    %259 = tpu.matmul %253, %18, %cst_87 {dimension_numbers = #tpu.dot_dimension_numbers<[1], [0], [0], [1], [0, 0, 1, 1], [], []>} : vector<8x128xf32>, vector<128x384xf32>, vector<8x384xf32> -> vector<8x384xf32>
    %260 = vector.extract_strided_slice %258 {offsets = [0, 0], sizes = [8, 128], strides = [1, 1]} : vector<8x384xf32> to vector<8x128xf32>
    %261 = vector.extract_strided_slice %259 {offsets = [0, 0], sizes = [8, 128], strides = [1, 1]} : vector<8x384xf32> to vector<8x128xf32>
    %262 = arith.addf %260, %261 : vector<8x128xf32>
    %263 = arith.negf %262 : vector<8x128xf32>
    %264 = math.exp %263 : vector<8x128xf32>
    %cst_88 = arith.constant 1.000000e+00 : f32
    %265 = vector.broadcast %cst_88 : f32 to vector<8x128xf32>
    %266 = arith.addf %265, %264 : vector<8x128xf32>
    %267 = arith.divf %265, %266 : vector<8x128xf32>
    %268 = vector.extract_strided_slice %258 {offsets = [0, 128], sizes = [8, 128], strides = [1, 1]} : vector<8x384xf32> to vector<8x128xf32>
    %269 = vector.extract_strided_slice %259 {offsets = [0, 128], sizes = [8, 128], strides = [1, 1]} : vector<8x384xf32> to vector<8x128xf32>
    %270 = arith.addf %268, %269 : vector<8x128xf32>
    %271 = arith.negf %270 : vector<8x128xf32>
    %272 = math.exp %271 : vector<8x128xf32>
    %cst_89 = arith.constant 1.000000e+00 : f32
    %273 = vector.broadcast %cst_89 : f32 to vector<8x128xf32>
    %274 = arith.addf %273, %272 : vector<8x128xf32>
    %275 = arith.divf %273, %274 : vector<8x128xf32>
    %276 = vector.extract_strided_slice %258 {offsets = [0, 256], sizes = [8, 128], strides = [1, 1]} : vector<8x384xf32> to vector<8x128xf32>
    %277 = vector.extract_strided_slice %259 {offsets = [0, 256], sizes = [8, 128], strides = [1, 1]} : vector<8x384xf32> to vector<8x128xf32>
    %278 = vector.broadcast %1 : vector<1x128xf32> to vector<8x128xf32>
    %279 = arith.addf %277, %278 : vector<8x128xf32>
    %280 = arith.mulf %267, %279 : vector<8x128xf32>
    %281 = arith.addf %276, %280 : vector<8x128xf32>
    %282 = math.tanh %281 : vector<8x128xf32>
    %cst_90 = arith.constant 1.000000e+00 : f32
    %283 = vector.broadcast %cst_90 : f32 to vector<8x128xf32>
    %284 = arith.subf %283, %275 : vector<8x128xf32>
    %285 = arith.mulf %284, %282 : vector<8x128xf32>
    %286 = arith.mulf %275, %253 : vector<8x128xf32>
    %287 = arith.addf %285, %286 : vector<8x128xf32>
    %c7_91 = arith.constant 7 : index
    %c0_92 = arith.constant 0 : index
    %c0_93 = arith.constant 0 : index
    %288 = vector.load %arg12[%c7_91, %c0_92, %c0_93] : memref<8x8x128xf32, #tpu.memory_space<vmem>>, vector<1x8x128xf32>
    %289 = vector.shape_cast %288 : vector<1x8x128xf32> to vector<8x128xf32>
    %290 = vector.shape_cast %287 : vector<8x128xf32> to vector<1x8x128xf32>
    tpu.vector_store %arg12[%c7_91, %c0_92, %c0_93], %290 {strides = array<i32>} : memref<8x8x128xf32, #tpu.memory_space<vmem>>, vector<1x8x128xf32>,
    %c0_94 = arith.constant 0 : index
    %c0_95 = arith.constant 0 : index
    %291 = vector.load %arg10[%c0_94, %c0_95] : memref<8x128xf32, #tpu.memory_space<vmem>>, vector<8x128xf32>
    tpu.vector_store %arg10[%c0_94, %c0_95], %287 {strides = array<i32>} : memref<8x128xf32, #tpu.memory_space<vmem>>, vector<8x128xf32>,
    %c0_96 = arith.constant 0 : index
    %c0_97 = arith.constant 0 : index
    %c0_98 = arith.constant 0 : index
    %292 = vector.load %arg12[%c0_96, %c0_97, %c0_98] : memref<8x8x128xf32, #tpu.memory_space<vmem>>, vector<8x8x128xf32>
    %293 = tpu.transpose %292, [1, 0, 2] : vector<8x8x128xf32> -> vector<8x8x128xf32>
    %294 = vector.shape_cast %293 : vector<8x8x128xf32> to vector<64x128xf32>
    %c0_99 = arith.constant 0 : index
    %c0_100 = arith.constant 0 : index
    %295 = vector.load %arg5[%c0_99, %c0_100] : memref<128x128xf32, #tpu.memory_space<vmem>>, vector<128x128xf32>
    %cst_101 = arith.constant dense<0.000000e+00> : vector<64x128xf32>
    %296 = tpu.matmul %294, %295, %cst_101 {dimension_numbers = #tpu.dot_dimension_numbers<[1], [0], [0], [1], [0, 0, 1, 1], [], []>} : vector<64x128xf32>, vector<128x128xf32>, vector<64x128xf32> -> vector<64x128xf32>
    %297 = vector.broadcast %2 : vector<1x128xf32> to vector<64x128xf32>
    %298 = arith.addf %296, %297 : vector<64x128xf32>
    %cst_102 = arith.constant 0.000000e+00 : f32
    %299 = vector.broadcast %cst_102 : f32 to vector<64x128xf32>
    %300 = arith.maximumf %298, %299 : vector<64x128xf32>
    %c0_103 = arith.constant 0 : index
    %c0_104 = arith.constant 0 : index
    %301 = vector.load %arg6[%c0_103, %c0_104] : memref<128x256xf32, #tpu.memory_space<vmem>>, vector<128x256xf32>
    %cst_105 = arith.constant dense<0.000000e+00> : vector<64x256xf32>
    %302 = tpu.matmul %300, %301, %cst_105 {dimension_numbers = #tpu.dot_dimension_numbers<[1], [0], [0], [1], [0, 0, 1, 1], [], []>} : vector<64x128xf32>, vector<128x256xf32>, vector<64x256xf32> -> vector<64x256xf32>
    %303 = vector.broadcast %3 : vector<1x256xf32> to vector<64x256xf32>
    %304 = arith.addf %302, %303 : vector<64x256xf32>
    %cst_106 = arith.constant 0.000000e+00 : f32
    %305 = vector.broadcast %cst_106 : f32 to vector<64x256xf32>
    %306 = arith.maximumf %304, %305 : vector<64x256xf32>
    %c0_107 = arith.constant 0 : index
    %c0_108 = arith.constant 0 : index
    %307 = vector.load %arg7[%c0_107, %c0_108] : memref<256x128xf32, #tpu.memory_space<vmem>>, vector<256x128xf32>
    %cst_109 = arith.constant dense<0.000000e+00> : vector<64x128xf32>
    %308 = tpu.matmul %306, %307, %cst_109 {dimension_numbers = #tpu.dot_dimension_numbers<[1], [0], [0], [1], [0, 0, 1, 1], [], []>} : vector<64x256xf32>, vector<256x128xf32>, vector<64x128xf32> -> vector<64x128xf32>
    %309 = vector.broadcast %4 : vector<1x128xf32> to vector<64x128xf32>
    %310 = arith.addf %308, %309 : vector<64x128xf32>
    %311 = tpu.iota {dimensions = array<i32: 1>} : vector<64x128xi32>
    %c5_i32 = arith.constant 5 : i32
    %312 = vector.broadcast %c5_i32 : i32 to vector<64x128xi32>
    %313 = arith.cmpi slt, %311, %312 : vector<64x128xi32>
    %cst_110 = arith.constant 0xFF800000 : f32
    %314 = vector.broadcast %cst_110 : f32 to vector<64x128xf32>
    %315 = arith.select %313, %310, %314 : vector<64x128xi1>, vector<64x128xf32>
    %cst_111 = arith.constant dense<0xFF800000> : vector<64xf32>
    %316 = vector.multi_reduction <maximumf>, %315, %cst_111 [1] : vector<64x128xf32> to vector<64xf32>
    %317 = vector.shape_cast %316 : vector<64xf32> to vector<64x1xf32>
    %318 = vector.broadcast %317 : vector<64x1xf32> to vector<64x128xf32>
    %319 = arith.subf %310, %318 : vector<64x128xf32>
    %320 = math.exp %319 : vector<64x128xf32>
    %cst_112 = arith.constant 0.000000e+00 : f32
    %321 = vector.broadcast %cst_112 : f32 to vector<64x128xf32>
    %322 = arith.select %313, %320, %321 : vector<64x128xi1>, vector<64x128xf32>
    %cst_113 = arith.constant dense<0.000000e+00> : vector<64xf32>
    %323 = vector.multi_reduction <add>, %322, %cst_113 [1] : vector<64x128xf32> to vector<64xf32>
    %324 = vector.shape_cast %323 : vector<64xf32> to vector<64x1xf32>
    %325 = math.log %324 : vector<64x1xf32>
    %326 = arith.addf %317, %325 : vector<64x1xf32>
    %327 = vector.broadcast %326 : vector<64x1xf32> to vector<64x128xf32>
    %328 = arith.subf %310, %327 : vector<64x128xf32>
    %329 = arith.select %313, %328, %310 : vector<64x128xi1>, vector<64x128xf32>
    %c0_114 = arith.constant 0 : index
    %c0_115 = arith.constant 0 : index
    %330 = vector.load %arg9[%c0_114, %c0_115] : memref<64x128xf32, #tpu.memory_space<vmem>>, vector<64x128xf32>
    tpu.vector_store %arg9[%c0_114, %c0_115], %329 {strides = array<i32>} : memref<64x128xf32, #tpu.memory_space<vmem>>, vector<64x128xf32>,
    return
  }
  func.func @transform_0(%arg0: i32) -> (i32, i32) {
    %c0_i32 = arith.constant 0 : i32
    %c0_i32_0 = arith.constant 0 : i32
    return %arg0, %c0_i32 : i32, i32
  }
  func.func @transform_1(%arg0: i32) -> (i32, i32) {
    %c0_i32 = arith.constant 0 : i32
    %c0_i32_0 = arith.constant 0 : i32
    return %arg0, %c0_i32 : i32, i32
  }
  func.func @transform_2(%arg0: i32) -> (i32, i32) {
    %c0_i32 = arith.constant 0 : i32
    %c0_i32_0 = arith.constant 0 : i32
    %c0_i32_1 = arith.constant 0 : i32
    return %c0_i32, %c0_i32_0 : i32, i32
  }
  func.func @transform_3(%arg0: i32) -> (i32, i32) {
    %c0_i32 = arith.constant 0 : i32
    %c0_i32_0 = arith.constant 0 : i32
    %c0_i32_1 = arith.constant 0 : i32
    return %c0_i32, %c0_i32_0 : i32, i32
  }
  func.func @transform_4(%arg0: i32) -> (i32, i32) {
    %c0_i32 = arith.constant 0 : i32
    %c0_i32_0 = arith.constant 0 : i32
    %c0_i32_1 = arith.constant 0 : i32
    return %c0_i32, %c0_i32_0 : i32, i32
  }
  func.func @transform_5(%arg0: i32) -> (i32, i32) {
    %c0_i32 = arith.constant 0 : i32
    %c0_i32_0 = arith.constant 0 : i32
    %c0_i32_1 = arith.constant 0 : i32
    return %c0_i32, %c0_i32_0 : i32, i32
  }
  func.func @transform_6(%arg0: i32) -> (i32, i32) {
    %c0_i32 = arith.constant 0 : i32
    %c0_i32_0 = arith.constant 0 : i32
    %c0_i32_1 = arith.constant 0 : i32
    return %c0_i32, %c0_i32_0 : i32, i32
  }
  func.func @transform_7(%arg0: i32) -> (i32, i32) {
    %c0_i32 = arith.constant 0 : i32
    %c0_i32_0 = arith.constant 0 : i32
    %c0_i32_1 = arith.constant 0 : i32
    return %c0_i32, %c0_i32_0 : i32, i32
  }
  func.func @transform_8(%arg0: i32) -> (i32, i32) {
    %c0_i32 = arith.constant 0 : i32
    %c0_i32_0 = arith.constant 0 : i32
    return %arg0, %c0_i32 : i32, i32
  }
  func.func @transform_9(%arg0: i32) -> (i32, i32) {
    %c0_i32 = arith.constant 0 : i32
    %c0_i32_0 = arith.constant 0 : i32
    return %arg0, %c0_i32 : i32, i32
  }
}

</mosaic_0001>

<bundles_post_ra>
// kernel: tpu_custom_call.1
= control target key start
LH: loop header
LB: loop body
LE: loop exit
PB: predicated region body
PF: predicated region fallthrough
CT: control target
= control target key end

     0   :  { %s4534_s0 = inlined_call_operand.vmem [shape: f32[128,64], index: 0, kind: input, shape index: {}]   ;;  %s4535_s1 = inlined_call_operand.hbm [shape: f32[16,64], index: 1, kind: input, shape index: {}]   ;;  %s4536_s2 = inlined_call_operand.vmem [shape: f32[64,384], index: 2, kind: input, shape index: {}]   ;;  %s4537_s3 = inlined_call_operand.hbm [shape: f32[128,384], index: 3, kind: input, shape index: {}]   ;;  %s4538_s4 = inlined_call_operand.hbm [shape: f32[128,128], index: 4, kind: input, shape index: {}]   ;;  %s4539_s5 = inlined_call_operand.hbm [shape: f32[128,256], index: 5, kind: input, shape index: {}]   ;;  %s4540_s6 = inlined_call_operand.hbm [shape: f32[256,128], index: 6, kind: input, shape index: {}]   ;;  %s4541_s7 = inlined_call_operand.hbm [shape: f32[8,384], index: 7, kind: input, shape index: {}]   ;;  %s4542_s8 = inlined_call_operand.hbm [shape: f32[128,128], index: 8, kind: output, shape index: {0}]   ;;  %s4543_s9 = inlined_call_operand.hbm [shape: f32[16,128], index: 9, kind: output, shape index: {1}]  }
   0x1   :  { %4573 = sst [smem:[#allocation56_spill]] %s4534_s0 }
   0x2   :  { %4574 = sst [smem:[#allocation57_spill]] %s4537_s3 }
   0x3   :  { %4575 = sst [smem:[#allocation58_spill]] %s4538_s4 }
   0x4   :  { %4576 = sst [smem:[#allocation59_spill]] %s4539_s5 }
   0x5   :  { %15 = vsyncpa [#allocation5], 0 }
   0x6   :  { %17 = vsyncpa [#allocation5 + $0x1], 0 }
   0x7   :  { %18 = vsyncpa [#allocation8], 0 }
   0x8   :  { %19 = vsyncpa [#allocation11], 0 }
   0x9   :  { %20 = vsyncpa [#allocation14], 0 }
   0xa   :  { %21 = vsyncpa [#allocation6], 0 }
   0xb   :  { %23 = vsyncpa [#allocation6 + $0x1], 0 }
   0xc   :  { %24 = vsyncpa [#allocation17], 0 }
   0xd   :  { %26 = vsyncpa [#allocation17 + $0x1], 0  ;;  %s3224_s30 = smov 0   ;;  %s3226_s10 = smov 0  }
   0xe   :  { %s3228_s11 = smov 0   ;;  %s3230_s12 = smov 0  }
   0xf LB: > { %s4577_s3 = sld [smem:[#allocation57_spill]]  ;;  %s3248_s16 = sadd.s32 4294967295, %s3157_s12   ;;  %s3157_s12 = sphi %s3230_s12, %s4667_s12   ;;  %s3153_s11 = sphi %s3228_s11, %s4666_s11   ;;  %s3149_s10 = sphi %s3226_s10, %s4665_s10   ;;  %s3145_s30 = sphi %s3224_s30, %s4664_s30  }
  0x10   : > { %p2515_p0 = scmp.ge.s32.totalorder %s3157_s12, 1  ;;  %p79_p1 = scmp.eq.s32.totalorder %s3248_s16, 0 }
  0x11   : > { %p267_p2 = scmp.lt.s32.totalorder %s3157_s12, 3  ;;  %s3159_s18 = smov [#allocation7]  }
  0x12   : > { %s283_s19 = sshll.u32 %s3159_s18, 4  ;;  %s4579_s5 = sld [smem:[#allocation59_spill]]  ;;  %s284_s19 = int_to_ptr.vmem [resolvable:$true] %s283_s19 }
  0x13   : > { %p3253_p3 = pnand %p2515_p0, %p267_p2  ;;  %s3160_s24 = smov [#allocation10]  }
  0x14   : > { %s311_s25 = sshll.u32 %s3160_s24, 4  ;;  %s3161_s26 = smov 384   ;;  %s312_s25 = int_to_ptr.vmem [resolvable:$true] %s311_s25 }
  0x15   : > { %s281_s15 = sshll.u32 %s4577_s3, 4  ;;  %p2620_p4 = pneg %p3253_p3  ;;  %s282_s15 = int_to_ptr.hbm [resolvable:$true] %s281_s15 }
  0x16   : > { %s3162_s27 = smov 24   ;;  %s3163_s28 = smov 256  }
  0x17   : > { %p3265_p6 = pnand %p2620_p4, %p79_p1  ;;  %s3164_s29 = smov 16  }
  0x18   : > { %s309_s22 = sshll.u32 %s4579_s5, 4  ;;  %s4581_s4 = sld [smem:[#allocation58_spill]]  ;;  %s310_s22 = int_to_ptr.hbm [resolvable:$true] %s309_s22 }
  0x19   : > { %2623 = dma.hbm_to_vmem [thread:$0]  (!%p3265_p6), %s282_s15, 6144, %s284_s19, [#allocation8], %s3161_s26, %s3161_s26, %s3162_s27  }
  0x1a   : > { %2629 = dma.hbm_to_vmem [thread:$0]  (!%p3265_p6), %s310_s22, 4096, %s312_s25, [#allocation11], %s3163_s28, %s3163_s28, %s3164_s29  }
  0x1b   : > { %s3165_s20 = smov [#allocation9]   ;;  %s323_s15 = sshll.u32 %s4540_s6, 4  ;;  %s324_s15 = int_to_ptr.hbm [resolvable:$true] %s323_s15 }
  0x1c   : > { %s297_s21 = sshll.u32 %s3165_s20, 4  ;;  %s3166_s19 = smov 128   ;;  %s298_s21 = int_to_ptr.vmem [resolvable:$true] %s297_s21 }
  0x1d   : > { %s3167_s26 = smov 8   ;;  %s3168_s22 = smov [#allocation12]  }
  0x1e   : > { %s295_s18 = sshll.u32 %s4581_s4, 4  ;;  %s325_s25 = sshll.u32 %s3168_s22, 4  ;;  %s296_s18 = int_to_ptr.hbm [resolvable:$true] %s295_s18  ;;  %s326_s25 = int_to_ptr.vmem [resolvable:$true] %s325_s25 }
  0x1f   : > { %2626 = dma.hbm_to_vmem [thread:$0]  (!%p3265_p6), %s296_s18, 2048, %s298_s21, [#allocation8], %s3166_s19, %s3166_s19, %s3167_s26  }
  0x20   : > { %s338_s3 = sshll.u32 %s4541_s7, 4  ;;  %s3169_s29 = smov [#allocation13]   ;;  %s339_s3 = int_to_ptr.hbm [resolvable:$true] %s338_s3 }
  0x21   : > { %2632 = dma.hbm_to_vmem [thread:$0]  (!%p3265_p6), %s324_s15, 4096, %s326_s25, [#allocation11], %s3166_s19, %s3166_s19, %s3167_s26  }
  0x22   : > { %s340_s13 = sshll.u32 %s3169_s29, 4  ;;  %s2514_s14 = sadd.s32 4294967294, %s3157_s12   ;;  %s341_s13 = int_to_ptr.vmem [resolvable:$true] %s340_s13 }
  0x23   : > { %2635 = dma.hbm_to_vmem [thread:$0]  (!%p3265_p6), %s339_s3, 384, %s341_s13, [#allocation14]  }
  0x24   : > { %s3290_s18 = sadd.s32 1, %s3157_s12   ;;  %s65_s20 = sadd.s32 1, %s3153_s11 }
  0x25   : > { %s62_s21 = ssub.s32 %s3157_s12, %s3290_s18  ;;  %p72_p7 = scmp.ne.s32.totalorder %s3153_s11, %s3149_s10 }
  0x26   : > { %p63_p8 = scmp.eq.s32.totalorder %s62_s21, 0  ;;  %p73_p9 = scmp.eq.s32.totalorder %s3157_s12, 0 }
  0x27   : > { %p78_p10 = scmp.ne.s32.totalorder %s3149_s10, %s3145_s30  ;;  %p228_p11 = scmp.eq.s32.totalorder %s3248_s16, 1 }
  0x28   : > { %s3302_s24 = scalar_select %p63_p8, %s3153_s11, %s65_s20  }
  0x29   : > { %p3306_p12 = por %p79_p1, %p78_p10  ;;  %p3310_p13 = por %p228_p11, %p72_p7 }
  0x2a   : > { %p234_p0 = scmp.eq.s32.totalorder %s2514_s14, 1  ;;  %p74_p2 = por %p73_p9, %p72_p7 }
  0x2b   : > { %s360_s19 = sand.u32 1, %s3153_s11   ;;  %p2652_p6 = scmp.lt.s32.totalorder %s3157_s12, 2 }
  0x2c   : > { %p3315_p4 = por %p234_p0, %p78_p10  ;;  %s2522_s22 = sshll.u32 %s360_s19, 3 }
  0x2d   : > { %s2523_s25 = sshll.u32 %s3157_s12, 3  ;;  %s364_s13 = scalar_lea.vmem [#allocation4], %s2522_s22 }
  0x2e   : > { %s368_s3 = scalar_lea.hbm %s4535_s1, %s2523_s25  ;;  %s372_s20 = sshll.u32 %s364_s13, 4  ;;  %s373_s20 = int_to_ptr.vmem [resolvable:$true] %s372_s20 }
  0x2f   : > { %s370_s29 = sshll.u32 %s368_s3, 4  ;;  %p3324_p8 = pnand %p2652_p6, %p74_p2  ;;  %s371_s29 = int_to_ptr.hbm [resolvable:$true] %s370_s29 }
  0x30   : > { %s361_s21 = scalar_lea.sflag [#allocation5], %s360_s19  ;;  %s3017_s4 = sshra.s32 %s371_s29, 4  ;;  %s3018_s4 = int_to_ptr.hbm [resolvable:$true] %s3017_s4 }
  0x31   : > { %s3019_s5 = scalar_lea.hbm %s3018_s4, 8  ;;  %p3021_p9 = pneg %p3324_p8 }
  0x32   : > { %p3020_p7 = scmp.ne.s32.totalorder %s3018_s4, %s3019_s5  ;;  %s3024_s22 = scalar_lea.hbm %s4535_s1, 16 }
  0x33   : > { %p3025_p0 = scmp.lt.s32.totalorder %s3018_s4, %s4535_s1  ;;  %p3026_p2 = scmp.lt.s32.totalorder %s3024_s22, %s3019_s5 }
  0x34   : > { %p3022_p10 = pnand %p3021_p9, %p3020_p7 }
  0x35   : > { %p3027_p6 = por %p3026_p2, %p3025_p0 }
  0x36   : > { %p3023_p11 = pneg %p3022_p10 }
  0x38   : > { %p3028_p5 = pnand %p3027_p6, %p3023_p11 }
  0x3a   : > { %3031 = shalt.err (!%p3028_p5)
}
  0x3b   : > { %2639 = dma.hbm_to_vmem [thread:$0]  (!%p3324_p8), %s371_s29, 128, %s373_s20, %s361_s21  }
  0x3c   : > { %381 = sbr.rel (%p3253_p3) target bundleno = 2273 (0x8e1), region = 52 }
  0x41   : > { %s3341_s19 = sand.u32 1, %s3149_s10  }
  0x42   : > { %s4544_s13 = sshll.u32 %s3341_s19, 3  ;;  %s384_s25 = scalar_lea.sflag [#allocation5], %s3341_s19 }
  0x43   : > { %s3347_s4 = scalar_lea.vmem [#allocation4], %s4544_s13 }
  0x44   : > { %3120 = dma.done.wait (%p3306_p12), %s384_s25, 128  }
  0x45   : > { %3122 = vsyncadd (%p3306_p12), %s384_s25, 4294967168 }
  0x46   : > { %3124 = dma.done.wait (%p79_p1), [#allocation8], 8192  }
  0x47   : > { %3126 = vsyncadd (%p79_p1), [#allocation8], 4294959104 }
  0x48   : > { %3128 = dma.done.wait (%p79_p1), [#allocation11], 8192  }
  0x49   : > { %3130 = vsyncadd (%p79_p1), [#allocation11], 4294959104 }
  0x4a   : > { %3132 = dma.done.wait (%p79_p1), [#allocation14], 384  }
  0x4b   : > { %3134 = vsyncadd (%p79_p1), [#allocation14], 4294966912  ;;  %s3366_s5 = sshll.u32 %s3248_s16, 3  ;;  %v615_v0 = vld [vmem:[%s4536_s2 + $0xb8] sm:$0xff]  ;;  %v613_v1 = vld [vmem:[%s4536_s2 + $0xa8] sm:$0xff]  ;;  %s4586_s0 = sld [smem:[#allocation56_spill]] }
  0x4c   : > { %p459_p3 = scmp.lt.s32.totalorder %s3366_s5, 15  ;;  %v612_v2 = vld [vmem:[%s4536_s2 + $0xa0] sm:$0xff]  ;;  %2586 = vmatpush.msra.mxu3 %v615_v0  ;;  %656 = vmatpush.msra.mxu0 %v613_v1  ;;  %v610_v3 = vld [vmem:[%s4536_s2 + $0x90] sm:$0xff]  ;;  %v609_v4 = vld [vmem:[%s4536_s2 + $0x88] sm:$0xff]  ;;  %v3170_v7 = vmov 1983009808   ;;  %s2346_s13 = scalar_lea.hbm %s4543_s9, %s3366_s5 }
  0x4d   : > { %v607_v5 = vld [vmem:[%s4536_s2 + $0x78] sm:$0xff]  ;;  %738 = vmatpush.msra.mxu2 %v615_v0  ;;  %v606_v6 = vld [vmem:[%s4536_s2 + $0x70] sm:$0xff]  ;;  %v485_v8 = vunpack.c.l.s4 %v3170_v7  ;;  %v604_v9 = vld [vmem:[%s4536_s2 + $0x60] sm:$0xff]  ;;  %vm480_vm0 = vcmask 1047556   ;;  %v3171_v21 = vmov 1934713408  }
  0x4e   : > { %s460_s17 = scalar_select %p459_p3, %s3366_s5, 15  ;;  %2587 = vmatpush.msra.mxu3 %v612_v2  ;;  %657 = vmatpush.msra.mxu0 %v610_v3  ;;  %v603_v10 = vld [vmem:[%s4536_s2 + $0x58] sm:$0xff]  ;;  %v601_v11 = vld [vmem:[%s4536_s2 + $0x48] sm:$0xff]  ;;  %v533_v22 = vunpack.c.l.s4 %v3171_v21  ;;  %v600_v29 = vld [vmem:[%s4536_s2 + $0x40] sm:$0xff]  ;;  %vm623_vm1 = vcmask 523264  }
  0x4f   : > { %739 = vmatpush.msra.mxu2 %v612_v2  ;;  %v3403_v25 = vunpack.c.0.s8 %v485_v8  ;;  %v598_v30 = vld [vmem:[%s4536_s2 + $0x30] sm:$0xff]  ;;  %v597_v38 = vld [vmem:[%s4536_s2 + $0x28] sm:$0xff]  ;;  %v595_v39 = vld [vmem:[%s4536_s2 + $0x18] sm:$0xff]  ;;  %s2350_s25 = sshll.u32 %s2346_s13, 4  ;;  %s2319_s23 = scalar_lea.sflag [#allocation17], %s3341_s19  ;;  %s2351_s25 = int_to_ptr.hbm [resolvable:$true] %s2350_s25 }
  0x50   : > { %s2534_s22 = sshll.u32 %s460_s17, 3  ;;  %2588 = vmatpush.msra.mxu3 %v609_v4  ;;  %658 = vmatpush.msra.mxu0 %v607_v5  ;;  %v594_v47 = vld [vmem:[%s4536_s2 + $0x10] sm:$0xff]  ;;  %v3440_v48 = vunpack.c.0.s8 %v533_v22  ;;  %v592_v49 = vld [vmem:[%s4536_s2] sm:$0xff]  ;;  %v3452_v55 = vld [vmem:[#allocation7 + $0x168] sm:$0xff]  ;;  %s3061_s29 = sshra.s32 %s2351_s25, 4  ;;  %s3062_s29 = int_to_ptr.hbm [resolvable:$true] %s3061_s29 }
  0x51   : > { %s462_s27 = scalar_lea.vmem %s4586_s0, %s2534_s22  ;;  %740 = vmatpush.msra.mxu2 %v609_v4  ;;  %4587 = vst [vmem:[#allocation24_spill] sm:$0xff] %v3403_v25  ;;  %v3456_v58 = vld [vmem:[#allocation7 + $0x178] sm:$0xff]  ;;  %v3461_v62 = vld [vmem:[#allocation7 + $0x150] sm:$0xff]  ;;  %v3463_v63 = vld [vmem:[#allocation7 + $0x160] sm:$0xff]  ;;  %s3063_s22 = scalar_lea.hbm %s3062_s29, 8 }
  0x52   : > { %v471_v12 = vld [vmem:[%s462_s27] sm:$0xff]  ;;  %v472_v13 = vld [vmem:[%s462_s27 + $0x8] sm:$0xff]  ;;  %v473_v14 = vld [vmem:[%s462_s27 + $0x10] sm:$0xff]  ;;  %2589 = vmatpush.msra.mxu3 %v606_v6  ;;  %659 = vmatpush.msra.mxu0 %v604_v9  ;;  %4588 = vst [vmem:[#allocation25_spill] sm:$0xff] %v3440_v48  ;;  %p3064_p1 = scmp.ne.s32.totalorder %s3062_s29, %s3063_s22  ;;  %s3067_s17 = scalar_lea.hbm %s4543_s9, 16 }
  0x53   : > { %v474_v15 = vld [vmem:[%s462_s27 + $0x18] sm:$0xff]  ;;  %v475_v16 = vld [vmem:[%s462_s27 + $0x20] sm:$0xff]  ;;  %v476_v17 = vld [vmem:[%s462_s27 + $0x28] sm:$0xff]  ;;  %v479_v18 = vrot.slane %v473_v14, 4  ;;  %v482_v19 = vrot.slane %v471_v12, 4  ;;  %v494_v20 = vrot.slane %v472_v13, 4  ;;  %741 = vmatpush.msra.mxu2 %v606_v6  ;;  %p3068_p8 = scmp.lt.s32.totalorder %s3062_s29, %s4543_s9  ;;  %p3069_p7 = scmp.lt.s32.totalorder %s3067_s17, %s3063_s22 }
  0x54   : > { %v477_v23 = vld [vmem:[%s462_s27 + $0x30] sm:$0xff]  ;;  %v478_v24 = vld [vmem:[%s462_s27 + $0x38] sm:$0xff]  ;;  %v492_v26 = vrot.slane %v474_v15, 4  ;;  %v506_v27 = vrot.slane %v475_v16, 4  ;;  %v518_v28 = vrot.slane %v476_v17, 4  ;;  %2590 = vmatpush.msra.mxu3 %v603_v10  ;;  %660 = vmatpush.msra.mxu0 %v601_v11  ;;  %v3472_v4 = vld [vmem:[#allocation7 + $0x138] sm:$0xff]  ;;  %p3065_p5 = pnand %p3064_p1, %p3310_p13 }
  0x55   : > { %v483_v31 = vsel %vm480_vm0, %v473_v14, %v482_v19  ;;  %v495_v32 = vsel %vm480_vm0, %v474_v15, %v494_v20  ;;  %v504_v33 = vrot.slane %v477_v23, 4  ;;  %v516_v34 = vrot.slane %v478_v24, 4  ;;  %742 = vmatpush.msra.mxu2 %v603_v10  ;;  %v3474_v5 = vld [vmem:[#allocation7 + $0x148] sm:$0xff]  ;;  %v3480_v9 = vld [vmem:[#allocation7 + $0x170] sm:$0xff]  ;;  %v3482_v10 = vld [vmem:[#allocation7 + $0x120] sm:$0xff]  ;;  %p3070_p9 = por %p3069_p7, %p3068_p8 }
  0x56   : > { %v3414_v35 = vperm.slane %v483_v31, %v3403_v25  ;;  %v3417_v36 = vperm.slane %v495_v32, %v3403_v25  ;;  %v507_v37 = vsel %vm480_vm0, %v477_v23, %v506_v27  ;;  %v519_v40 = vsel %vm480_vm0, %v478_v24, %v518_v28  ;;  %2591 = vmatpush.msra.mxu3 %v600_v29  ;;  %v3493_v14 = vld [vmem:[#allocation7 + $0x108] sm:$0xff]  ;;  %v3504_v19 = vld [vmem:[#allocation7 + $0xf0] sm:$0xff]  ;;  %v3513_v24 = vld [vmem:[#allocation7 + $0x140] sm:$0xff]  ;;  %p3066_p12 = pneg %p3065_p5 }
  0x57   : > { %v481_v41 = vsel %vm480_vm0, %v479_v18, %v471_v12  ;;  %v493_v42 = vsel %vm480_vm0, %v492_v26, %v472_v13  ;;  %661 = vmatpush.msra.mxu0 %v598_v30  ;;  %v3430_v43 = vperm.slane %v507_v37, %v3403_v25  ;;  %v527_v44 = vperm.slane %v519_v40, %v3403_v25  ;;  %v3508_v22 = vld [vmem:[#allocation7 + $0x130] sm:$0xff]  ;;  %v3516_v26 = vld [vmem:[#allocation7 + $0x118] sm:$0xff]  ;;  %v3528_v32 = vld [vmem:[#allocation7 + $0x128] sm:$0xff] }
  0x58   : > { %v540_v45 = vrot.slane %v3417_v36, 4  ;;  %v3435_v46 = vperm.slane %v493_v42, %v3403_v25  ;;  %v3446_v50 = vperm.slane %v481_v41, %v3403_v25  ;;  %v505_v51 = vsel %vm480_vm0, %v504_v33, %v475_v16  ;;  %743 = vmatpush.msra.mxu2 %v600_v29  ;;  %2592 = vmatpush.msra.mxu3 %v597_v38  ;;  %v3495_v16 = vld [vmem:[#allocation7 + $0x158] sm:$0xff]  ;;  %v3531_v33 = vld [vmem:[#allocation7 + $0xc0] sm:$0xff]  ;;  %v3554_v42 = vld [vmem:[#allocation7 + $0x90] sm:$0xff]  ;;  %p3071_p10 = pnand %p3070_p9, %p3066_p12 }
  0x59   : > { %v517_v52 = vsel %vm480_vm0, %v516_v34, %v476_v17  ;;  %662 = vmatpush.msra.mxu0 %v595_v39  ;;  %v564_v54 = vrot.slane %v527_v44, 4  ;;  %v511_v56 = vperm.slane %v505_v51, %v3403_v25  ;;  %v566_v11 = vrot.slane %v3430_v43, 4  ;;  %v3518_v27 = vld [vmem:[#allocation7 + $0xd8] sm:$0xff]  ;;  %v3545_v39 = vld [vmem:[#allocation7 + $0xa8] sm:$0xff]  ;;  %v3574_v51 = vld [vmem:[#allocation7 + $0xe0] sm:$0xff] }
  0x5a   : > { %v541_v53 = vsel %vm480_vm0, %v540_v45, %v3414_v35  ;;  %v523_v57 = vperm.slane %v517_v52, %v3403_v25  ;;  %v528_v59 = vrot.slane %v3435_v46, 4  ;;  %744 = vmatpush.msra.mxu2 %v597_v38  ;;  %2593 = vmatpush.msra.mxu3 %v594_v47  ;;  %v542_v20 = vrot.slane %v3414_v35, 4  ;;  %v3541_v38 = vld [vmem:[#allocation7 + $0x110] sm:$0xff] }
  0x5b   : > { %v565_v60 = vsel %vm480_vm0, %v564_v54, %v3430_v43  ;;  %663 = vmatpush.msra.mxu0 %v592_v49  ;;  %v547_v0 = vperm.slane %v541_v53, %v3440_v48  ;;  %v554_v15 = vrot.slane %v511_v56, 4  ;;  %v567_v21 = vsel %vm480_vm0, %v527_v44, %v566_v11  ;;  %v3556_v43 = vld [vmem:[#allocation7 + $0x100] sm:$0xff]  ;;  %v3567_v49 = vld [vmem:[#allocation7 + $0x78] sm:$0xff]  ;;  %v3577_v52 = vld [vmem:[#allocation7 + $0xd0] sm:$0xff] }
  0x5c   : > { %v552_v61 = vrot.slane %v523_v57, 4  ;;  %v571_v1 = vperm.slane %v565_v60, %v3440_v48  ;;  %848 = vmatpush.msrb.mxu3 %v3452_v55  ;;  %v529_v2 = vsel %vm480_vm0, %v528_v59, %v3446_v50  ;;  %745 = vmatpush.msra.mxu2 %v594_v47  ;;  %v530_v28 = vrot.slane %v3446_v50, 4  ;;  %v3565_v47 = vld [vmem:[#allocation7 + $0xe8] sm:$0xff]  ;;  %v3579_v53 = vld [vmem:[#allocation7 + $0x60] sm:$0xff]  ;;  %v3597_v60 = vld [vmem:[#allocation7 + $0x30] sm:$0xff] }
  0x5d   : > { %888 = vmatpush.msrb.mxu0 %v3456_v58  ;;  %v535_v7 = vperm.slane %v529_v2, %v3440_v48  ;;  %v586_v18 = vrot.slane %v547_v0, 4  ;;  %v555_v29 = vsel %vm480_vm0, %v523_v57, %v554_v15  ;;  %v575_v31 = vperm.slane %v567_v21, %v3440_v48  ;;  %v3591_v57 = vld [vmem:[#allocation7 + $0x48] sm:$0xff]  ;;  %4589 = vst [vmem:[#allocation26_spill] sm:$0xff] %v3597_v60  ;;  %v3607_v2 = vld [vmem:[#allocation7 + $0xb0] sm:$0xff] }
  0x5e   : > { %v553_v3 = vsel %vm480_vm0, %v552_v61, %v511_v56  ;;  %v584_v6 = vrot.slane %v571_v1, 4  ;;  %849 = vmatpush.msrb.mxu3 %v3461_v62  ;;  %981 = vmatpush.msrb.mxu2 %v3480_v9  ;;  %v543_v34 = vsel %vm480_vm0, %v3417_v36, %v542_v20  ;;  %v563_v37 = vperm.slane %v555_v29, %v3440_v48  ;;  %v3586_v56 = vld [vmem:[#allocation7 + $0xc8] sm:$0xff]  ;;  %v614_v61 = vld [vmem:[%s4536_s2 + $0xb0] sm:$0xff]  ;;  %v605_v20 = vld [vmem:[%s4536_s2 + $0x68] sm:$0xff] }
  0x5f   : > { %v559_v8 = vperm.slane %v553_v3, %v3440_v48  ;;  %889 = vmatpush.msrb.mxu0 %v3463_v63  ;;  %v578_v23 = vrot.slane %v535_v7, 4  ;;  %v3524_v30 = vsel %vm480_vm0, %v571_v1, %v586_v18  ;;  %v531_v40 = vsel %vm480_vm0, %v3435_v46, %v530_v28  ;;  %v3562_v46 = vld [vmem:[#allocation7 + $0xf8] sm:$0xff]  ;;  %697 = vmatpush.msra.mxu1 %v614_v61  ;;  %v611_v3 = vld [vmem:[%s4536_s2 + $0x98] sm:$0xff]  ;;  %v3629_v18 = vld [vmem:[#allocation7] sm:$0xff] }
  0x60   : > { %v3487_v12 = vsel %vm480_vm0, %v584_v6, %v547_v0  ;;  %850 = vmatpush.msrb.mxu3 %v3472_v4  ;;  %982 = vmatpush.msrb.mxu2 %v3495_v16  ;;  %v551_v36 = vperm.slane %v543_v34, %v3440_v48  ;;  %v588_v41 = vrot.slane %v575_v31, 4  ;;  %v539_v44 = vperm.slane %v531_v40, %v3440_v48  ;;  %v3602_v0 = vld [vmem:[#allocation7 + $0xb8] sm:$0xff]  ;;  %v3612_v6 = vld [vmem:[#allocation7 + $0xa0] sm:$0xff]  ;;  %v3627_v15 = vld [vmem:[#allocation7 + $0x88] sm:$0xff] }
  0x61   : > { %v576_v13 = vrot.slane %v559_v8, 4  ;;  %890 = vmatpush.msrb.mxu0 %v3474_v5  ;;  %2555 = vmatmul.msk.f32.vlgmr.msra.gmra.mxu3 %vm623_vm1, %v3487_v12  ;;  %v3537_v35 = vsel %vm480_vm0, %v559_v8, %v578_v23  ;;  %v580_v45 = vrot.slane %v563_v37, 4  ;;  %v608_v8 = vld [vmem:[%s4536_s2 + $0x80] sm:$0xff]  ;;  %4591 = vst [vmem:[#allocation28_spill] sm:$0xff] %v3629_v18  ;;  %v602_v28 = vld [vmem:[%s4536_s2 + $0x50] sm:$0xff]  ;;  %v3652_v29 = vld [vmem:[#allocation7 + $0x58] sm:$0xff] }
  0x62   : > { %851 = vmatpush.msrb.mxu3 %v3482_v10  ;;  %983 = vmatpush.msrb.mxu2 %v3513_v24  ;;  %v3571_v50 = vsel %vm480_vm0, %v588_v41, %v551_v36  ;;  %v590_v59 = vrot.slane %v551_v36, 4  ;;  %v582_v1 = vrot.slane %v539_v44, 4  ;;  %v3643_v23 = vld [vmem:[#allocation7 + $0x70] sm:$0xff]  ;;  %v599_v34 = vld [vmem:[%s4536_s2 + $0x38] sm:$0xff] }
  0x63   : > { %v3498_v17 = vsel %vm480_vm0, %v576_v13, %v535_v7  ;;  %891 = vmatpush.msrb.mxu0 %v3508_v22  ;;  %v3583_v54 = vsel %vm480_vm0, %v580_v45, %v539_v44  ;;  %v3614_v7 = vld [vmem:[#allocation7 + $0x18] sm:$0xff]  ;;  %698 = vmatpush.msra.mxu1 %v611_v3  ;;  %v596_v40 = vld [vmem:[%s4536_s2 + $0x20] sm:$0xff]  ;;  %v3670_v41 = vld [vmem:[#allocation7 + $0x68] sm:$0xff] }
  0x64   : > { %2535 = vmatmul.msk.f32.vlgmr.msra.gmra.mxu0 %vm623_vm1, %v3498_v17  ;;  %2551 = vmatmul.msk.f32.vlgmr.msra.gmra.mxu2 %vm623_vm1, %v3498_v17  ;;  %4590 = vst [vmem:[#allocation27_spill] sm:$0xff] %v3614_v7  ;;  %v3622_v11 = vsel %vm480_vm0, %v575_v31, %v590_v59  ;;  %v3625_v13 = vld [vmem:[#allocation7 + $0x98] sm:$0xff]  ;;  %v3637_v21 = vsel %vm480_vm0, %v563_v37, %v582_v1  ;;  %v3654_v31 = vld [vmem:[#allocation7 + $0x80] sm:$0xff]  ;;  %v3674_v44 = vld [vmem:[#allocation7 + $0x28] sm:$0xff] }
  0x65   : > { %852 = vmatpush.msrb.mxu3 %v3493_v14  ;;  %892 = vmatpush.msrb.mxu0 %v3516_v26  ;;  %v3661_v37 = vld [vmem:[#allocation7 + $0x40] sm:$0xff]  ;;  %v3668_v36 = vld [vmem:[%s3347_s4] sm:$0xff]  ;;  %4593 = vst [vmem:[#allocation30_spill] sm:$0xff] %v3674_v44  ;;  %s4660_s4 = sshll.u32 %s3341_s19, 3 }
  0x66   : > { %984 = vmatpush.msrb.mxu2 %v3528_v32  ;;  %699 = vmatpush.msra.mxu1 %v608_v8  ;;  %4592 = vst [vmem:[#allocation29_spill] sm:$0xff] %v3661_v37  ;;  %v593_v45 = vld [vmem:[%s4536_s2 + $0x8] sm:$0xff]  ;;  %v3683_v59 = vld [vmem:[#allocation7 + $0x10] sm:$0xff]  ;;  %v3705_v3 = vld [vmem:[#allocation7 + $0x20] sm:$0xff]  ;;  %s4281_s21 = scalar_lea.vmem [#allocation16], %s4660_s4 }
  0x67   : > { %853 = vmatpush.msrb.mxu3 %v3504_v19  ;;  %893 = vmatpush.msrb.mxu0 %v3556_v43  ;;  %4594 = vst [vmem:[#allocation31_spill] sm:$0xff] %v3683_v59  ;;  %v3692_v61 = vld [vmem:[#allocation7 + $0x50] sm:$0xff]  ;;  %v3699_v1 = vld [vmem:[#allocation7 + $0x38] sm:$0xff]  ;;  %s2348_s3 = sshll.u32 %s4281_s21, 4  ;;  %s2349_s3 = int_to_ptr.vmem [resolvable:$true] %s2348_s3 }
  0x68   : > { %985 = vmatpush.msrb.mxu2 %v3541_v38  ;;  %700 = vmatpush.msra.mxu1 %v605_v20  ;;  %4595 = vst [vmem:[#allocation32_spill] sm:$0xff] %v3699_v1 }
  0x69   : > { %854 = vmatpush.msrb.mxu3 %v3518_v27  ;;  %894 = vmatpush.msrb.mxu0 %v3565_v47  ;;  %4596 = vst [vmem:[#allocation33_spill] sm:$0xff] %v3705_v3 }
  0x6a   : > { %2556 = vmatmul.msk.f32.gmra.mxu3 %vm623_vm1, %v3524_v30  ;;  %986 = vmatpush.msrb.mxu2 %v3562_v46 }
  0x6b   : > { %855 = vmatpush.msrb.mxu3 %v3531_v33  ;;  %895 = vmatpush.msrb.mxu0 %v3577_v52 }
  0x6c   : > { %2536 = vmatmul.msk.f32.gmra.mxu0 %vm623_vm1, %v3537_v35  ;;  %2552 = vmatmul.msk.f32.gmra.mxu2 %vm623_vm1, %v3537_v35 }
  0x6d   : > { %856 = vmatpush.msrb.mxu3 %v3545_v39  ;;  %987 = vmatpush.msrb.mxu2 %v3574_v51 }
  0x6e   : > { %896 = vmatpush.msrb.mxu0 %v3602_v0  ;;  %701 = vmatpush.msra.mxu1 %v602_v28 }
  0x6f   : > { %857 = vmatpush.msrb.mxu3 %v3554_v42  ;;  %988 = vmatpush.msrb.mxu2 %v3586_v56 }
  0x70   : > { %897 = vmatpush.msrb.mxu0 %v3612_v6  ;;  %702 = vmatpush.msra.mxu1 %v599_v34 }
  0x71   : > { %858 = vmatpush.msrb.mxu3 %v3567_v49  ;;  %989 = vmatpush.msrb.mxu2 %v3607_v2 }
  0x72   : > { %2557 = vmatmul.msk.f32.gmra.mxu3 %vm623_vm1, %v3571_v50  ;;  %898 = vmatpush.msrb.mxu0 %v3627_v15 }
  0x73   : > { %859 = vmatpush.msrb.mxu3 %v3579_v53  ;;  %990 = vmatpush.msrb.mxu2 %v3625_v13 }
  0x74   : > { %2537 = vmatmul.msk.f32.gmra.mxu0 %vm623_vm1, %v3583_v54  ;;  %2553 = vmatmul.msk.f32.gmra.mxu2 %vm623_vm1, %v3583_v54 }
  0x75   : > { %860 = vmatpush.msrb.mxu3 %v3591_v57  ;;  %899 = vmatpush.msrb.mxu0 %v3643_v23 }
  0x76   : > { %991 = vmatpush.msrb.mxu2 %v3654_v31  ;;  %703 = vmatpush.msra.mxu1 %v596_v40 }
  0x77   : > { %861 = vmatpush.msrb.mxu3 %v3597_v60  ;;  %900 = vmatpush.msrb.mxu0 %v3652_v29 }
  0x78   : > { %992 = vmatpush.msrb.mxu2 %v3670_v41  ;;  %704 = vmatpush.msra.mxu1 %v593_v45 }
  0x79   : > { %862 = vmatpush.msrb.mxu3 %v3614_v7  ;;  %901 = vmatpush.msrb.mxu0 %v3661_v37 }
  0x7a   : > { %2558 = vmatmul.msk.f32.gmra.mxu3 %vm623_vm1, %v3622_v11  ;;  %2543 = vmatmul.msk.f32.vlgmr.msra.gmra.mxu1 %vm623_vm1, %v3498_v17  ;;  %v3711_v17 = vld [vmem:[#allocation7 + $0x8] sm:$0xff] }
  0x7b   : > { %863 = vmatpush.msrb.mxu3 %v3629_v18  ;;  %902 = vmatpush.msrb.mxu0 %v3674_v44  ;;  %4597 = vst [vmem:[#allocation34_spill] sm:$0xff] %v3711_v17 }
  0x7c   : > { %2538 = vmatmul.msk.f32.gmra.mxu0 %vm623_vm1, %v3637_v21  ;;  %2554 = vmatmul.msk.f32.gmra.mxu2 %vm623_vm1, %v3637_v21 }
  0x7d   : > { %868 = vmatpush.msra.mxu3 %v3480_v9  ;;  %903 = vmatpush.msrb.mxu0 %v3683_v59 }
  0x7e   : > { %993 = vmatpush.msrb.mxu2 %v3692_v61  ;;  %961 = vmatpush.msrb.mxu1 %v3452_v55 }
  0x7f   : > { %869 = vmatpush.msra.mxu3 %v3495_v16  ;;  %1075 = vmatpush.msra.mxu0 %v3452_v55 }
  0x80   : > { %994 = vmatpush.msrb.mxu2 %v3699_v1  ;;  %962 = vmatpush.msrb.mxu1 %v3461_v62 }
  0x81   : > { %870 = vmatpush.msra.mxu3 %v3513_v24  ;;  %1076 = vmatpush.msra.mxu0 %v3461_v62 }
  0x82   : > { %2559 = vmatmul.msk.f32.vlgmr.msrb.gmra.mxu3 %vm623_vm1, %v3668_v36  ;;  %995 = vmatpush.msrb.mxu2 %v3705_v3 }
  0x83   : > { %871 = vmatpush.msra.mxu3 %v3528_v32  ;;  %963 = vmatpush.msrb.mxu1 %v3472_v4 }
  0x84   : > { %2539 = vmatmul.msk.f32.gmra.mxu0 %vm623_vm1, %v3487_v12  ;;  %996 = vmatpush.msrb.mxu2 %v3711_v17 }
  0x85   : > { %872 = vmatpush.msra.mxu3 %v3541_v38  ;;  %964 = vmatpush.msrb.mxu1 %v3482_v10 }
  0x86   : > { %2544 = vmatmul.msk.f32.gmra.mxu1 %vm623_vm1, %v3537_v35  ;;  %1115 = vmatpush.msra.mxu2 %v3456_v58 }
  0x87   : > { %873 = vmatpush.msra.mxu3 %v3562_v46  ;;  %965 = vmatpush.msrb.mxu1 %v3493_v14 }
  0x88   : > { %1116 = vmatpush.msra.mxu2 %v3463_v63  ;;  %1077 = vmatpush.msra.mxu0 %v3472_v4 }
  0x89   : > { %874 = vmatpush.msra.mxu3 %v3574_v51  ;;  %966 = vmatpush.msrb.mxu1 %v3504_v19 }
  0x8a   : > { %1117 = vmatpush.msra.mxu2 %v3474_v5  ;;  %1078 = vmatpush.msra.mxu0 %v3482_v10 }
  0x8b   : > { %875 = vmatpush.msra.mxu3 %v3586_v56  ;;  %967 = vmatpush.msrb.mxu1 %v3518_v27 }
  0x8c   : > { %2540 = vmatmul.msk.f32.gmra.mxu0 %vm623_vm1, %v3524_v30  ;;  %1118 = vmatpush.msra.mxu2 %v3508_v22 }
  0x8d   : > { %876 = vmatpush.msra.mxu3 %v3607_v2  ;;  %968 = vmatpush.msrb.mxu1 %v3531_v33 }
  0x8e   : > { %2545 = vmatmul.msk.f32.gmra.mxu1 %vm623_vm1, %v3583_v54  ;;  %1079 = vmatpush.msra.mxu0 %v3493_v14 }
  0x8f   : > { %877 = vmatpush.msra.mxu3 %v3625_v13  ;;  %969 = vmatpush.msrb.mxu1 %v3545_v39 }
  0x90   : > { %1119 = vmatpush.msra.mxu2 %v3516_v26  ;;  %1080 = vmatpush.msra.mxu0 %v3504_v19 }
  0x91   : > { %878 = vmatpush.msra.mxu3 %v3654_v31  ;;  %970 = vmatpush.msrb.mxu1 %v3554_v42 }
  0x92   : > { %1120 = vmatpush.msra.mxu2 %v3556_v43  ;;  %1081 = vmatpush.msra.mxu0 %v3518_v27 }
  0x93   : > { %879 = vmatpush.msra.mxu3 %v3670_v41  ;;  %971 = vmatpush.msrb.mxu1 %v3567_v49 }
  0x94   : > { %2541 = vmatmul.msk.f32.gmra.mxu0 %vm623_vm1, %v3571_v50  ;;  %1121 = vmatpush.msra.mxu2 %v3565_v47 }
  0x95   : > { %880 = vmatpush.msra.mxu3 %v3692_v61  ;;  %972 = vmatpush.msrb.mxu1 %v3579_v53 }
  0x96   : > { %2546 = vmatmul.msk.f32.gmra.mxu1 %vm623_vm1, %v3637_v21  ;;  %1082 = vmatpush.msra.mxu0 %v3531_v33 }
  0x97   : > { %881 = vmatpush.msra.mxu3 %v3699_v1  ;;  %973 = vmatpush.msrb.mxu1 %v3591_v57 }
  0x98   : > { %1122 = vmatpush.msra.mxu2 %v3577_v52  ;;  %1083 = vmatpush.msra.mxu0 %v3545_v39 }
  0x99   : > { %882 = vmatpush.msra.mxu3 %v3705_v3  ;;  %974 = vmatpush.msrb.mxu1 %v3597_v60 }
  0x9a   : > { %1123 = vmatpush.msra.mxu2 %v3602_v0  ;;  %1084 = vmatpush.msra.mxu0 %v3554_v42 }
  0x9b   : > { %883 = vmatpush.msra.mxu3 %v3711_v17  ;;  %975 = vmatpush.msrb.mxu1 %v3614_v7 }
  0x9c   : > { %2542 = vmatmul.msk.f32.gmra.mxu0 %vm623_vm1, %v3622_v11  ;;  %2560 = vmatmul.msk.f32.vlgmr.msra.gmra.mxu3 %vm623_vm1, %v3668_v36 }
  0x9d   : > { %1001 = vmatpush.msrb.mxu3 %v3456_v58  ;;  %1124 = vmatpush.msra.mxu2 %v3612_v6 }
  0x9e   : > { %976 = vmatpush.msrb.mxu1 %v3629_v18  ;;  %1085 = vmatpush.msra.mxu0 %v3567_v49 }
  0x9f   : > { %1002 = vmatpush.msrb.mxu3 %v3463_v63  ;;  %2547 = vmatmul.msk.f32.gmra.mxu1 %vm623_vm1, %v3487_v12 }
  0xa0   : > { %1095 = vmatpush.msra.mxu1 %v3480_v9  ;;  %1125 = vmatpush.msra.mxu2 %v3627_v15 }
  0xa1   : > { %1003 = vmatpush.msrb.mxu3 %v3474_v5  ;;  %1086 = vmatpush.msra.mxu0 %v3579_v53 }
  0xa2   : > { %1096 = vmatpush.msra.mxu1 %v3495_v16  ;;  %1126 = vmatpush.msra.mxu2 %v3643_v23 }
  0xa3   : > { %1004 = vmatpush.msrb.mxu3 %v3508_v22  ;;  %1087 = vmatpush.msra.mxu0 %v3591_v57 }
  0xa4   : > { %2561 = vmatmul.msk.f32.vlgmr.msrb.gmra.mxu0 %vm623_vm1, %v3668_v36  ;;  %1097 = vmatpush.msra.mxu1 %v3513_v24 }
  0xa5   : > { %1005 = vmatpush.msrb.mxu3 %v3516_v26  ;;  %1127 = vmatpush.msra.mxu2 %v3652_v29 }
  0xa6   : > { %1098 = vmatpush.msra.mxu1 %v3528_v32  ;;  %1088 = vmatpush.msra.mxu0 %v3597_v60 }
  0xa7   : > { %1006 = vmatpush.msrb.mxu3 %v3556_v43  ;;  %2548 = vmatmul.msk.f32.gmra.mxu1 %vm623_vm1, %v3524_v30  ;;  %v465_v30 = vld [vmem:[#allocation13] ss:$8 sm:$0x7] }
  0xa8   : > { %1099 = vmatpush.msra.mxu1 %v3541_v38  ;;  %1128 = vmatpush.msra.mxu2 %v3661_v37 }
  0xa9   : > { %1007 = vmatpush.msrb.mxu3 %v3565_v47  ;;  %1089 = vmatpush.msra.mxu0 %v3614_v7 }
  0xaa   : > { %1100 = vmatpush.msra.mxu1 %v3562_v46  ;;  %1129 = vmatpush.msra.mxu2 %v3674_v44 }
  0xab   : > { %1008 = vmatpush.msrb.mxu3 %v3577_v52  ;;  %1090 = vmatpush.msra.mxu0 %v3629_v18 }
  0xac   : > { %1101 = vmatpush.msra.mxu1 %v3574_v51  ;;  %1130 = vmatpush.msra.mxu2 %v3683_v59 }
  0xad   : > { %1009 = vmatpush.msrb.mxu3 %v3602_v0  ;;  %1209 = vmatpush.msrb.mxu0 %v3480_v9 }
  0xae   : > { %1102 = vmatpush.msra.mxu1 %v3586_v56 }
  0xaf   : > { %1010 = vmatpush.msrb.mxu3 %v3612_v6  ;;  %2549 = vmatmul.msk.f32.gmra.mxu1 %vm623_vm1, %v3571_v50  ;;  %v617_v50 = vperm.slane %v465_v30, 0 }
  0xb0   : > { %1210 = vmatpush.msrb.mxu0 %v3495_v16  ;;  %1103 = vmatpush.msra.mxu1 %v3607_v2 }
  0xb1   : > { %1011 = vmatpush.msrb.mxu3 %v3627_v15 }
  0xb2   : > { %1211 = vmatpush.msrb.mxu0 %v3513_v24  ;;  %1104 = vmatpush.msra.mxu1 %v3625_v13 }
  0xb3   : > { %1012 = vmatpush.msrb.mxu3 %v3643_v23 }
  0xb4   : > { %1212 = vmatpush.msrb.mxu0 %v3528_v32  ;;  %1105 = vmatpush.msra.mxu1 %v3654_v31 }
  0xb5   : > { %1013 = vmatpush.msrb.mxu3 %v3652_v29 }
  0xb6   : > { %1213 = vmatpush.msrb.mxu0 %v3541_v38  ;;  %1106 = vmatpush.msra.mxu1 %v3670_v41 }
  0xb7   : > { %1014 = vmatpush.msrb.mxu3 %v3661_v37  ;;  %2550 = vmatmul.msk.f32.gmra.mxu1 %vm623_vm1, %v3622_v11 }
  0xb8   : > { %1107 = vmatpush.msra.mxu1 %v3692_v61  ;;  %1214 = vmatpush.msrb.mxu0 %v3562_v46 }
  0xb9   : > { %1015 = vmatpush.msrb.mxu3 %v3674_v44 }
  0xba   : > { %1108 = vmatpush.msra.mxu1 %v3699_v1  ;;  %1215 = vmatpush.msrb.mxu0 %v3574_v51 }
  0xbb   : > { %1016 = vmatpush.msrb.mxu3 %v3683_v59 }
  0xbc   : > { %1109 = vmatpush.msra.mxu1 %v3705_v3  ;;  %1216 = vmatpush.msrb.mxu0 %v3586_v56 }
  0xbd   : > { %1189 = vmatpush.msra.mxu3 %v3452_v55 }
  0xbe   : > { %1110 = vmatpush.msra.mxu1 %v3711_v17  ;;  %1217 = vmatpush.msrb.mxu0 %v3607_v2 }
  0xbf   : > { %1190 = vmatpush.msra.mxu3 %v3461_v62 }
  0xc0   : > { %1218 = vmatpush.msrb.mxu0 %v3625_v13 }
  0xc1   : > { %1191 = vmatpush.msra.mxu3 %v3472_v4 }
  0xc2   : > { %1219 = vmatpush.msrb.mxu0 %v3654_v31 }
  0xc3   : > { %1192 = vmatpush.msra.mxu3 %v3482_v10 }
  0xc4   : > { %1220 = vmatpush.msrb.mxu0 %v3670_v41 }
  0xc5   : > { %1193 = vmatpush.msra.mxu3 %v3493_v14 }
  0xc6   : > { %1221 = vmatpush.msrb.mxu0 %v3692_v61 }
  0xc7   : > { %1194 = vmatpush.msra.mxu3 %v3504_v19 }
  0xc8   : > { %1222 = vmatpush.msrb.mxu0 %v3699_v1 }
  0xc9   : > { %1195 = vmatpush.msra.mxu3 %v3518_v27 }
  0xca   : > { %1223 = vmatpush.msrb.mxu0 %v3705_v3 }
  0xcb   : > { %1196 = vmatpush.msra.mxu3 %v3531_v33 }
  0xcc   : > { %1224 = vmatpush.msrb.mxu0 %v3711_v17 }
  0xcd   : > { %1197 = vmatpush.msra.mxu3 %v3545_v39 }
  0xcf   : > { %1198 = vmatpush.msra.mxu3 %v3554_v42 }
  0xd1   : > { %1199 = vmatpush.msra.mxu3 %v3567_v49 }
  0xd3   : > { %1200 = vmatpush.msra.mxu3 %v3579_v53 }
  0xd5   : > { %1201 = vmatpush.msra.mxu3 %v3591_v57 }
  0xd7   : > { %1202 = vmatpush.msra.mxu3 %v3597_v60 }
  0xd9   : > { %1203 = vmatpush.msra.mxu3 %v3614_v7  ;;  %v3879_v7 = vld [vmem:[#allocation13 + $0x1] ss:$0 sm:$0xff] }
  0xdb   : > { %1204 = vmatpush.msra.mxu3 %v3629_v18 }
  0xe1   : > { %v665_v12 = vpop.f32.mrf.mxu0 }
  0xe4   : > { %v3854_v35 = vpop.f32.mrf.mxu3 }
  0xe5   : > { %4598 = vst [vmem:[#allocation35_spill] sm:$0xff] %v3854_v35  ;;  %v666_v35 = vadd.f32 %v665_v12, %v617_v50 }
  0xe9   : > { %v668_v54 = vpop.f32.mrf.mxu0 }
  0xea   : > { %v3856_v8 = vadd.f32 %v668_v54, %v617_v50 }
  0xec   : > { %4599 = vst [vmem:[#allocation36_spill] sm:$0xff] %v3856_v8 }
  0xed   : > { %v3858_v11 = vpop.f32.mrf.mxu3 }
  0xee   : > { %4600 = vst [vmem:[#allocation37_spill] sm:$0xff] %v3858_v11 }
  0xf1   : > { %v671_v20 = vpop.f32.mrf.mxu0 }
  0xf2   : > { %v3860_v21 = vadd.f32 %v671_v20, %v617_v50 }
  0xf4   : > { %4601 = vst [vmem:[#allocation38_spill] sm:$0xff] %v3860_v21 }
  0xf5   : > { %v3862_v28 = vpop.f32.mrf.mxu3 }
  0xf6   : > { %4602 = vst [vmem:[#allocation39_spill] sm:$0xff] %v3862_v28 }
  0xf9   : > { %v674_v34 = vpop.f32.mrf.mxu0 }
  0xfa   : > { %v3864_v40 = vadd.f32 %v674_v34, %v617_v50  ;;  %v3874_v34 = vperm.slane %v465_v30, 1 }
  0xfc   : > { %4603 = vst [vmem:[#allocation40_spill] sm:$0xff] %v3864_v40 }
  0xfd   : > { %v3866_v45 = vpop.f32.mrf.mxu3  ;;  %4608 = vst [vmem:[#allocation45_spill] sm:$0xff] %v3874_v34 }
  0xfe   : > { %4604 = vst [vmem:[#allocation41_spill] sm:$0xff] %v3866_v45 }
 0x101   : > { %v677_v48 = vpop.f32.mrf.mxu0 }
 0x102   : > { %v3868_v25 = vadd.f32 %v677_v48, %v617_v50  ;;  %v706_v48 = vpop.f32.mrf.mxu1 }
 0x104   : > { %4605 = vst [vmem:[#allocation42_spill] sm:$0xff] %v3868_v25 }
 0x105   : > { %v865_v17 = vpop.f32.mrf.mxu3 }
 0x106   : > { %v908_v18 = vadd.f32 %v865_v17, %v666_v35 }
 0x108   : > { %v2562_v54 = vmul.f32 -1.442695, %v908_v18  ;;  %v707_v18 = vadd.f32 %v706_v48, %v3874_v34 }
 0x109   : > { %v680_v8 = vpop.f32.mrf.mxu0 }
 0x10a   : > { %2706 = vpow2.f32 %v2562_v54  ;;  %v3870_v11 = vadd.f32 %v680_v8, %v617_v50 }
 0x10c   : > { %4606 = vst [vmem:[#allocation43_spill] sm:$0xff] %v3870_v11 }
 0x110   : > { %v2707_v20 = vpop.eup %2706 }
 0x111   : > { %v912_v21 = vadd.f32 1.0, %v2707_v20  ;;  %v683_v59 = vpop.f32.mrf.mxu0 }
 0x112   : > { %v3872_v28 = vadd.f32 %v683_v59, %v617_v50 }
 0x113   : > { %2708 = vrcp.f32 %v912_v21  ;;  %v924_v59 = vand.u32 2147483648, %v912_v21  ;;  %vm918_vm3 = vweird.f32 %v912_v21 }
 0x114   : > { %4607 = vst [vmem:[#allocation44_spill] sm:$0xff] %v3872_v28  ;;  %v922_v28 = vand.u32 2147483647, %v912_v21 }
 0x116   : > { %vm923_vm5 = vcmp.eq.f32.partialorder %v922_v28, 8.507059e+37 }
 0x119   : > { %v2709_v45 = vpop.eup %2708  ;;  %v686_v40 = vpop.f32.mrf.mxu0 }
 0x11a   : > { %v3876_v25 = vadd.f32 %v686_v40, %v617_v50  ;;  %v914_v12 = vmul.f32 %v2709_v45, %v912_v21  ;;  %vm919_vm2 = vweird.f32 %v2709_v45 }
 0x11b   : > { %vm920_vm4 = vmor %vm918_vm3, %vm919_vm2 }
 0x11c   : > { %4609 = vst [vmem:[#allocation46_spill] sm:$0xff] %v3876_v25  ;;  %v915_v17 = vsub.f32 1.0, %v914_v12  ;;  %v925_v25 = vor.u32 1.1754944e-38, %v924_v59 }
 0x11e   : > { %v916_v11 = vmul.f32 %v2709_v45, %v915_v17  ;;  %v3882_v17 = vperm.slane %v465_v30, 2  ;;  %v796_v30 = vsel %vm623_vm1, %v3668_v36, 0.0  ;;  %v4613_v36 = vld [vmem:[#allocation30_spill] sm:$0xff] }
 0x11f   : > { %v885_v35 = vpop.f32.mrf.mxu3 }
 0x120   : > { %v928_v8 = vadd.f32 %v885_v35, %v707_v18  ;;  %v917_v20 = vadd.f32 %v2709_v45, %v916_v11  ;;  %v747_v18 = vpop.f32.mrf.mxu2 }
 0x121   : > { %v905_v44 = vpop.f32.mrf.mxu0  ;;  %v748_v35 = vadd.f32 %v747_v18, %v3882_v17  ;;  %v4617_v18 = vld [vmem:[#allocation28_spill] sm:$0xff] }
 0x122   : > { %v2563_v54 = vmul.f32 -1.442695, %v928_v8  ;;  %v921_v50 = vsel %vm920_vm4, %v2709_v45, %v917_v20  ;;  %v948_v48 = vadd.f32 %v905_v44, %v3879_v7 }
 0x123   : > { %v926_v12 = vsel %vm923_vm5, %v925_v25, %v921_v50 }
 0x124   : > { %2710 = vpow2.f32 %v2563_v54  ;;  %v949_v11 = vmul.f32 %v948_v48, %v926_v12 }
 0x126   : > { %v950_v54 = vadd.f32 %v949_v11, %v748_v35  ;;  %v4618_v11 = vld [vmem:[#allocation34_spill] sm:$0xff]  ;;  %v709_v35 = vpop.f32.mrf.mxu1 }
 0x12a   : > { %v2711_v3 = vpop.eup %2710 }
 0x12b   : > { %v932_v40 = vadd.f32 1.0, %v2711_v3 }
 0x12d   : > { %2712 = vrcp.f32 %v932_v40  ;;  %v944_v1 = vand.u32 2147483648, %v932_v40  ;;  %v942_v3 = vand.u32 2147483647, %v932_v40  ;;  %vm938_vm7 = vweird.f32 %v932_v40 }
 0x12e   : > { %2714 = vtanh.f32 %v950_v54 }
 0x12f   : > { %v945_v44 = vor.u32 1.1754944e-38, %v944_v1  ;;  %vm943_vm9 = vcmp.eq.f32.partialorder %v942_v3, 8.507059e+37  ;;  %v4614_v1 = vld [vmem:[#allocation27_spill] sm:$0xff] }
 0x133   : > { %v2713_v21 = vpop.eup %2712 }
 0x134   : > { %v934_v8 = vmul.f32 %v2713_v21, %v932_v40  ;;  %vm939_vm6 = vweird.f32 %v2713_v21  ;;  %v2715_v59 = vpop.eup %2714  ;;  %v4616_v40 = vld [vmem:[#allocation31_spill] sm:$0xff] }
 0x135   : > { %vm940_vm8 = vmor %vm938_vm7, %vm939_vm6 }
 0x136   : > { %v935_v34 = vsub.f32 1.0, %v934_v8 }
 0x138   : > { %v936_v60 = vmul.f32 %v2713_v21, %v935_v34  ;;  %v4615_v34 = vld [vmem:[#allocation33_spill] sm:$0xff] }
 0x13a   : > { %v937_v28 = vadd.f32 %v2713_v21, %v936_v60  ;;  %v4612_v60 = vld [vmem:[#allocation32_spill] sm:$0xff] }
 0x13c   : > { %v941_v25 = vsel %vm940_vm8, %v2713_v21, %v937_v28  ;;  %v3940_v21 = vpop.f32.mrf.mxu1  ;;  %v750_v28 = vpop.f32.mrf.mxu2 }
 0x13d   : > { %v946_v45 = vsel %vm943_vm9, %v945_v44, %v941_v25  ;;  %4619 = vst [vmem:[#allocation48_spill] sm:$0xff] %v3940_v21  ;;  %v4628_v21 = vld [vmem:[#allocation45_spill] sm:$0xff] }
 0x13e   : > { %v952_v20 = vsub.f32 1.0, %v946_v45  ;;  %v954_v48 = vmul.f32 %v946_v45, %v796_v30 }
 0x140   : > { %v953_v50 = vmul.f32 %v2715_v59, %v952_v20  ;;  %v4627_v59 = vld [vmem:[#allocation36_spill] sm:$0xff] }
 0x142   : > { %v3887_v12 = vadd.f32 %v954_v48, %v953_v50 }
 0x144   : > { %4610 = vst [vmem:[#allocation47_spill] sm:$0xff] %v3887_v12  ;;  %977 = vmatmul.f32.vlgmr.msrb.gmra.mxu1 %v3887_v12  ;;  %997 = vmatmul.f32.vlgmr.msrb.gmra.mxu2 %v3887_v12  ;;  %v3942_v8 = vpop.f32.mrf.mxu1  ;;  %v3950_v25 = vpop.f32.mrf.mxu2 }
 0x145   : > { %1017 = vmatmul.f32.vlgmr.msrb.gmra.mxu3 %v3887_v12  ;;  %1229 = vmatpush.msrb.mxu1 %v3456_v58  ;;  %4620 = vst [vmem:[#allocation49_spill] sm:$0xff] %v3942_v8 }
 0x146   : > { %1303 = vmatpush.msrb.mxu2 %v3452_v55  ;;  %1323 = vmatpush.msrb.mxu3 %v3480_v9  ;;  %v4611_v55 = vld [vmem:[#allocation26_spill] sm:$0xff]  ;;  %4624 = vst [vmem:[#allocation53_spill] sm:$0xff] %v3950_v25 }
 0x147   : > { %1230 = vmatpush.msrb.mxu1 %v3463_v63 }
 0x148   : > { %1304 = vmatpush.msrb.mxu2 %v3461_v62  ;;  %1324 = vmatpush.msrb.mxu3 %v3495_v16 }
 0x149   : > { %1231 = vmatpush.msrb.mxu1 %v3474_v5 }
 0x14a   : > { %1305 = vmatpush.msrb.mxu2 %v3472_v4  ;;  %1325 = vmatpush.msrb.mxu3 %v3513_v24 }
 0x14b   : > { %1232 = vmatpush.msrb.mxu1 %v3508_v22 }
 0x14c   : > { %1306 = vmatpush.msrb.mxu2 %v3482_v10  ;;  %1326 = vmatpush.msrb.mxu3 %v3528_v32  ;;  %v3944_v54 = vpop.f32.mrf.mxu1  ;;  %v3954_v45 = vpop.f32.mrf.mxu2 }
 0x14d   : > { %1233 = vmatpush.msrb.mxu1 %v3516_v26  ;;  %4621 = vst [vmem:[#allocation50_spill] sm:$0xff] %v3944_v54 }
 0x14e   : > { %1307 = vmatpush.msrb.mxu2 %v3493_v14  ;;  %1327 = vmatpush.msrb.mxu3 %v3541_v38  ;;  %4626 = vst [vmem:[#allocation55_spill] sm:$0xff] %v3954_v45 }
 0x14f   : > { %1234 = vmatpush.msrb.mxu1 %v3556_v43 }
 0x150   : > { %1308 = vmatpush.msrb.mxu2 %v3504_v19  ;;  %1328 = vmatpush.msrb.mxu3 %v3562_v46 }
 0x151   : > { %1235 = vmatpush.msrb.mxu1 %v3565_v47 }
 0x152   : > { %1309 = vmatpush.msrb.mxu2 %v3518_v27  ;;  %1329 = vmatpush.msrb.mxu3 %v3574_v51 }
 0x153   : > { %1236 = vmatpush.msrb.mxu1 %v3577_v52 }
 0x154   : > { %1310 = vmatpush.msrb.mxu2 %v3531_v33  ;;  %1330 = vmatpush.msrb.mxu3 %v3586_v56  ;;  %v3946_v3 = vpop.f32.mrf.mxu1 }
 0x155   : > { %1237 = vmatpush.msrb.mxu1 %v3602_v0  ;;  %4622 = vst [vmem:[#allocation51_spill] sm:$0xff] %v3946_v3 }
 0x156   : > { %1311 = vmatpush.msrb.mxu2 %v3545_v39  ;;  %1331 = vmatpush.msrb.mxu3 %v3607_v2 }
 0x157   : > { %1238 = vmatpush.msrb.mxu1 %v3612_v6 }
 0x158   : > { %1312 = vmatpush.msrb.mxu2 %v3554_v42  ;;  %1332 = vmatpush.msrb.mxu3 %v3625_v13 }
 0x159   : > { %1239 = vmatpush.msrb.mxu1 %v3627_v15 }
 0x15a   : > { %1313 = vmatpush.msrb.mxu2 %v3567_v49  ;;  %1333 = vmatpush.msrb.mxu3 %v3654_v31 }
 0x15b   : > { %1240 = vmatpush.msrb.mxu1 %v3643_v23 }
 0x15c   : > { %1314 = vmatpush.msrb.mxu2 %v3579_v53  ;;  %1334 = vmatpush.msrb.mxu3 %v3670_v41  ;;  %v3948_v44 = vpop.f32.mrf.mxu1 }
 0x15d   : > { %1241 = vmatpush.msrb.mxu1 %v3652_v29  ;;  %4623 = vst [vmem:[#allocation52_spill] sm:$0xff] %v3948_v44 }
 0x15e   : > { %1315 = vmatpush.msrb.mxu2 %v3591_v57  ;;  %1335 = vmatpush.msrb.mxu3 %v3692_v61 }
 0x15f   : > { %1242 = vmatpush.msrb.mxu1 %v3661_v37 }
 0x160   : > { %1316 = vmatpush.msrb.mxu2 %v4611_v55  ;;  %1336 = vmatpush.msrb.mxu3 %v4612_v60 }
 0x161   : > { %1243 = vmatpush.msrb.mxu1 %v4613_v36 }
 0x162   : > { %1317 = vmatpush.msrb.mxu2 %v4614_v1  ;;  %1337 = vmatpush.msrb.mxu3 %v4615_v34 }
 0x163   : > { %1244 = vmatpush.msrb.mxu1 %v4616_v40 }
 0x164   : > { %1318 = vmatpush.msrb.mxu2 %v4617_v18  ;;  %1338 = vmatpush.msrb.mxu3 %v4618_v11  ;;  %v3952_v30 = vpop.f32.mrf.mxu1  ;;  %v710_v11 = vadd.f32 %v709_v35, %v4628_v21 }
 0x165   : > { %4625 = vst [vmem:[#allocation54_spill] sm:$0xff] %v3952_v30 }
 0x1c1   : > { %v978_v20 = vpop.f32.mrf.mxu1 }
 0x1c2   : > { %v1021_v50 = vadd.f32 %v978_v20, %v4627_v59 }
 0x1c4   : > { %v2564_v48 = vmul.f32 -1.442695, %v1021_v50 }
 0x1c6   : > { %2716 = vpow2.f32 %v2564_v48 }
 0x1c7   : > { %v998_v8 = vpop.f32.mrf.mxu2 }
 0x1c8   : > { %v1041_v54 = vadd.f32 %v998_v8, %v710_v11  ;;  %v1018_v35 = vpop.f32.mrf.mxu3 }
 0x1ca   : > { %v2565_v18 = vmul.f32 -1.442695, %v1041_v54  ;;  %v1061_v54 = vadd.f32 %v1018_v35, %v3879_v7 }
 0x1cc   : > { %v2717_v3 = vpop.eup %2716  ;;  %2718 = vpow2.f32 %v2565_v18 }
 0x1cd   : > { %v1025_v40 = vadd.f32 1.0, %v2717_v3  ;;  %v751_v3 = vadd.f32 %v750_v28, %v3882_v17 }
 0x1cf   : > { %2720 = vrcp.f32 %v1025_v40  ;;  %v1037_v1 = vand.u32 2147483648, %v1025_v40  ;;  %v1035_v20 = vand.u32 2147483647, %v1025_v40  ;;  %vm1031_vm11 = vweird.f32 %v1025_v40 }
 0x1d1   : > { %v1038_v11 = vor.u32 1.1754944e-38, %v1037_v1  ;;  %vm1036_vm13 = vcmp.eq.f32.partialorder %v1035_v20, 8.507059e+37 }
 0x1d2   : > { %v2719_v44 = vpop.eup %2718 }
 0x1d3   : > { %v1045_v25 = vadd.f32 1.0, %v2719_v44 }
 0x1d5   : > { %v2721_v34 = vpop.eup %2720  ;;  %2722 = vrcp.f32 %v1045_v25  ;;  %v1055_v60 = vand.u32 2147483647, %v1045_v25  ;;  %vm1051_vm15 = vweird.f32 %v1045_v25 }
 0x1d6   : > { %v1027_v30 = vmul.f32 %v2721_v34, %v1025_v40  ;;  %vm1032_vm10 = vweird.f32 %v2721_v34 }
 0x1d7   : > { %vm1033_vm12 = vmor %vm1031_vm11, %vm1032_vm10  ;;  %vm1056_vm2 = vcmp.eq.f32.partialorder %v1055_v60, 8.507059e+37 }
 0x1d8   : > { %v1028_v45 = vsub.f32 1.0, %v1027_v30 }
 0x1da   : > { %v1029_v36 = vmul.f32 %v2721_v34, %v1028_v45  ;;  %v1057_v45 = vand.u32 2147483648, %v1045_v25 }
 0x1db   : > { %v2723_v59 = vpop.eup %2722 }
 0x1dc   : > { %v1047_v50 = vmul.f32 %v2723_v59, %v1045_v25  ;;  %v1030_v48 = vadd.f32 %v2721_v34, %v1029_v36  ;;  %vm1052_vm14 = vweird.f32 %v2723_v59  ;;  %v1058_v36 = vor.u32 1.1754944e-38, %v1057_v45 }
 0x1dd   : > { %vm1053_vm1 = vmor %vm1051_vm15, %vm1052_vm14 }
 0x1de   : > { %v1048_v18 = vsub.f32 1.0, %v1047_v50  ;;  %v1034_v8 = vsel %vm1033_vm12, %v2721_v34, %v1030_v48  ;;  %v4642_v48 = vld [vmem:[#allocation53_spill] sm:$0xff] }
 0x1df   : > { %v1039_v44 = vsel %vm1036_vm13, %v1038_v11, %v1034_v8  ;;  %v754_v11 = vadd.f32 %v4642_v48, %v3882_v17  ;;  %v4148_v48 = vld [vmem:[#allocation7] sm:$0xff] }
 0x1e0   : > { %v1049_v30 = vmul.f32 %v2723_v59, %v1048_v18  ;;  %v1062_v21 = vmul.f32 %v1061_v54, %v1039_v44 }
 0x1e2   : > { %v1050_v55 = vadd.f32 %v2723_v59, %v1049_v30  ;;  %v1063_v37 = vadd.f32 %v1062_v21, %v751_v3  ;;  %v3967_v21 = vld [vmem:[#allocation7 + $0x168] sm:$0xff] }
 0x1e4   : > { %v1054_v40 = vsel %vm1053_vm1, %v2723_v59, %v1050_v55  ;;  %2724 = vtanh.f32 %v1063_v37 }
 0x1e5   : > { %v1059_v1 = vsel %vm1056_vm2, %v1058_v36, %v1054_v40 }
 0x1e6   : > { %v1065_v34 = vsub.f32 1.0, %v1059_v1  ;;  %v1067_v28 = vmul.f32 %v1059_v1, %v3887_v12 }
 0x1ea   : > { %v2725_v20 = vpop.eup %2724 }
 0x1eb   : > { %v1066_v35 = vmul.f32 %v2725_v20, %v1065_v34 }
 0x1ed   : > { %v3961_v50 = vadd.f32 %v1067_v28, %v1066_v35  ;;  %v4028_v35 = vld [vmem:[#allocation7 + $0x178] sm:$0xff]  ;;  %v4032_v28 = vld [vmem:[#allocation7 + $0x170] sm:$0xff] }
 0x1ef   : > { %4629 = vst [vmem:[#allocation36_spill] sm:$0xff] %v3961_v50  ;;  %1091 = vmatmul.f32.vlgmr.msra.gmra.mxu0 %v3961_v50  ;;  %1111 = vmatmul.f32.vlgmr.msra.gmra.mxu1 %v3961_v50 }
 0x1f0   : > { %1131 = vmatmul.f32.vlgmr.msra.gmra.mxu2 %v3961_v50  ;;  %1343 = vmatpush.msra.mxu0 %v3456_v58  ;;  %v4630_v58 = vld [vmem:[#allocation29_spill] sm:$0xff] }
 0x1f1   : > { %1417 = vmatpush.msra.mxu1 %v3967_v21  ;;  %1437 = vmatpush.msra.mxu2 %v3480_v9  ;;  %v4635_v9 = vld [vmem:[#allocation33_spill] sm:$0xff] }
 0x1f2   : > { %1344 = vmatpush.msra.mxu0 %v3463_v63  ;;  %v4632_v63 = vld [vmem:[#allocation32_spill] sm:$0xff] }
 0x1f3   : > { %1418 = vmatpush.msra.mxu1 %v3461_v62  ;;  %1438 = vmatpush.msra.mxu2 %v3495_v16  ;;  %v4631_v62 = vld [vmem:[#allocation26_spill] sm:$0xff] }
 0x1f4   : > { %1345 = vmatpush.msra.mxu0 %v3474_v5  ;;  %v4634_v5 = vld [vmem:[#allocation27_spill] sm:$0xff]  ;;  %v4638_v16 = vld [vmem:[#allocation34_spill] sm:$0xff] }
 0x1f5   : > { %1419 = vmatpush.msra.mxu1 %v3472_v4  ;;  %1439 = vmatpush.msra.mxu2 %v3513_v24  ;;  %v4633_v4 = vld [vmem:[#allocation30_spill] sm:$0xff] }
 0x1f6   : > { %1346 = vmatpush.msra.mxu0 %v3508_v22  ;;  %v4640_v22 = vld [vmem:[#allocation48_spill] sm:$0xff] }
 0x1f7   : > { %1420 = vmatpush.msra.mxu1 %v3482_v10  ;;  %1440 = vmatpush.msra.mxu2 %v3528_v32  ;;  %v4636_v10 = vld [vmem:[#allocation31_spill] sm:$0xff]  ;;  %v4641_v32 = vld [vmem:[#allocation38_spill] sm:$0xff] }
 0x1f8   : > { %1347 = vmatpush.msra.mxu0 %v3516_v26 }
 0x1f9   : > { %1421 = vmatpush.msra.mxu1 %v3493_v14  ;;  %1441 = vmatpush.msra.mxu2 %v3541_v38  ;;  %v4637_v14 = vld [vmem:[#allocation28_spill] sm:$0xff] }
 0x1fa   : > { %1348 = vmatpush.msra.mxu0 %v3556_v43 }
 0x1fb   : > { %1422 = vmatpush.msra.mxu1 %v3504_v19  ;;  %1442 = vmatpush.msra.mxu2 %v3562_v46  ;;  %v4639_v19 = vld [vmem:[#allocation45_spill] sm:$0xff] }
 0x1fc   : > { %1349 = vmatpush.msra.mxu0 %v3565_v47  ;;  %v713_v24 = vadd.f32 %v4640_v22, %v4639_v19  ;;  %v4044_v22 = vld [vmem:[#allocation7 + $0x148] sm:$0xff] }
 0x1fd   : > { %1423 = vmatpush.msra.mxu1 %v3518_v27  ;;  %1443 = vmatpush.msra.mxu2 %v3574_v51 }
 0x1fe   : > { %1350 = vmatpush.msra.mxu0 %v3577_v52 }
 0x1ff   : > { %1424 = vmatpush.msra.mxu1 %v3531_v33  ;;  %1444 = vmatpush.msra.mxu2 %v3586_v56 }
 0x200   : > { %1351 = vmatpush.msra.mxu0 %v3602_v0 }
 0x201   : > { %1425 = vmatpush.msra.mxu1 %v3545_v39  ;;  %1445 = vmatpush.msra.mxu2 %v3607_v2 }
 0x202   : > { %1352 = vmatpush.msra.mxu0 %v3612_v6 }
 0x203   : > { %1426 = vmatpush.msra.mxu1 %v3554_v42  ;;  %1446 = vmatpush.msra.mxu2 %v3625_v13 }
 0x204   : > { %1353 = vmatpush.msra.mxu0 %v3627_v15 }
 0x205   : > { %1427 = vmatpush.msra.mxu1 %v3567_v49  ;;  %1447 = vmatpush.msra.mxu2 %v3654_v31 }
 0x206   : > { %1354 = vmatpush.msra.mxu0 %v3643_v23 }
 0x207   : > { %1428 = vmatpush.msra.mxu1 %v3579_v53  ;;  %1448 = vmatpush.msra.mxu2 %v3670_v41 }
 0x208   : > { %1355 = vmatpush.msra.mxu0 %v3652_v29 }
 0x209   : > { %1429 = vmatpush.msra.mxu1 %v3591_v57  ;;  %1449 = vmatpush.msra.mxu2 %v3692_v61 }
 0x20a   : > { %1356 = vmatpush.msra.mxu0 %v4630_v58 }
 0x20b   : > { %1430 = vmatpush.msra.mxu1 %v4631_v62  ;;  %1450 = vmatpush.msra.mxu2 %v4632_v63  ;;  %v4035_v62 = vld [vmem:[#allocation7 + $0x160] sm:$0xff] }
 0x20c   : > { %1357 = vmatpush.msra.mxu0 %v4633_v4 }
 0x20d   : > { %1431 = vmatpush.msra.mxu1 %v4634_v5  ;;  %1451 = vmatpush.msra.mxu2 %v4635_v9  ;;  %v4038_v5 = vld [vmem:[#allocation7 + $0x150] sm:$0xff] }
 0x20e   : > { %1358 = vmatpush.msra.mxu0 %v4636_v10 }
 0x20f   : > { %1432 = vmatpush.msra.mxu1 %v4637_v14  ;;  %1452 = vmatpush.msra.mxu2 %v4638_v16  ;;  %v4041_v14 = vld [vmem:[#allocation7 + $0x158] sm:$0xff] }
 0x26c   : > { %v1092_v26 = vpop.f32.mrf.mxu0  ;;  %v1112_v27 = vpop.f32.mrf.mxu1 }
 0x26d   : > { %v1135_v33 = vadd.f32 %v1092_v26, %v4641_v32  ;;  %v1155_v38 = vadd.f32 %v1112_v27, %v713_v24  ;;  %v4047_v24 = vld [vmem:[#allocation7 + $0x138] sm:$0xff]  ;;  %v4050_v26 = vld [vmem:[#allocation7 + $0x140] sm:$0xff]  ;;  %v4053_v27 = vld [vmem:[#allocation7 + $0x130] sm:$0xff] }
 0x26e   : > { %v4056_v32 = vld [vmem:[#allocation7 + $0x120] sm:$0xff] }
 0x26f   : > { %v2566_v39 = vmul.f32 -1.442695, %v1135_v33  ;;  %v2567_v42 = vmul.f32 -1.442695, %v1155_v38  ;;  %v4059_v33 = vld [vmem:[#allocation7 + $0x128] sm:$0xff]  ;;  %v4062_v38 = vld [vmem:[#allocation7 + $0x118] sm:$0xff] }
 0x271   : > { %2726 = vpow2.f32 %v2566_v39  ;;  %v4065_v39 = vld [vmem:[#allocation7 + $0x108] sm:$0xff] }
 0x272   : > { %2728 = vpow2.f32 %v2567_v42  ;;  %v4068_v42 = vld [vmem:[#allocation7 + $0x110] sm:$0xff] }
 0x273   : > { %v1132_v23 = vpop.f32.mrf.mxu2 }
 0x274   : > { %v1175_v60 = vadd.f32 %v1132_v23, %v3879_v7  ;;  %v4113_v23 = vld [vmem:[#allocation7 + $0x98] sm:$0xff] }
 0x277   : > { %v2727_v43 = vpop.eup %2726 }
 0x278   : > { %v2729_v46 = vpop.eup %2728  ;;  %v1139_v47 = vadd.f32 1.0, %v2727_v43  ;;  %v4071_v43 = vld [vmem:[#allocation7 + $0x100] sm:$0xff] }
 0x279   : > { %v1159_v49 = vadd.f32 1.0, %v2729_v46  ;;  %v4074_v46 = vld [vmem:[#allocation7 + $0xf0] sm:$0xff] }
 0x27a   : > { %2730 = vrcp.f32 %v1139_v47  ;;  %v1151_v2 = vand.u32 2147483648, %v1139_v47  ;;  %v1149_v13 = vand.u32 2147483647, %v1139_v47  ;;  %vm1145_vm4 = vweird.f32 %v1139_v47 }
 0x27b   : > { %2732 = vrcp.f32 %v1159_v49  ;;  %v1171_v18 = vand.u32 2147483648, %v1159_v49  ;;  %vm1165_vm8 = vweird.f32 %v1159_v49  ;;  %v1169_v54 = vand.u32 2147483647, %v1159_v49 }
 0x27c   : > { %v1152_v37 = vor.u32 1.1754944e-38, %v1151_v2  ;;  %vm1150_vm6 = vcmp.eq.f32.partialorder %v1149_v13, 8.507059e+37  ;;  %v4101_v2 = vld [vmem:[#allocation7 + $0xa8] sm:$0xff]  ;;  %v4107_v13 = vld [vmem:[#allocation7 + $0xa0] sm:$0xff] }
 0x27d   : > { %v1172_v30 = vor.u32 1.1754944e-38, %v1171_v18  ;;  %vm1170_vm10 = vcmp.eq.f32.partialorder %v1169_v54, 8.507059e+37 }
 0x280   : > { %v2731_v51 = vpop.eup %2730 }
 0x281   : > { %v2733_v52 = vpop.eup %2732  ;;  %v1141_v53 = vmul.f32 %v2731_v51, %v1139_v47  ;;  %vm1146_vm3 = vweird.f32 %v2731_v51  ;;  %v4077_v47 = vld [vmem:[#allocation7 + $0xf8] sm:$0xff] }
 0x282   : > { %v1161_v56 = vmul.f32 %v2733_v52, %v1159_v49  ;;  %vm1147_vm5 = vmor %vm1145_vm4, %vm1146_vm3  ;;  %vm1166_vm7 = vweird.f32 %v2733_v52  ;;  %v4080_v49 = vld [vmem:[#allocation7 + $0xe8] sm:$0xff] }
 0x283   : > { %v1142_v57 = vsub.f32 1.0, %v1141_v53  ;;  %vm1167_vm9 = vmor %vm1165_vm8, %vm1166_vm7  ;;  %v4089_v53 = vld [vmem:[#allocation7 + $0xd0] sm:$0xff] }
 0x284   : > { %v1162_v0 = vsub.f32 1.0, %v1161_v56  ;;  %v4092_v56 = vld [vmem:[#allocation7 + $0xc0] sm:$0xff] }
 0x285   : > { %v1143_v6 = vmul.f32 %v2731_v51, %v1142_v57  ;;  %v4095_v57 = vld [vmem:[#allocation7 + $0xc8] sm:$0xff] }
 0x286   : > { %v1163_v15 = vmul.f32 %v2733_v52, %v1162_v0  ;;  %v4098_v0 = vld [vmem:[#allocation7 + $0xb8] sm:$0xff] }
 0x287   : > { %v1144_v29 = vadd.f32 %v2731_v51, %v1143_v6  ;;  %v4104_v6 = vld [vmem:[#allocation7 + $0xb0] sm:$0xff] }
 0x288   : > { %v1164_v25 = vadd.f32 %v2733_v52, %v1163_v15  ;;  %v4110_v15 = vld [vmem:[#allocation7 + $0x90] sm:$0xff] }
 0x289   : > { %v1148_v55 = vsel %vm1147_vm5, %v2731_v51, %v1144_v29  ;;  %v4083_v51 = vld [vmem:[#allocation7 + $0xd8] sm:$0xff]  ;;  %v4116_v29 = vld [vmem:[#allocation7 + $0x88] sm:$0xff] }
 0x28a   : > { %v1153_v59 = vsel %vm1150_vm6, %v1152_v37, %v1148_v55  ;;  %v1168_v44 = vsel %vm1167_vm9, %v2733_v52, %v1164_v25  ;;  %v4086_v52 = vld [vmem:[#allocation7 + $0xe0] sm:$0xff]  ;;  %v4119_v37 = vld [vmem:[#allocation7 + $0x78] sm:$0xff]  ;;  %v4123_v55 = vld [vmem:[#allocation7 + $0x70] sm:$0xff] }
 0x28b   : > { %v1176_v8 = vmul.f32 %v1175_v60, %v1153_v59  ;;  %v1173_v45 = vsel %vm1170_vm10, %v1172_v30, %v1168_v44  ;;  %v4126_v60 = vld [vmem:[#allocation7 + $0x60] sm:$0xff]  ;;  %v4130_v25 = vld [vmem:[#allocation7 + $0x58] sm:$0xff]  ;;  %v4133_v59 = vld [vmem:[#allocation7 + $0x48] sm:$0xff] }
 0x28c   : > { %v1179_v36 = vsub.f32 1.0, %v1173_v45  ;;  %v1181_v34 = vmul.f32 %v1173_v45, %v3961_v50 }
 0x28d   : > { %v1177_v3 = vadd.f32 %v1176_v8, %v754_v11  ;;  %v4644_v8 = vld [vmem:[#allocation40_spill] sm:$0xff] }
 0x28f   : > { %2734 = vtanh.f32 %v1177_v3 }
 0x295   : > { %v2735_v40 = vpop.eup %2734 }
 0x296   : > { %v1180_v1 = vmul.f32 %v2735_v40, %v1179_v36 }
 0x298   : > { %v4023_v20 = vadd.f32 %v1181_v34, %v1180_v1 }
 0x29a   : > { %1205 = vmatmul.f32.vlgmr.msra.gmra.mxu3 %v4023_v20  ;;  %1225 = vmatmul.f32.vlgmr.msrb.gmra.mxu0 %v4023_v20 }
 0x29b   : > { %1245 = vmatmul.f32.vlgmr.msrb.gmra.mxu1 %v4023_v20  ;;  %1457 = vmatpush.msra.mxu3 %v4028_v35 }
 0x29c   : > { %1531 = vmatpush.msrb.mxu0 %v3967_v21  ;;  %1551 = vmatpush.msrb.mxu1 %v4032_v28 }
 0x29d   : > { %1458 = vmatpush.msra.mxu3 %v4035_v62 }
 0x29e   : > { %1532 = vmatpush.msrb.mxu0 %v4038_v5  ;;  %1552 = vmatpush.msrb.mxu1 %v4041_v14 }
 0x29f   : > { %1459 = vmatpush.msra.mxu3 %v4044_v22 }
 0x2a0   : > { %1533 = vmatpush.msrb.mxu0 %v4047_v24  ;;  %1553 = vmatpush.msrb.mxu1 %v4050_v26 }
 0x2a1   : > { %1460 = vmatpush.msra.mxu3 %v4053_v27 }
 0x2a2   : > { %1534 = vmatpush.msrb.mxu0 %v4056_v32  ;;  %1554 = vmatpush.msrb.mxu1 %v4059_v33 }
 0x2a3   : > { %1461 = vmatpush.msra.mxu3 %v4062_v38 }
 0x2a4   : > { %1535 = vmatpush.msrb.mxu0 %v4065_v39  ;;  %1555 = vmatpush.msrb.mxu1 %v4068_v42 }
 0x2a5   : > { %1462 = vmatpush.msra.mxu3 %v4071_v43 }
 0x2a6   : > { %1536 = vmatpush.msrb.mxu0 %v4074_v46  ;;  %1556 = vmatpush.msrb.mxu1 %v4077_v47 }
 0x2a7   : > { %1463 = vmatpush.msra.mxu3 %v4080_v49 }
 0x2a8   : > { %1537 = vmatpush.msrb.mxu0 %v4083_v51  ;;  %1557 = vmatpush.msrb.mxu1 %v4086_v52 }
 0x2a9   : > { %1464 = vmatpush.msra.mxu3 %v4089_v53 }
 0x2aa   : > { %1538 = vmatpush.msrb.mxu0 %v4092_v56  ;;  %1558 = vmatpush.msrb.mxu1 %v4095_v57 }
 0x2ab   : > { %1465 = vmatpush.msra.mxu3 %v4098_v0 }
 0x2ac   : > { %1539 = vmatpush.msrb.mxu0 %v4101_v2  ;;  %1559 = vmatpush.msrb.mxu1 %v4104_v6 }
 0x2ad   : > { %1466 = vmatpush.msra.mxu3 %v4107_v13 }
 0x2ae   : > { %1540 = vmatpush.msrb.mxu0 %v4110_v15  ;;  %1560 = vmatpush.msrb.mxu1 %v4113_v23 }
 0x2af   : > { %1467 = vmatpush.msra.mxu3 %v4116_v29 }
 0x2b0   : > { %1541 = vmatpush.msrb.mxu0 %v4119_v37  ;;  %1561 = vmatpush.msrb.mxu1 %v3654_v31  ;;  %v4138_v31 = vld [vmem:[#allocation7 + $0x30] sm:$0xff] }
 0x2b1   : > { %1468 = vmatpush.msra.mxu3 %v4123_v55 }
 0x2b2   : > { %1542 = vmatpush.msrb.mxu0 %v4126_v60  ;;  %1562 = vmatpush.msrb.mxu1 %v3670_v41  ;;  %v4143_v41 = vld [vmem:[#allocation7 + $0x18] sm:$0xff] }
 0x2b3   : > { %1469 = vmatpush.msra.mxu3 %v4130_v25 }
 0x2b4   : > { %1543 = vmatpush.msrb.mxu0 %v4133_v59  ;;  %1563 = vmatpush.msrb.mxu1 %v3692_v61  ;;  %v4643_v61 = vld [vmem:[#allocation49_spill] sm:$0xff] }
 0x2b5   : > { %1470 = vmatpush.msra.mxu3 %v4630_v58  ;;  %v716_v58 = vadd.f32 %v4643_v61, %v4639_v19 }
 0x2b6   : > { %1544 = vmatpush.msrb.mxu0 %v4138_v31  ;;  %1564 = vmatpush.msrb.mxu1 %v4632_v63 }
 0x2b7   : > { %1471 = vmatpush.msra.mxu3 %v4633_v4 }
 0x2b8   : > { %1545 = vmatpush.msrb.mxu0 %v4143_v41  ;;  %1565 = vmatpush.msrb.mxu1 %v4635_v9 }
 0x2b9   : > { %1472 = vmatpush.msra.mxu3 %v4636_v10 }
 0x2ba   : > { %1546 = vmatpush.msrb.mxu0 %v4148_v48  ;;  %1566 = vmatpush.msrb.mxu1 %v4638_v16 }
 0x317   : > { %v1226_v63 = vpop.f32.mrf.mxu0 }
 0x318   : > { %v1269_v11 = vadd.f32 %v1226_v63, %v716_v58 }
 0x31a   : > { %v2569_v4 = vmul.f32 -1.442695, %v1269_v11 }
 0x31c   : > { %2736 = vpow2.f32 %v2569_v4  ;;  %v1246_v4 = vpop.f32.mrf.mxu1 }
 0x31d   : > { %v1206_v18 = vpop.f32.mrf.mxu3 }
 0x31e   : > { %v1249_v54 = vadd.f32 %v1206_v18, %v4644_v8 }
 0x320   : > { %v2568_v3 = vmul.f32 -1.442695, %v1249_v54  ;;  %v1289_v54 = vadd.f32 %v1246_v4, %v3879_v7 }
 0x322   : > { %v2737_v9 = vpop.eup %2736  ;;  %2738 = vpow2.f32 %v2568_v3 }
 0x323   : > { %v1273_v10 = vadd.f32 1.0, %v2737_v9 }
 0x325   : > { %2740 = vrcp.f32 %v1273_v10  ;;  %v1285_v12 = vand.u32 2147483648, %v1273_v10  ;;  %vm1279_vm1 = vweird.f32 %v1273_v10  ;;  %v1283_v50 = vand.u32 2147483647, %v1273_v10 }
 0x327   : > { %vm1284_vm3 = vcmp.eq.f32.partialorder %v1283_v50, 8.507059e+37  ;;  %v2858_v50 = vld [vmem:[#allocation7 + $0x68] sm:$0xff] }
 0x328   : > { %v2739_v44 = vpop.eup %2738 }
 0x329   : > { %v1253_v30 = vadd.f32 1.0, %v2739_v44 }
 0x32b   : > { %2742 = vrcp.f32 %v1253_v30  ;;  %v2741_v45 = vpop.eup %2740  ;;  %v1265_v61 = vand.u32 2147483648, %v1253_v30  ;;  %v1263_v63 = vand.u32 2147483647, %v1253_v30  ;;  %vm1259_vm12 = vweird.f32 %v1253_v30 }
 0x32c   : > { %v1275_v16 = vmul.f32 %v2741_v45, %v1273_v10  ;;  %vm1280_vm15 = vweird.f32 %v2741_v45 }
 0x32d   : > { %v1266_v8 = vor.u32 1.1754944e-38, %v1265_v61  ;;  %vm1264_vm14 = vcmp.eq.f32.partialorder %v1263_v63, 8.507059e+37  ;;  %vm1281_vm2 = vmor %vm1279_vm1, %vm1280_vm15 }
 0x32e   : > { %v1276_v1 = vsub.f32 1.0, %v1275_v16  ;;  %v4645_v16 = vld [vmem:[#allocation55_spill] sm:$0xff] }
 0x330   : > { %v1277_v11 = vmul.f32 %v2741_v45, %v1276_v1 }
 0x331   : > { %v2743_v36 = vpop.eup %2742 }
 0x332   : > { %v1255_v40 = vmul.f32 %v2743_v36, %v1253_v30  ;;  %vm1260_vm11 = vweird.f32 %v2743_v36  ;;  %v1278_v9 = vadd.f32 %v2741_v45, %v1277_v11  ;;  %v1286_v30 = vor.u32 1.1754944e-38, %v1285_v12  ;;  %v2857_v12 = vld [vmem:[#allocation7 + $0x80] sm:$0xff] }
 0x333   : > { %vm1261_vm13 = vmor %vm1259_vm12, %vm1260_vm11 }
 0x334   : > { %v1256_v34 = vsub.f32 1.0, %v1255_v40  ;;  %v757_v40 = vadd.f32 %v4645_v16, %v3882_v17 }
 0x336   : > { %v1257_v58 = vmul.f32 %v2743_v36, %v1256_v34 }
 0x338   : > { %v1258_v18 = vadd.f32 %v2743_v36, %v1257_v58  ;;  %v1282_v58 = vsel %vm1281_vm2, %v2741_v45, %v1278_v9 }
 0x339   : > { %v1287_v61 = vsel %vm1284_vm3, %v1286_v30, %v1282_v58  ;;  %v4648_v58 = vld [vmem:[#allocation35_spill] sm:$0xff] }
 0x33a   : > { %v1262_v3 = vsel %vm1261_vm13, %v2743_v36, %v1258_v18  ;;  %v1293_v4 = vsub.f32 1.0, %v1287_v61  ;;  %v1295_v11 = vmul.f32 %v1287_v61, %v4023_v20  ;;  %v760_v30 = vadd.f32 %v4648_v58, %v3882_v17 }
 0x33b   : > { %v1267_v44 = vsel %vm1264_vm14, %v1266_v8, %v1262_v3 }
 0x33c   : > { %v1290_v34 = vmul.f32 %v1289_v54, %v1267_v44 }
 0x33e   : > { %v1291_v1 = vadd.f32 %v1290_v34, %v757_v40 }
 0x340   : > { %2744 = vtanh.f32 %v1291_v1 }
 0x346   : > { %v2745_v36 = vpop.eup %2744 }
 0x347   : > { %v1294_v63 = vmul.f32 %v2745_v36, %v1293_v4 }
 0x349   : > { %v4159_v18 = vadd.f32 %v1295_v11, %v1294_v63 }
 0x34b   : > { %1319 = vmatmul.f32.vlgmr.msrb.gmra.mxu2 %v4159_v18  ;;  %1339 = vmatmul.f32.vlgmr.msrb.gmra.mxu3 %v4159_v18 }
 0x34c   : > { %1359 = vmatmul.f32.vlgmr.msra.gmra.mxu0 %v4159_v18  ;;  %1571 = vmatpush.msrb.mxu2 %v4028_v35 }
 0x34d   : > { %1645 = vmatpush.msrb.mxu3 %v3967_v21  ;;  %1665 = vmatpush.msra.mxu0 %v4032_v28  ;;  %v2859_v21 = vld [vmem:[#allocation7 + $0x50] sm:$0xff]  ;;  %v4200_v28 = vld [vmem:[#allocation7 + $0x40] sm:$0xff] }
 0x34e   : > { %1572 = vmatpush.msrb.mxu2 %v4035_v62 }
 0x34f   : > { %1646 = vmatpush.msrb.mxu3 %v4038_v5  ;;  %1666 = vmatpush.msra.mxu0 %v4041_v14  ;;  %v2861_v5 = vld [vmem:[#allocation7 + $0x38] sm:$0xff]  ;;  %v4204_v14 = vld [vmem:[#allocation7 + $0x28] sm:$0xff] }
 0x350   : > { %1573 = vmatpush.msrb.mxu2 %v4044_v22 }
 0x351   : > { %1647 = vmatpush.msrb.mxu3 %v4047_v24  ;;  %1667 = vmatpush.msra.mxu0 %v4050_v26  ;;  %v2863_v24 = vld [vmem:[#allocation7 + $0x20] sm:$0xff]  ;;  %v4208_v26 = vld [vmem:[#allocation7 + $0x10] sm:$0xff] }
 0x352   : > { %1574 = vmatpush.msrb.mxu2 %v4053_v27 }
 0x353   : > { %1648 = vmatpush.msrb.mxu3 %v4056_v32  ;;  %1668 = vmatpush.msra.mxu0 %v4059_v33  ;;  %v2865_v32 = vld [vmem:[#allocation7 + $0x8] sm:$0xff]  ;;  %v4646_v33 = vld [vmem:[#allocation50_spill] sm:$0xff] }
 0x354   : > { %1575 = vmatpush.msrb.mxu2 %v4062_v38 }
 0x355   : > { %1649 = vmatpush.msrb.mxu3 %v4065_v39  ;;  %1669 = vmatpush.msra.mxu0 %v4068_v42  ;;  %v719_v39 = vadd.f32 %v4646_v33, %v4639_v19 }
 0x356   : > { %1576 = vmatpush.msrb.mxu2 %v4071_v43 }
 0x357   : > { %1650 = vmatpush.msrb.mxu3 %v4074_v46  ;;  %1670 = vmatpush.msra.mxu0 %v4077_v47  ;;  %v4647_v47 = vld [vmem:[#allocation42_spill] sm:$0xff] }
 0x358   : > { %1577 = vmatpush.msrb.mxu2 %v4080_v49 }
 0x359   : > { %1651 = vmatpush.msrb.mxu3 %v4083_v51  ;;  %1671 = vmatpush.msra.mxu0 %v4086_v52 }
 0x35a   : > { %1578 = vmatpush.msrb.mxu2 %v4089_v53 }
 0x35b   : > { %1652 = vmatpush.msrb.mxu3 %v4092_v56  ;;  %1672 = vmatpush.msra.mxu0 %v4095_v57 }
 0x35c   : > { %1579 = vmatpush.msrb.mxu2 %v4098_v0 }
 0x35d   : > { %1653 = vmatpush.msrb.mxu3 %v4101_v2  ;;  %1673 = vmatpush.msra.mxu0 %v4104_v6 }
 0x35e   : > { %1580 = vmatpush.msrb.mxu2 %v4107_v13 }
 0x35f   : > { %1654 = vmatpush.msrb.mxu3 %v4110_v15  ;;  %1674 = vmatpush.msra.mxu0 %v4113_v23 }
 0x360   : > { %1581 = vmatpush.msrb.mxu2 %v4116_v29 }
 0x361   : > { %1655 = vmatpush.msrb.mxu3 %v4119_v37  ;;  %1675 = vmatpush.msra.mxu0 %v2857_v12 }
 0x362   : > { %1582 = vmatpush.msrb.mxu2 %v4123_v55 }
 0x363   : > { %1656 = vmatpush.msrb.mxu3 %v4126_v60  ;;  %1676 = vmatpush.msra.mxu0 %v2858_v50 }
 0x364   : > { %1583 = vmatpush.msrb.mxu2 %v4130_v25 }
 0x365   : > { %1657 = vmatpush.msrb.mxu3 %v4133_v59  ;;  %1677 = vmatpush.msra.mxu0 %v2859_v21 }
 0x366   : > { %1584 = vmatpush.msrb.mxu2 %v4200_v28 }
 0x367   : > { %1658 = vmatpush.msrb.mxu3 %v4138_v31  ;;  %1678 = vmatpush.msra.mxu0 %v2861_v5 }
 0x368   : > { %1585 = vmatpush.msrb.mxu2 %v4204_v14 }
 0x369   : > { %1659 = vmatpush.msrb.mxu3 %v4143_v41  ;;  %1679 = vmatpush.msra.mxu0 %v2863_v24 }
 0x36a   : > { %1586 = vmatpush.msrb.mxu2 %v4208_v26 }
 0x36b   : > { %1660 = vmatpush.msrb.mxu3 %v4148_v48  ;;  %1680 = vmatpush.msra.mxu0 %v2865_v32 }
 0x3c9   : > { %v1360_v54 = vpop.f32.mrf.mxu0 }
 0x3ca   : > { %v1403_v16 = vadd.f32 %v1360_v54, %v3879_v7 }
 0x3ce   : > { %v1320_v42 = vpop.f32.mrf.mxu2  ;;  %v1340_v46 = vpop.f32.mrf.mxu3 }
 0x3cf   : > { %v1363_v51 = vadd.f32 %v1320_v42, %v4647_v47  ;;  %v1383_v52 = vadd.f32 %v1340_v46, %v719_v39 }
 0x3d1   : > { %v2570_v56 = vmul.f32 -1.442695, %v1363_v51  ;;  %v2571_v57 = vmul.f32 -1.442695, %v1383_v52 }
 0x3d3   : > { %2746 = vpow2.f32 %v2570_v56 }
 0x3d4   : > { %2748 = vpow2.f32 %v2571_v57 }
 0x3d9   : > { %v2747_v2 = vpop.eup %2746 }
 0x3da   : > { %v2749_v6 = vpop.eup %2748  ;;  %v1367_v15 = vadd.f32 1.0, %v2747_v2 }
 0x3db   : > { %v1387_v23 = vadd.f32 1.0, %v2749_v6  ;;  %v4243_v6 = vld [vmem:[#allocation13 + $0x1] ss:$0 sm:$0xff] }
 0x3dc   : > { %2750 = vrcp.f32 %v1367_v15  ;;  %v1379_v48 = vand.u32 2147483648, %v1367_v15  ;;  %v1377_v8 = vand.u32 2147483647, %v1367_v15  ;;  %vm1373_vm5 = vweird.f32 %v1367_v15 }
 0x3dd   : > { %2752 = vrcp.f32 %v1387_v23  ;;  %v1399_v4 = vand.u32 2147483648, %v1387_v23  ;;  %vm1393_vm9 = vweird.f32 %v1387_v23  ;;  %v1397_v36 = vand.u32 2147483647, %v1387_v23 }
 0x3de   : > { %v1380_v44 = vor.u32 1.1754944e-38, %v1379_v48  ;;  %vm1378_vm7 = vcmp.eq.f32.partialorder %v1377_v8, 8.507059e+37 }
 0x3df   : > { %v1400_v12 = vor.u32 1.1754944e-38, %v1399_v4  ;;  %vm1398_vm11 = vcmp.eq.f32.partialorder %v1397_v36, 8.507059e+37  ;;  %v4653_v4 = vld [vmem:[#allocation44_spill] sm:$0xff] }
 0x3e2   : > { %v2751_v37 = vpop.eup %2750 }
 0x3e3   : > { %v2753_v60 = vpop.eup %2752  ;;  %v1369_v59 = vmul.f32 %v2751_v37, %v1367_v15  ;;  %vm1374_vm4 = vweird.f32 %v2751_v37 }
 0x3e4   : > { %v1389_v31 = vmul.f32 %v2753_v60, %v1387_v23  ;;  %vm1375_vm6 = vmor %vm1373_vm5, %vm1374_vm4  ;;  %vm1394_vm8 = vweird.f32 %v2753_v60  ;;  %v4651_v23 = vld [vmem:[#allocation37_spill] sm:$0xff] }
 0x3e5   : > { %v1370_v41 = vsub.f32 1.0, %v1369_v59  ;;  %vm1395_vm10 = vmor %vm1393_vm9, %vm1394_vm8 }
 0x3e6   : > { %v1390_v10 = vsub.f32 1.0, %v1389_v31 }
 0x3e7   : > { %v1371_v45 = vmul.f32 %v2751_v37, %v1370_v41 }
 0x3e8   : > { %v1391_v3 = vmul.f32 %v2753_v60, %v1390_v10 }
 0x3e9   : > { %v1372_v9 = vadd.f32 %v2751_v37, %v1371_v45 }
 0x3ea   : > { %v1392_v1 = vadd.f32 %v2753_v60, %v1391_v3 }
 0x3eb   : > { %v1376_v40 = vsel %vm1375_vm6, %v2751_v37, %v1372_v9  ;;  %v763_v37 = vadd.f32 %v4651_v23, %v3882_v17 }
 0x3ec   : > { %v1381_v34 = vsel %vm1378_vm7, %v1380_v44, %v1376_v40  ;;  %v1396_v11 = vsel %vm1395_vm10, %v2753_v60, %v1392_v1  ;;  %v4652_v1 = vld [vmem:[#allocation52_spill] sm:$0xff] }
 0x3ed   : > { %v1404_v61 = vmul.f32 %v1403_v16, %v1381_v34  ;;  %v1401_v50 = vsel %vm1398_vm11, %v1400_v12, %v1396_v11  ;;  %v725_v58 = vadd.f32 %v4652_v1, %v4639_v19  ;;  %v1888_v1 = vld [vmem:[#allocation9 + $0x60] sm:$0xff] }
 0x3ee   : > { %v1407_v7 = vsub.f32 1.0, %v1401_v50  ;;  %v1409_v24 = vmul.f32 %v1401_v50, %v4159_v18 }
 0x3ef   : > { %v1405_v63 = vadd.f32 %v1404_v61, %v760_v30 }
 0x3f1   : > { %2754 = vtanh.f32 %v1405_v63 }
 0x3f7   : > { %v2755_v21 = vpop.eup %2754 }
 0x3f8   : > { %v1408_v5 = vmul.f32 %v2755_v21, %v1407_v7 }
 0x3fa   : > { %v4219_v32 = vadd.f32 %v1409_v24, %v1408_v5 }
 0x3fc   : > { %1433 = vmatmul.f32.vlgmr.msra.gmra.mxu1 %v4219_v32  ;;  %1453 = vmatmul.f32.vlgmr.msra.gmra.mxu2 %v4219_v32 }
 0x3fd   : > { %1473 = vmatmul.f32.vlgmr.msra.gmra.mxu3 %v4219_v32  ;;  %1685 = vmatpush.msra.mxu1 %v4028_v35 }
 0x3ff   : > { %1686 = vmatpush.msra.mxu1 %v4035_v62  ;;  %v4649_v62 = vld [vmem:[#allocation43_spill] sm:$0xff] }
 0x401   : > { %1687 = vmatpush.msra.mxu1 %v4044_v22 }
 0x403   : > { %1688 = vmatpush.msra.mxu1 %v4053_v27 }
 0x405   : > { %1689 = vmatpush.msra.mxu1 %v4062_v38  ;;  %v4650_v38 = vld [vmem:[#allocation51_spill] sm:$0xff] }
 0x407   : > { %1690 = vmatpush.msra.mxu1 %v4071_v43  ;;  %v722_v43 = vadd.f32 %v4650_v38, %v4639_v19 }
 0x409   : > { %1691 = vmatpush.msra.mxu1 %v4080_v49 }
 0x40b   : > { %1692 = vmatpush.msra.mxu1 %v4089_v53 }
 0x40d   : > { %1693 = vmatpush.msra.mxu1 %v4098_v0 }
 0x40f   : > { %1694 = vmatpush.msra.mxu1 %v4107_v13 }
 0x411   : > { %1695 = vmatpush.msra.mxu1 %v4116_v29 }
 0x413   : > { %1696 = vmatpush.msra.mxu1 %v4123_v55 }
 0x415   : > { %1697 = vmatpush.msra.mxu1 %v4130_v25 }
 0x417   : > { %1698 = vmatpush.msra.mxu1 %v4200_v28 }
 0x419   : > { %1699 = vmatpush.msra.mxu1 %v4204_v14 }
 0x41b   : > { %1700 = vmatpush.msra.mxu1 %v4208_v26 }
 0x479   : > { %v1434_v35 = vpop.f32.mrf.mxu1 }
 0x47a   : > { %v1477_v22 = vadd.f32 %v1434_v35, %v4649_v62 }
 0x47c   : > { %v2572_v27 = vmul.f32 -1.442695, %v1477_v22 }
 0x47e   : > { %2756 = vpow2.f32 %v2572_v27 }
 0x47f   : > { %v1454_v49 = vpop.f32.mrf.mxu2 }
 0x480   : > { %v1497_v53 = vadd.f32 %v1454_v49, %v722_v43  ;;  %v1474_v47 = vpop.f32.mrf.mxu3 }
 0x481   : > { %v1517_v15 = vadd.f32 %v4243_v6, %v1474_v47 }
 0x482   : > { %v2573_v0 = vmul.f32 -1.442695, %v1497_v53 }
 0x484   : > { %v2757_v13 = vpop.eup %2756  ;;  %2758 = vpow2.f32 %v2573_v0 }
 0x485   : > { %v1481_v29 = vadd.f32 1.0, %v2757_v13 }
 0x487   : > { %2760 = vrcp.f32 %v1481_v29  ;;  %v1493_v33 = vand.u32 2147483648, %v1481_v29  ;;  %v1491_v42 = vand.u32 2147483647, %v1481_v29  ;;  %vm1487_vm13 = vweird.f32 %v1481_v29 }
 0x489   : > { %v1494_v56 = vor.u32 1.1754944e-38, %v1493_v33  ;;  %vm1492_vm15 = vcmp.eq.f32.partialorder %v1491_v42, 8.507059e+37  ;;  %v4654_v33 = vld [vmem:[#allocation39_spill] sm:$0xff] }
 0x48a   : > { %v2759_v55 = vpop.eup %2758 }
 0x48b   : > { %v1501_v25 = vadd.f32 1.0, %v2759_v55 }
 0x48d   : > { %v2761_v28 = vpop.eup %2760  ;;  %2762 = vrcp.f32 %v1501_v25  ;;  %v1513_v31 = vand.u32 2147483648, %v1501_v25  ;;  %v1511_v48 = vand.u32 2147483647, %v1501_v25  ;;  %vm1507_vm2 = vweird.f32 %v1501_v25 }
 0x48e   : > { %v1483_v14 = vmul.f32 %v2761_v28, %v1481_v29  ;;  %vm1488_vm12 = vweird.f32 %v2761_v28 }
 0x48f   : > { %vm1489_vm14 = vmor %vm1487_vm13, %vm1488_vm12  ;;  %v1514_v8 = vor.u32 1.1754944e-38, %v1513_v31  ;;  %vm1512_vm4 = vcmp.eq.f32.partialorder %v1511_v48, 8.507059e+37 }
 0x490   : > { %v1484_v26 = vsub.f32 1.0, %v1483_v14 }
 0x492   : > { %v1485_v39 = vmul.f32 %v2761_v28, %v1484_v26 }
 0x493   : > { %v2763_v46 = vpop.eup %2762 }
 0x494   : > { %v1503_v51 = vmul.f32 %v2763_v46, %v1501_v25  ;;  %v1486_v52 = vadd.f32 %v2761_v28, %v1485_v39  ;;  %vm1508_vm1 = vweird.f32 %v2763_v46  ;;  %v766_v39 = vadd.f32 %v4654_v33, %v3882_v17 }
 0x495   : > { %vm1509_vm3 = vmor %vm1507_vm2, %vm1508_vm1 }
 0x496   : > { %v1504_v57 = vsub.f32 1.0, %v1503_v51  ;;  %v1490_v2 = vsel %vm1489_vm14, %v2761_v28, %v1486_v52 }
 0x497   : > { %v1495_v60 = vsel %vm1492_vm15, %v1494_v56, %v1490_v2 }
 0x498   : > { %v1505_v59 = vmul.f32 %v2763_v46, %v1504_v57  ;;  %v1518_v41 = vmul.f32 %v1517_v15, %v1495_v60 }
 0x49a   : > { %v1506_v10 = vadd.f32 %v2763_v46, %v1505_v59  ;;  %v1519_v45 = vadd.f32 %v1518_v41, %v763_v37  ;;  %v4655_v59 = vld [vmem:[#allocation54_spill] sm:$0xff] }
 0x49b   : > { %v728_v31 = vadd.f32 %v4655_v59, %v4639_v19  ;;  %v1887_v19 = vld [vmem:[#allocation9 + $0x58] sm:$0xff] }
 0x49c   : > { %v1510_v54 = vsel %vm1509_vm3, %v2763_v46, %v1506_v10  ;;  %2764 = vtanh.f32 %v1519_v45  ;;  %v1891_v45 = vld [vmem:[#allocation9 + $0x78] sm:$0xff] }
 0x49d   : > { %v1515_v3 = vsel %vm1512_vm4, %v1514_v8, %v1510_v54  ;;  %1892 = vmatpush.msra.mxu2 %v1891_v45  ;;  %v4656_v54 = vld [vmem:[#allocation46_spill] sm:$0xff] }
 0x49e   : > { %v1521_v9 = vsub.f32 1.0, %v1515_v3  ;;  %v1523_v40 = vmul.f32 %v1515_v3, %v4219_v32 }
 0x4a2   : > { %v2765_v44 = vpop.eup %2764 }
 0x4a3   : > { %v1522_v16 = vmul.f32 %v2765_v44, %v1521_v9  ;;  %v1890_v9 = vld [vmem:[#allocation9 + $0x70] sm:$0xff] }
 0x4a4   : > { %1893 = vmatpush.msra.mxu2 %v1890_v9  ;;  %v4661_v9 = vld [vmem:[#allocation47_spill] sm:$0xff] }
 0x4a5   : > { %v4249_v34 = vadd.f32 %v1523_v40, %v1522_v16  ;;  %v1889_v16 = vld [vmem:[#allocation9 + $0x68] sm:$0xff] }
 0x4a6   : > { %1894 = vmatpush.msra.mxu2 %v1889_v16 }
 0x4a7   : > { %1547 = vmatmul.f32.vlgmr.msrb.gmra.mxu0 %v4249_v34  ;;  %1567 = vmatmul.f32.vlgmr.msrb.gmra.mxu1 %v4249_v34 }
 0x4a8   : > { %1587 = vmatmul.f32.vlgmr.msrb.gmra.mxu2 %v4249_v34 }
 0x4a9   : > { %1895 = vmatpush.msra.mxu2 %v1888_v1 }
 0x4ab   : > { %1896 = vmatpush.msra.mxu2 %v1887_v19 }
 0x524   : > { %v1548_v30 = vpop.f32.mrf.mxu0  ;;  %v1568_v61 = vpop.f32.mrf.mxu1 }
 0x525   : > { %v1591_v36 = vadd.f32 %v1548_v30, %v4653_v4  ;;  %v1611_v63 = vadd.f32 %v1568_v61, %v725_v58  ;;  %v1886_v30 = vld [vmem:[#allocation9 + $0x50] sm:$0xff]  ;;  %v1885_v61 = vld [vmem:[#allocation9 + $0x48] sm:$0xff] }
 0x526   : > { %1897 = vmatpush.msra.mxu2 %v1886_v30 }
 0x527   : > { %v2574_v11 = vmul.f32 -1.442695, %v1591_v36  ;;  %v2575_v12 = vmul.f32 -1.442695, %v1611_v63  ;;  %v1884_v36 = vld [vmem:[#allocation9 + $0x40] sm:$0xff] }
 0x528   : > { %1898 = vmatpush.msra.mxu2 %v1885_v61 }
 0x529   : > { %2766 = vpow2.f32 %v2574_v11  ;;  %v1883_v11 = vld [vmem:[#allocation9 + $0x38] sm:$0xff] }
 0x52a   : > { %2768 = vpow2.f32 %v2575_v12  ;;  %1899 = vmatpush.msra.mxu2 %v1884_v36 }
 0x52b   : > { %v1588_v13 = vpop.f32.mrf.mxu2 }
 0x52c   : > { %v1631_v28 = vadd.f32 %v4243_v6, %v1588_v13  ;;  %1900 = vmatpush.msra.mxu2 %v1883_v11 }
 0x52f   : > { %v2767_v50 = vpop.eup %2766 }
 0x530   : > { %v2769_v7 = vpop.eup %2768  ;;  %v1595_v21 = vadd.f32 1.0, %v2767_v50  ;;  %v1882_v50 = vld [vmem:[#allocation9 + $0x30] sm:$0xff] }
 0x531   : > { %v1615_v5 = vadd.f32 1.0, %v2769_v7  ;;  %v1881_v7 = vld [vmem:[#allocation9 + $0x28] sm:$0xff]  ;;  %1901 = vmatpush.msra.mxu2 %v1882_v50 }
 0x532   : > { %2770 = vrcp.f32 %v1595_v21  ;;  %v1607_v43 = vand.u32 2147483648, %v1595_v21  ;;  %v1605_v53 = vand.u32 2147483647, %v1595_v21  ;;  %vm1601_vm6 = vweird.f32 %v1595_v21 }
 0x533   : > { %2772 = vrcp.f32 %v1615_v5  ;;  %v1627_v42 = vand.u32 2147483648, %v1615_v5  ;;  %vm1621_vm10 = vweird.f32 %v1615_v5  ;;  %v1625_v47 = vand.u32 2147483647, %v1615_v5  ;;  %1902 = vmatpush.msra.mxu2 %v1881_v7 }
 0x534   : > { %v1608_v55 = vor.u32 1.1754944e-38, %v1607_v43  ;;  %vm1606_vm8 = vcmp.eq.f32.partialorder %v1605_v53, 8.507059e+37 }
 0x535   : > { %v1628_v56 = vor.u32 1.1754944e-38, %v1627_v42  ;;  %vm1626_vm12 = vcmp.eq.f32.partialorder %v1625_v47, 8.507059e+37  ;;  %v4657_v42 = vld [vmem:[#allocation41_spill] sm:$0xff] }
 0x538   : > { %v2771_v24 = vpop.eup %2770 }
 0x539   : > { %v2773_v35 = vpop.eup %2772  ;;  %v1597_v62 = vmul.f32 %v2771_v24, %v1595_v21  ;;  %vm1602_vm5 = vweird.f32 %v2771_v24 }
 0x53a   : > { %v1617_v22 = vmul.f32 %v2773_v35, %v1615_v5  ;;  %vm1603_vm7 = vmor %vm1601_vm6, %vm1602_vm5  ;;  %vm1622_vm9 = vweird.f32 %v2773_v35  ;;  %v1880_v5 = vld [vmem:[#allocation9 + $0x20] sm:$0xff] }
 0x53b   : > { %v1598_v27 = vsub.f32 1.0, %v1597_v62  ;;  %vm1623_vm11 = vmor %vm1621_vm10, %vm1622_vm9  ;;  %v1879_v62 = vld [vmem:[#allocation9 + $0x18] sm:$0xff]  ;;  %1903 = vmatpush.msra.mxu2 %v1880_v5 }
 0x53c   : > { %v1618_v38 = vsub.f32 1.0, %v1617_v22 }
 0x53d   : > { %v1599_v49 = vmul.f32 %v2771_v24, %v1598_v27  ;;  %1904 = vmatpush.msra.mxu2 %v1879_v62 }
 0x53e   : > { %v1619_v0 = vmul.f32 %v2773_v35, %v1618_v38  ;;  %v1878_v38 = vld [vmem:[#allocation9 + $0x10] sm:$0xff] }
 0x53f   : > { %v1600_v29 = vadd.f32 %v2771_v24, %v1599_v49  ;;  %1905 = vmatpush.msra.mxu2 %v1878_v38 }
 0x540   : > { %v1620_v14 = vadd.f32 %v2773_v35, %v1619_v0  ;;  %v1877_v0 = vld [vmem:[#allocation9 + $0x8] sm:$0xff] }
 0x541   : > { %v1604_v25 = vsel %vm1603_vm7, %v2771_v24, %v1600_v29  ;;  %1906 = vmatpush.msra.mxu2 %v1877_v0 }
 0x542   : > { %v1609_v26 = vsel %vm1606_vm8, %v1608_v55, %v1604_v25  ;;  %v1624_v52 = vsel %vm1623_vm11, %v2773_v35, %v1620_v14  ;;  %v1876_v25 = vld [vmem:[#allocation9] sm:$0xff] }
 0x543   : > { %v1632_v46 = vmul.f32 %v1631_v28, %v1609_v26  ;;  %v1629_v57 = vsel %vm1626_vm12, %v1628_v56, %v1624_v52  ;;  %1907 = vmatpush.msra.mxu2 %v1876_v25 }
 0x544   : > { %v1635_v2 = vsub.f32 1.0, %v1629_v57  ;;  %v1637_v37 = vmul.f32 %v1629_v57, %v4249_v34 }
 0x545   : > { %v1633_v51 = vadd.f32 %v1632_v46, %v766_v39  ;;  %v769_v46 = vadd.f32 %v4657_v42, %v3882_v17  ;;  %v4658_v17 = vld [vmem:[#allocation36_spill] sm:$0xff] }
 0x547   : > { %2774 = vtanh.f32 %v1633_v51 }
 0x54d   : > { %v2775_v15 = vpop.eup %2774 }
 0x54e   : > { %v1636_v23 = vmul.f32 %v2775_v15, %v1635_v2  ;;  %v1776_v15 = vrot.slane %v4159_v18, 4 }
 0x550   : > { %v4261_v60 = vadd.f32 %v1637_v37, %v1636_v23 }
 0x552   : > { %1661 = vmatmul.f32.vlgmr.msrb.gmra.mxu3 %v4261_v60  ;;  %1681 = vmatmul.f32.vlgmr.msra.gmra.mxu0 %v4261_v60  ;;  %v1788_v45 = vrot.slane %v4261_v60, 4 }
 0x553   : > { %1701 = vmatmul.f32.vlgmr.msra.gmra.mxu1 %v4261_v60 }
 0x554   : > { %v1789_v16 = vsel %vm480_vm0, %v1788_v45, %v4219_v32 }
 0x5cf   : > { %v1682_v41 = vpop.f32.mrf.mxu0 }
 0x5d0   : > { %v1725_v48 = vadd.f32 %v1682_v41, %v728_v31  ;;  %v1702_v29 = vpop.f32.mrf.mxu1  ;;  %v1777_v41 = vsel %vm480_vm0, %v1776_v15, %v4658_v17  ;;  %v1968_v15 = vld [vmem:[#allocation10 + $0xd8] sm:$0xff] }
 0x5d1   : > { %v1745_v14 = vadd.f32 %v4243_v6, %v1702_v29  ;;  %v1790_v29 = vrot.slane %v4219_v32, 4 }
 0x5d2   : > { %v2577_v10 = vmul.f32 -1.442695, %v1725_v48 }
 0x5d3   : > { %v1791_v25 = vsel %vm480_vm0, %v4261_v60, %v1790_v29 }
 0x5d4   : > { %2776 = vpow2.f32 %v2577_v10  ;;  %v1764_v10 = vrot.slane %v4023_v20, 4 }
 0x5d5   : > { %v1662_v8 = vpop.f32.mrf.mxu3 }
 0x5d6   : > { %v1705_v3 = vadd.f32 %v1662_v8, %v4656_v54  ;;  %v4659_v8 = vld [vmem:[#allocation24_spill] sm:$0xff] }
 0x5d7   : > { %v1783_v54 = vperm.slane %v1777_v41, %v4659_v8  ;;  %v1795_v30 = vperm.slane %v1789_v16, %v4659_v8 }
 0x5d8   : > { %v2576_v44 = vmul.f32 -1.442695, %v1705_v3 }
 0x5da   : > { %v2777_v40 = vpop.eup %2776  ;;  %2778 = vpow2.f32 %v2576_v44  ;;  %v1765_v44 = vsel %vm480_vm0, %v1764_v10, %v4661_v9  ;;  %v1962_v10 = vld [vmem:[#allocation10 + $0xa8] sm:$0xff] }
 0x5db   : > { %v1729_v58 = vadd.f32 1.0, %v2777_v40  ;;  %v1771_v19 = vperm.slane %v1765_v44, %v4659_v8  ;;  %v1958_v44 = vld [vmem:[#allocation10 + $0x88] sm:$0xff] }
 0x5dd   : > { %2780 = vrcp.f32 %v1729_v58  ;;  %v1741_v47 = vand.u32 2147483648, %v1729_v58  ;;  %vm1735_vm3 = vweird.f32 %v1729_v58  ;;  %v1739_v52 = vand.u32 2147483647, %v1729_v58 }
 0x5df   : > { %v1742_v2 = vor.u32 1.1754944e-38, %v1741_v47  ;;  %vm1740_vm5 = vcmp.eq.f32.partialorder %v1739_v52, 8.507059e+37  ;;  %v1972_v52 = vld [vmem:[#allocation10 + $0xf8] sm:$0xff] }
 0x5e0   : > { %v2779_v4 = vpop.eup %2778  ;;  %2019 = vmatpush.msrb.mxu0 %v1972_v52  ;;  %v2091_v52 = vld [vmem:[#allocation12 + $0x78] sm:$0xff] }
 0x5e1   : > { %v1709_v63 = vadd.f32 1.0, %v2779_v4  ;;  %2108 = vmatpush.msrb.mxu1 %v2091_v52 }
 0x5e3   : > { %2782 = vrcp.f32 %v1709_v63  ;;  %v2781_v12 = vpop.eup %2780  ;;  %v1721_v43 = vand.u32 2147483648, %v1709_v63  ;;  %v1719_v53 = vand.u32 2147483647, %v1709_v63  ;;  %vm1715_vm14 = vweird.f32 %v1709_v63 }
 0x5e4   : > { %v1731_v21 = vmul.f32 %v2781_v12, %v1729_v58  ;;  %vm1736_vm2 = vweird.f32 %v2781_v12  ;;  %v1812_v58 = vrot.slane %v1783_v54, 4 }
 0x5e5   : > { %v1722_v28 = vor.u32 1.1754944e-38, %v1721_v43  ;;  %vm1720_vm1 = vcmp.eq.f32.partialorder %v1719_v53, 8.507059e+37  ;;  %vm1737_vm4 = vmor %vm1735_vm3, %vm1736_vm2 }
 0x5e6   : > { %v1732_v22 = vsub.f32 1.0, %v1731_v21  ;;  %v1813_v4 = vsel %vm480_vm0, %v1812_v58, %v1771_v19  ;;  %v1838_v21 = vrot.slane %v1795_v30, 4 }
 0x5e8   : > { %v1733_v13 = vmul.f32 %v2781_v12, %v1732_v22  ;;  %v1802_v22 = vrot.slane %v4249_v34, 4 }
 0x5e9   : > { %v2783_v24 = vpop.eup %2782 }
 0x5ea   : > { %v1711_v35 = vmul.f32 %v2783_v24, %v1709_v63  ;;  %vm1716_vm13 = vweird.f32 %v2783_v24  ;;  %v1734_v33 = vadd.f32 %v2781_v12, %v1733_v13  ;;  %v4662_v63 = vld [vmem:[#allocation25_spill] sm:$0xff]  ;;  %v1778_v13 = vrot.slane %v4658_v17, 4  ;;  %v1964_v17 = vld [vmem:[#allocation10 + $0xb8] sm:$0xff] }
 0x5eb   : > { %vm1717_vm15 = vmor %vm1715_vm14, %vm1716_vm13 }
 0x5ec   : > { %v1712_v27 = vsub.f32 1.0, %v1711_v35  ;;  %v1738_v57 = vsel %vm1737_vm4, %v2781_v12, %v1734_v33  ;;  %v1819_v12 = vperm.slane %v1813_v4, %v4662_v63  ;;  %v1766_v33 = vrot.slane %v4661_v9, 4  ;;  %v1957_v9 = vld [vmem:[#allocation10 + $0x80] sm:$0xff]  ;;  %v1954_v4 = vld [vmem:[#allocation10 + $0x68] sm:$0xff] }
 0x5ed   : > { %v1743_v6 = vsel %vm1740_vm5, %v1742_v2, %v1738_v57  ;;  %v1970_v57 = vld [vmem:[#allocation10 + $0xe8] sm:$0xff] }
 0x5ee   : > { %v1713_v49 = vmul.f32 %v2783_v24, %v1712_v27  ;;  %v1749_v23 = vsub.f32 1.0, %v1743_v6  ;;  %v1751_v59 = vmul.f32 %v1743_v6, %v4261_v60  ;;  %v1814_v27 = vrot.slane %v1771_v19, 4  ;;  %v1967_v6 = vld [vmem:[#allocation10 + $0xd0] sm:$0xff]  ;;  %2020 = vmatpush.msrb.mxu0 %v1970_v57 }
 0x5ef   : > { %v1767_v32 = vsel %vm480_vm0, %v4023_v20, %v1766_v33  ;;  %v1965_v20 = vld [vmem:[#allocation10 + $0xc0] sm:$0xff] }
 0x5f0   : > { %v1714_v55 = vadd.f32 %v2783_v24, %v1713_v49  ;;  %v1815_v43 = vsel %vm480_vm0, %v1783_v54, %v1814_v27  ;;  %v1775_v60 = vperm.slane %v1767_v32, %v4659_v8  ;;  %2021 = vmatpush.msrb.mxu0 %v1968_v15  ;;  %v1960_v54 = vld [vmem:[#allocation10 + $0x98] sm:$0xff] }
 0x5f1   : > { %v1823_v0 = vperm.slane %v1815_v43, %v4662_v63  ;;  %v1946_v43 = vld [vmem:[#allocation10 + $0x28] sm:$0xff]  ;;  %v2103_v15 = vld [vmem:[#allocation12 + $0xd8] sm:$0xff] }
 0x5f2   : > { %v1718_v26 = vsel %vm1717_vm15, %v2783_v24, %v1714_v55  ;;  %v1862_v24 = vrot.slane %v1819_v12, 4 }
 0x5f3   : > { %v1723_v39 = vsel %vm1720_vm1, %v1722_v28, %v1718_v26  ;;  %v1799_v26 = vperm.slane %v1791_v25, %v4659_v8  ;;  %v1866_v42 = vrot.slane %v1823_v0, 4 }
 0x5f4   : > { %v1746_v51 = vmul.f32 %v1745_v14, %v1723_v39 }
 0x5f5   : > { %v1850_v45 = vrot.slane %v1799_v26, 4 }
 0x5f6   : > { %v1747_v56 = vadd.f32 %v1746_v51, %v769_v46  ;;  %v1971_v51 = vld [vmem:[#allocation10 + $0xf0] sm:$0xff] }
 0x5f7   : > { %1978 = vmatpush.msra.mxu3 %v1971_v51 }
 0x5f8   : > { %2784 = vtanh.f32 %v1747_v56  ;;  %v1969_v56 = vld [vmem:[#allocation10 + $0xe0] sm:$0xff] }
 0x5f9   : > { %1979 = vmatpush.msra.mxu3 %v1969_v56  ;;  %v2090_v56 = vld [vmem:[#allocation12 + $0x70] sm:$0xff] }
 0x5fa   : > { %2109 = vmatpush.msrb.mxu1 %v2090_v56 }
 0x5fb   : > { %1980 = vmatpush.msra.mxu3 %v1967_v6 }
 0x5fd   : > { %1981 = vmatpush.msra.mxu3 %v1965_v20  ;;  %v2102_v20 = vld [vmem:[#allocation12 + $0xd0] sm:$0xff] }
 0x5fe   : > { %v2785_v37 = vpop.eup %2784 }
 0x5ff   : > { %v1750_v31 = vmul.f32 %v2785_v37, %v1749_v23  ;;  %v1966_v37 = vld [vmem:[#allocation10 + $0xc8] sm:$0xff] }
 0x600   : > { %2022 = vmatpush.msrb.mxu0 %v1966_v37  ;;  %v2088_v37 = vld [vmem:[#allocation12 + $0x60] sm:$0xff] }
 0x601   : > { %v1752_v48 = vadd.f32 %v1751_v59, %v1750_v31  ;;  %v1963_v31 = vld [vmem:[#allocation10 + $0xb0] sm:$0xff] }
 0x602   : > { %1982 = vmatpush.msra.mxu3 %v1963_v31  ;;  %2023 = vmatpush.msrb.mxu0 %v1964_v17  ;;  %v2087_v31 = vld [vmem:[#allocation12 + $0x58] sm:$0xff] }
 0x603   : > { %v1800_v3 = vrot.slane %v1752_v48, 4  ;;  %1755 = vst [vmem:[%s4281_s21] sm:$0xff] %v1752_v48  ;;  %v1803_v38 = vsel %vm480_vm0, %v1752_v48, %v1802_v22  ;;  %v1961_v48 = vld [vmem:[#allocation10 + $0xa0] sm:$0xff] }
 0x604   : > { %v1811_v53 = vperm.slane %v1803_v38, %v4659_v8  ;;  %1983 = vmatpush.msra.mxu3 %v1961_v48  ;;  %2024 = vmatpush.msrb.mxu0 %v1962_v10  ;;  %v1945_v38 = vld [vmem:[#allocation10 + $0x20] sm:$0xff]  ;;  %v2086_v10 = vld [vmem:[#allocation12 + $0x50] sm:$0xff] }
 0x605   : > { %v1801_v40 = vsel %vm480_vm0, %v1800_v3, %v4249_v34  ;;  %v1779_v34 = vsel %vm480_vm0, %v4159_v18, %v1778_v13  ;;  %v4332_v13 = vld [vmem:[#allocation13 + $0x2] ss:$0 sm:$0xff] }
 0x606   : > { %v1807_v1 = vperm.slane %v1801_v40, %v4659_v8  ;;  %v1848_v28 = vrot.slane %v1811_v53, 4  ;;  %v1787_v14 = vperm.slane %v1779_v34, %v4659_v8  ;;  %v1959_v8 = vld [vmem:[#allocation10 + $0x90] sm:$0xff]  ;;  %v1851_v3 = vsel %vm480_vm0, %v1811_v53, %v1850_v45  ;;  %2025 = vmatpush.msrb.mxu0 %v1960_v54  ;;  %v1941_v53 = vld [vmem:[#allocation10] sm:$0xff]  ;;  %v2085_v54 = vld [vmem:[#allocation12 + $0x48] sm:$0xff] }
 0x607   : > { %1984 = vmatpush.msra.mxu3 %v1959_v8  ;;  %v1955_v40 = vld [vmem:[#allocation10 + $0x70] sm:$0xff]  ;;  %v1859_v19 = vperm.slane %v1851_v3, %v4662_v63  ;;  %v2100_v48 = vld [vmem:[#allocation12 + $0xc0] sm:$0xff]  ;;  %v2099_v8 = vld [vmem:[#allocation12 + $0xb8] sm:$0xff] }
 0x608   : > { %v1836_v61 = vrot.slane %v1807_v1, 4  ;;  %v1839_v5 = vsel %vm480_vm0, %v1807_v1, %v1838_v21  ;;  %v1849_v39 = vsel %vm480_vm0, %v1848_v28, %v1799_v26  ;;  %v1824_v46 = vrot.slane %v1787_v14, 4  ;;  %v1956_v1 = vld [vmem:[#allocation10 + $0x78] sm:$0xff]  ;;  %2026 = vmatpush.msrb.mxu0 %v1958_v44  ;;  %v1950_v21 = vld [vmem:[#allocation10 + $0x48] sm:$0xff]  ;;  %v2098_v3 = vld [vmem:[#allocation12 + $0xb0] sm:$0xff] }
 0x609   : > { %v1847_v62 = vperm.slane %v1839_v5, %v4662_v63  ;;  %v1855_v47 = vperm.slane %v1849_v39, %v4662_v63  ;;  %1985 = vmatpush.msra.mxu3 %v1957_v9  ;;  %v2084_v9 = vld [vmem:[#allocation12 + $0x40] sm:$0xff]  ;;  %v2097_v44 = vld [vmem:[#allocation12 + $0xa8] sm:$0xff] }
 0x60a   : > { %v1837_v36 = vsel %vm480_vm0, %v1836_v61, %v1795_v30  ;;  %v1825_v2 = vsel %vm480_vm0, %v1824_v46, %v1775_v60  ;;  %v1826_v30 = vrot.slane %v1775_v60, 4  ;;  %v1953_v61 = vld [vmem:[#allocation10 + $0x60] sm:$0xff]  ;;  %2027 = vmatpush.msrb.mxu0 %v1956_v1  ;;  %v2105_v60 = vld [vmem:[#allocation12 + $0xe8] sm:$0xff] }
 0x60b   : > { %v1843_v11 = vperm.slane %v1837_v36, %v4662_v63  ;;  %v1864_v49 = vrot.slane %v1847_v62, 4  ;;  %v1867_v18 = vsel %vm480_vm0, %v1847_v62, %v1866_v42  ;;  %v1868_v23 = vrot.slane %v1855_v47, 4  ;;  %1986 = vmatpush.msra.mxu3 %v1955_v40 }
 0x60c   : > { %v1831_v59 = vperm.slane %v1825_v2, %v4662_v63  ;;  %v1827_v36 = vsel %vm480_vm0, %v1787_v14, %v1826_v30  ;;  %2028 = vmatpush.msrb.mxu0 %v1954_v4  ;;  %v2104_v2 = vld [vmem:[#allocation12 + $0xe0] sm:$0xff]  ;;  %v2094_v4 = vld [vmem:[#allocation12 + $0x90] sm:$0xff] }
 0x60d   : > { %v1860_v50 = vrot.slane %v1843_v11, 4  ;;  %v1863_v35 = vsel %vm480_vm0, %v1843_v11, %v1862_v24  ;;  %v1865_v55 = vsel %vm480_vm0, %v1864_v49, %v1823_v0  ;;  %v1951_v11 = vld [vmem:[#allocation10 + $0x50] sm:$0xff]  ;;  %1987 = vmatpush.msra.mxu3 %v1953_v61  ;;  %v1835_v5 = vperm.slane %v1827_v36, %v4662_v63  ;;  %v1944_v63 = vld [vmem:[#allocation10 + $0x18] sm:$0xff]  ;;  %v1942_v0 = vld [vmem:[#allocation10 + $0x8] sm:$0xff] }
 0x60e   : > { %v1869_v41 = vsel %vm480_vm0, %v1868_v23, %v1831_v59  ;;  %v1870_v16 = vrot.slane %v1831_v59, 4  ;;  %v1947_v24 = vld [vmem:[#allocation10 + $0x30] sm:$0xff]  ;;  %v2089_v23 = vld [vmem:[#allocation12 + $0x68] sm:$0xff]  ;;  %v2095_v61 = vld [vmem:[#allocation12 + $0x98] sm:$0xff] }
 0x60f   : > { %v1861_v7 = vsel %vm480_vm0, %v1860_v50, %v1819_v12  ;;  %v1952_v12 = vld [vmem:[#allocation10 + $0x58] sm:$0xff]  ;;  %v1872_v50 = vrot.slane %v1859_v19, 4  ;;  %1988 = vmatpush.msra.mxu3 %v1951_v11  ;;  %v1874_v22 = vrot.slane %v1835_v5, 4  ;;  %v1943_v49 = vld [vmem:[#allocation10 + $0x10] sm:$0xff]  ;;  %2110 = vmatpush.msrb.mxu1 %v2089_v23  ;;  %v2101_v59 = vld [vmem:[#allocation12 + $0xc8] sm:$0xff] }
 0x610   : > { %1908 = vmatmul.f32.vlgmr.msra.gmra.mxu2 %v1861_v7  ;;  %v1871_v58 = vsel %vm480_vm0, %v1855_v47, %v1870_v16  ;;  %v1949_v7 = vld [vmem:[#allocation10 + $0x40] sm:$0xff]  ;;  %2029 = vmatpush.msrb.mxu0 %v1952_v12  ;;  %v2106_v47 = vld [vmem:[#allocation12 + $0xf0] sm:$0xff]  ;;  %v2083_v16 = vld [vmem:[#allocation12 + $0x38] sm:$0xff] }
 0x611   : > { %v1873_v62 = vsel %vm480_vm0, %v1872_v50, %v1835_v5  ;;  %1989 = vmatpush.msra.mxu3 %v1949_v7  ;;  %v1875_v27 = vsel %vm480_vm0, %v1859_v19, %v1874_v22  ;;  %2111 = vmatpush.msrb.mxu1 %v2088_v37  ;;  %v2082_v19 = vld [vmem:[#allocation12 + $0x30] sm:$0xff]  ;;  %v2093_v36 = vld [vmem:[#allocation12 + $0x88] sm:$0xff]  ;;  %v2092_v5 = vld [vmem:[#allocation12 + $0x80] sm:$0xff] }
 0x612   : > { %2030 = vmatpush.msrb.mxu0 %v1950_v21  ;;  %v2081_v7 = vld [vmem:[#allocation12 + $0x28] sm:$0xff]  ;;  %v2080_v21 = vld [vmem:[#allocation12 + $0x20] sm:$0xff] }
 0x613   : > { %1990 = vmatpush.msra.mxu3 %v1947_v24  ;;  %2112 = vmatpush.msrb.mxu1 %v2087_v31  ;;  %v2079_v24 = vld [vmem:[#allocation12 + $0x18] sm:$0xff]  ;;  %v2076_v22 = vld [vmem:[#allocation12] sm:$0xff] }
 0x615   : > { %1991 = vmatpush.msra.mxu3 %v1945_v38  ;;  %2113 = vmatpush.msrb.mxu1 %v2086_v10 }
 0x617   : > { %1992 = vmatpush.msra.mxu3 %v1943_v49  ;;  %2114 = vmatpush.msrb.mxu1 %v2085_v54 }
 0x618   : > { %1911 = vmatmul.f32.gmra.mxu2 %v1863_v35  ;;  %v1948_v35 = vld [vmem:[#allocation10 + $0x38] sm:$0xff] }
 0x619   : > { %2031 = vmatpush.msrb.mxu0 %v1948_v35  ;;  %1993 = vmatpush.msra.mxu3 %v1941_v53  ;;  %v2078_v35 = vld [vmem:[#allocation12 + $0x10] sm:$0xff] }
 0x61a   : > { %2115 = vmatpush.msrb.mxu1 %v2084_v9 }
 0x61b   : > { %2032 = vmatpush.msrb.mxu0 %v1946_v43 }
 0x61c   : > { %2116 = vmatpush.msrb.mxu1 %v2083_v16 }
 0x61d   : > { %2033 = vmatpush.msrb.mxu0 %v1944_v63 }
 0x61e   : > { %2117 = vmatpush.msrb.mxu1 %v2082_v19 }
 0x61f   : > { %2034 = vmatpush.msrb.mxu0 %v1942_v0 }
 0x620   : > { %1914 = vmatmul.f32.gmra.mxu2 %v1865_v55  ;;  %2118 = vmatpush.msrb.mxu1 %v2081_v7 }
 0x622   : > { %2119 = vmatpush.msrb.mxu1 %v2080_v21 }
 0x624   : > { %2120 = vmatpush.msrb.mxu1 %v2079_v24 }
 0x626   : > { %2121 = vmatpush.msrb.mxu1 %v2078_v35 }
 0x628   : > { %1917 = vmatmul.f32.gmra.mxu2 %v1867_v18  ;;  %v2107_v18 = vld [vmem:[#allocation12 + $0xf8] sm:$0xff] }
 0x629   : > { %2149 = vmatpush.msrb.mxu2 %v2107_v18 }
 0x62b   : > { %2150 = vmatpush.msrb.mxu2 %v2106_v47 }
 0x62d   : > { %2151 = vmatpush.msrb.mxu2 %v2105_v60 }
 0x62f   : > { %2152 = vmatpush.msrb.mxu2 %v2104_v2 }
 0x630   : > { %1920 = vmatmul.f32.gmra.mxu2 %v1869_v41 }
 0x631   : > { %2153 = vmatpush.msrb.mxu2 %v2103_v15 }
 0x633   : > { %2154 = vmatpush.msrb.mxu2 %v2102_v20 }
 0x635   : > { %2155 = vmatpush.msrb.mxu2 %v2101_v59 }
 0x637   : > { %2156 = vmatpush.msrb.mxu2 %v2100_v48 }
 0x638   : > { %1923 = vmatmul.f32.gmra.mxu2 %v1871_v58  ;;  %v2096_v58 = vld [vmem:[#allocation12 + $0xa0] sm:$0xff] }
 0x639   : > { %2157 = vmatpush.msrb.mxu2 %v2099_v8 }
 0x63b   : > { %2158 = vmatpush.msrb.mxu2 %v2098_v3 }
 0x63d   : > { %2159 = vmatpush.msrb.mxu2 %v2097_v44 }
 0x63f   : > { %2160 = vmatpush.msrb.mxu2 %v2096_v58 }
 0x640   : > { %1926 = vmatmul.f32.gmra.mxu2 %v1873_v62  ;;  %v2077_v62 = vld [vmem:[#allocation12 + $0x8] sm:$0xff] }
 0x641   : > { %2161 = vmatpush.msrb.mxu2 %v2095_v61  ;;  %2122 = vmatpush.msrb.mxu1 %v2077_v62  ;;  %v2190_v61 = vlaneseq }
 0x643   : > { %2162 = vmatpush.msrb.mxu2 %v2094_v4  ;;  %2123 = vmatpush.msrb.mxu1 %v2076_v22  ;;  %v470_v4 = vld [vmem:[#allocation13 + $0x4] ss:$0 sm:$0xff] }
 0x645   : > { %2163 = vmatpush.msrb.mxu2 %v2093_v36  ;;  %v4342_v36 = vand.u32 127, %v2190_v61 }
 0x647   : > { %2164 = vmatpush.msrb.mxu2 %v2092_v5  ;;  %vm2192_vm0 = vcmp.lt.s32.totalorder %v4342_v36, 5 }
 0x648   : > { %1929 = vmatmul.f32.gmra.mxu2 %v1875_v27  ;;  %v469_v27 = vld [vmem:[#allocation13 + $0x3] ss:$8 sm:$0x3] }
 0x649   : > { %v1975_v38 = vperm.slane %v469_v27, 1  ;;  %v1974_v53 = vperm.slane %v469_v27, 0 }
 0x693   : > { %v1909_v29 = vpop.f32.mrf.mxu2 }
 0x694   : > { %v1910_v55 = vadd.f32 %v1909_v29, %v4332_v13 }
 0x696   : > { %v1933_v34 = vmax.f32 %v1910_v55, 0.0 }
 0x698   : > { %1994 = vmatmul.f32.vlgmr.msra.gmra.mxu3 %v1933_v34  ;;  %2035 = vmatmul.f32.vlgmr.msrb.gmra.mxu0 %v1933_v34 }
 0x69b   : > { %v1912_v25 = vpop.f32.mrf.mxu2 }
 0x69c   : > { %v1913_v28 = vadd.f32 %v1912_v25, %v4332_v13 }
 0x69e   : > { %v1934_v14 = vmax.f32 %v1913_v28, 0.0 }
 0x6a0   : > { %1997 = vmatmul.f32.gmra.mxu3 %v1934_v14  ;;  %2038 = vmatmul.f32.gmra.mxu0 %v1934_v14 }
 0x6a3   : > { %v1915_v26 = vpop.f32.mrf.mxu2 }
 0x6a4   : > { %v1916_v33 = vadd.f32 %v1915_v26, %v4332_v13 }
 0x6a6   : > { %v1935_v39 = vmax.f32 %v1916_v33, 0.0 }
 0x6a8   : > { %2000 = vmatmul.f32.gmra.mxu3 %v1935_v39  ;;  %2041 = vmatmul.f32.gmra.mxu0 %v1935_v39 }
 0x6ab   : > { %v1918_v42 = vpop.f32.mrf.mxu2 }
 0x6ac   : > { %v1919_v32 = vadd.f32 %v1918_v42, %v4332_v13 }
 0x6ae   : > { %v1936_v46 = vmax.f32 %v1919_v32, 0.0 }
 0x6b0   : > { %2003 = vmatmul.f32.gmra.mxu3 %v1936_v46  ;;  %2044 = vmatmul.f32.gmra.mxu0 %v1936_v46 }
 0x6b3   : > { %v1921_v51 = vpop.f32.mrf.mxu2 }
 0x6b4   : > { %v1922_v57 = vadd.f32 %v1921_v51, %v4332_v13 }
 0x6b6   : > { %v1937_v6 = vmax.f32 %v1922_v57, 0.0 }
 0x6b8   : > { %2006 = vmatmul.f32.gmra.mxu3 %v1937_v6  ;;  %2047 = vmatmul.f32.gmra.mxu0 %v1937_v6 }
 0x6bb   : > { %v1924_v17 = vpop.f32.mrf.mxu2 }
 0x6bc   : > { %v1925_v41 = vadd.f32 %v1924_v17, %v4332_v13 }
 0x6be   : > { %v1938_v45 = vmax.f32 %v1925_v41, 0.0 }
 0x6c0   : > { %2009 = vmatmul.f32.gmra.mxu3 %v1938_v45  ;;  %2050 = vmatmul.f32.gmra.mxu0 %v1938_v45 }
 0x6c3   : > { %v1927_v40 = vpop.f32.mrf.mxu2 }
 0x6c4   : > { %v1928_v1 = vadd.f32 %v1927_v40, %v4332_v13 }
 0x6c6   : > { %v1939_v30 = vmax.f32 %v1928_v1, 0.0 }
 0x6c8   : > { %2012 = vmatmul.f32.gmra.mxu3 %v1939_v30  ;;  %2053 = vmatmul.f32.gmra.mxu0 %v1939_v30 }
 0x6cb   : > { %v1930_v11 = vpop.f32.mrf.mxu2 }
 0x6cc   : > { %v1931_v12 = vadd.f32 %v1930_v11, %v4332_v13 }
 0x6ce   : > { %v1940_v50 = vmax.f32 %v1931_v12, 0.0 }
 0x6d0   : > { %2015 = vmatmul.f32.gmra.mxu3 %v1940_v50  ;;  %2056 = vmatmul.f32.gmra.mxu0 %v1940_v50 }
 0x715   : > { %v2036_v43 = vpop.f32.mrf.mxu0 }
 0x716   : > { %v2037_v49 = vadd.f32 %v2036_v43, %v1975_v38 }
 0x718   : > { %v2061_v63 = vmax.f32 %v2037_v49, 0.0 }
 0x71a   : > { %2165 = vmatmul.f32.vlgmr.msrb.gmra.mxu2 %v2061_v63 }
 0x71b   : > { %v1995_v0 = vpop.f32.mrf.mxu3 }
 0x71c   : > { %v1996_v13 = vadd.f32 %v1995_v0, %v1974_v53 }
 0x71d   : > { %v2039_v29 = vpop.f32.mrf.mxu0 }
 0x71e   : > { %v2060_v55 = vmax.f32 %v1996_v13, 0.0  ;;  %v2040_v34 = vadd.f32 %v2039_v29, %v1975_v38 }
 0x720   : > { %v2063_v25 = vmax.f32 %v2040_v34, 0.0  ;;  %2124 = vmatmul.f32.vlgmr.msrb.gmra.mxu1 %v2060_v55 }
 0x722   : > { %2168 = vmatmul.f32.gmra.mxu2 %v2063_v25 }
 0x723   : > { %v1998_v28 = vpop.f32.mrf.mxu3 }
 0x724   : > { %v1999_v14 = vadd.f32 %v1998_v28, %v1974_v53 }
 0x725   : > { %v2042_v26 = vpop.f32.mrf.mxu0 }
 0x726   : > { %v2062_v33 = vmax.f32 %v1999_v14, 0.0  ;;  %v2043_v39 = vadd.f32 %v2042_v26, %v1975_v38 }
 0x728   : > { %v2065_v42 = vmax.f32 %v2043_v39, 0.0  ;;  %2127 = vmatmul.f32.gmra.mxu1 %v2062_v33 }
 0x72a   : > { %2171 = vmatmul.f32.gmra.mxu2 %v2065_v42 }
 0x72b   : > { %v2001_v32 = vpop.f32.mrf.mxu3 }
 0x72c   : > { %v2002_v46 = vadd.f32 %v2001_v32, %v1974_v53 }
 0x72d   : > { %v2045_v18 = vpop.f32.mrf.mxu0 }
 0x72e   : > { %v2064_v47 = vmax.f32 %v2002_v46, 0.0  ;;  %v2046_v60 = vadd.f32 %v2045_v18, %v1975_v38 }
 0x730   : > { %v2067_v51 = vmax.f32 %v2046_v60, 0.0  ;;  %2130 = vmatmul.f32.gmra.mxu1 %v2064_v47 }
 0x732   : > { %2174 = vmatmul.f32.gmra.mxu2 %v2067_v51 }
 0x733   : > { %v2004_v52 = vpop.f32.mrf.mxu3 }
 0x734   : > { %v2005_v56 = vadd.f32 %v2004_v52, %v1974_v53 }
 0x735   : > { %v2048_v57 = vpop.f32.mrf.mxu0 }
 0x736   : > { %v2066_v2 = vmax.f32 %v2005_v56, 0.0  ;;  %v2049_v6 = vadd.f32 %v2048_v57, %v1975_v38 }
 0x738   : > { %v2069_v15 = vmax.f32 %v2049_v6, 0.0  ;;  %2133 = vmatmul.f32.gmra.mxu1 %v2066_v2 }
 0x73a   : > { %2177 = vmatmul.f32.gmra.mxu2 %v2069_v15 }
 0x73b   : > { %v2007_v23 = vpop.f32.mrf.mxu3 }
 0x73c   : > { %v2008_v20 = vadd.f32 %v2007_v23, %v1974_v53 }
 0x73d   : > { %v2051_v37 = vpop.f32.mrf.mxu0 }
 0x73e   : > { %v2068_v59 = vmax.f32 %v2008_v20, 0.0  ;;  %v2052_v31 = vadd.f32 %v2051_v37, %v1975_v38 }
 0x740   : > { %v2071_v17 = vmax.f32 %v2052_v31, 0.0  ;;  %2136 = vmatmul.f32.gmra.mxu1 %v2068_v59 }
 0x742   : > { %2180 = vmatmul.f32.gmra.mxu2 %v2071_v17 }
 0x743   : > { %v2010_v41 = vpop.f32.mrf.mxu3 }
 0x744   : > { %v2011_v48 = vadd.f32 %v2010_v41, %v1974_v53 }
 0x745   : > { %v2054_v10 = vpop.f32.mrf.mxu0 }
 0x746   : > { %v2070_v45 = vmax.f32 %v2011_v48, 0.0  ;;  %v2055_v8 = vadd.f32 %v2054_v10, %v1975_v38 }
 0x748   : > { %v2073_v54 = vmax.f32 %v2055_v8, 0.0  ;;  %2139 = vmatmul.f32.gmra.mxu1 %v2070_v45 }
 0x74a   : > { %2183 = vmatmul.f32.gmra.mxu2 %v2073_v54 }
 0x74b   : > { %v2013_v3 = vpop.f32.mrf.mxu3 }
 0x74c   : > { %v2014_v9 = vadd.f32 %v2013_v3, %v1974_v53 }
 0x74d   : > { %v2057_v44 = vpop.f32.mrf.mxu0 }
 0x74e   : > { %v2072_v16 = vmax.f32 %v2014_v9, 0.0  ;;  %v2058_v40 = vadd.f32 %v2057_v44, %v1975_v38 }
 0x750   : > { %v2075_v1 = vmax.f32 %v2058_v40, 0.0  ;;  %2142 = vmatmul.f32.gmra.mxu1 %v2072_v16 }
 0x752   : > { %2186 = vmatmul.f32.gmra.mxu2 %v2075_v1 }
 0x753   : > { %v2016_v58 = vpop.f32.mrf.mxu3 }
 0x754   : > { %v2017_v19 = vadd.f32 %v2016_v58, %v1974_v53 }
 0x756   : > { %v2074_v30 = vmax.f32 %v2017_v19, 0.0 }
 0x758   : > { %2145 = vmatmul.f32.gmra.mxu1 %v2074_v30 }
 0x79d   : > { %v2125_v11 = vpop.f32.mrf.mxu1  ;;  %v2166_v12 = vpop.f32.mrf.mxu2 }
 0x79e   : > { %v2126_v50 = vadd.f32 %v2125_v11, %v470_v4 }
 0x7a0   : > { %v4345_v7 = vadd.f32 %v2166_v12, %v2126_v50 }
 0x7a2   : > { %v2193_v21 = vsel %vm2192_vm0, %v4345_v7, -inf }
 0x7a3   : > { %2201 = vmax.xlane.f32.xlu0 %v2193_v21 }
 0x7a5   : > { %v2128_v5 = vpop.f32.mrf.mxu1  ;;  %v2169_v24 = vpop.f32.mrf.mxu2 }
 0x7a6   : > { %v2129_v35 = vadd.f32 %v2128_v5, %v470_v4 }
 0x7a8   : > { %v4350_v62 = vadd.f32 %v2169_v24, %v2129_v35 }
 0x7aa   : > { %v2194_v22 = vsel %vm2192_vm0, %v4350_v62, -inf }
 0x7ab   : > { %2203 = vmax.xlane.f32.xlu0 %v2194_v22 }
 0x7ad   : > { %v2131_v27 = vpop.f32.mrf.mxu1  ;;  %v2172_v38 = vpop.f32.mrf.mxu2 }
 0x7ae   : > { %v2132_v43 = vadd.f32 %v2131_v27, %v470_v4 }
 0x7b0   : > { %v4355_v49 = vadd.f32 %v2172_v38, %v2132_v43 }
 0x7b2   : > { %v2195_v63 = vsel %vm2192_vm0, %v4355_v49, -inf }
 0x7b3   : > { %2205 = vmax.xlane.f32.xlu1 %v2195_v63 }
 0x7b5   : > { %v2134_v53 = vpop.f32.mrf.mxu1  ;;  %v2175_v0 = vpop.f32.mrf.mxu2 }
 0x7b6   : > { %v2135_v13 = vadd.f32 %v2134_v53, %v470_v4 }
 0x7b8   : > { %v4360_v29 = vadd.f32 %v2175_v0, %v2135_v13 }
 0x7ba   : > { %v2196_v55 = vsel %vm2192_vm0, %v4360_v29, -inf }
 0x7bb   : > { %2207 = vmax.xlane.f32.xlu1 %v2196_v55 }
 0x7bd   : > { %v2137_v34 = vpop.f32.mrf.mxu1  ;;  %v2178_v25 = vpop.f32.mrf.mxu2 }
 0x7be   : > { %v2138_v28 = vadd.f32 %v2137_v34, %v470_v4 }
 0x7c0   : > { %v4365_v14 = vadd.f32 %v2178_v25, %v2138_v28 }
 0x7c2   : > { %v2197_v26 = vsel %vm2192_vm0, %v4365_v14, -inf }
 0x7c3   : > { %2209 = vmax.xlane.f32.xlu2 %v2197_v26 }
 0x7c5   : > { %v2140_v33 = vpop.f32.mrf.mxu1  ;;  %v2181_v39 = vpop.f32.mrf.mxu2 }
 0x7c6   : > { %v2141_v42 = vadd.f32 %v2140_v33, %v470_v4 }
 0x7c8   : > { %v4370_v32 = vadd.f32 %v2181_v39, %v2141_v42 }
 0x7ca   : > { %v2198_v46 = vsel %vm2192_vm0, %v4370_v32, -inf }
 0x7cb   : > { %2211 = vmax.xlane.f32.xlu2 %v2198_v46 }
 0x7cd   : > { %v2143_v18 = vpop.f32.mrf.mxu1  ;;  %v2184_v47 = vpop.f32.mrf.mxu2 }
 0x7ce   : > { %v2144_v60 = vadd.f32 %v2143_v18, %v470_v4 }
 0x7d0   : > { %v4375_v51 = vadd.f32 %v2184_v47, %v2144_v60 }
 0x7d2   : > { %v2199_v52 = vsel %vm2192_vm0, %v4375_v51, -inf }
 0x7d3   : > { %2213 = vmax.xlane.f32.xlu0 %v2199_v52 }
 0x7d5   : > { %v2146_v56 = vpop.f32.mrf.mxu1  ;;  %v2187_v2 = vpop.f32.mrf.mxu2 }
 0x7d6   : > { %v2147_v57 = vadd.f32 %v2146_v56, %v470_v4 }
 0x7d8   : > { %v4380_v6 = vadd.f32 %v2187_v2, %v2147_v57 }
 0x7da   : > { %v2200_v15 = vsel %vm2192_vm0, %v4380_v6, -inf }
 0x7db   : > { %2215 = vmax.xlane.f32.xlu1 %v2200_v15 }
 0x816   : > { %v4385_v23 = vpop.xlane.xlu0 %2201 }
 0x817   : > { %v2217_v20 = vsub.f32 %v4345_v7, %v4385_v23 }
 0x819   : > { %v2225_v37 = vmul.f32 1.442695, %v2217_v20 }
 0x81b   : > { %2786 = vpow2.f32 %v2225_v37 }
 0x81e   : > { %v4389_v59 = vpop.xlane.xlu0 %2203 }
 0x81f   : > { %v2218_v31 = vsub.f32 %v4350_v62, %v4389_v59 }
 0x821   : > { %v2787_v17 = vpop.eup %2786  ;;  %v2227_v41 = vmul.f32 1.442695, %v2218_v31 }
 0x822   : > { %v2241_v48 = vsel %vm2192_vm0, %v2787_v17, 0.0 }
 0x823   : > { %2788 = vpow2.f32 %v2227_v41  ;;  %2249 = vadd.xlane.f32.xlu2 %v2241_v48 }
 0x826   : > { %v4395_v10 = vpop.xlane.xlu1 %2205 }
 0x827   : > { %v2219_v45 = vsub.f32 %v4355_v49, %v4395_v10 }
 0x829   : > { %v2789_v8 = vpop.eup %2788  ;;  %v2229_v54 = vmul.f32 1.442695, %v2219_v45 }
 0x82a   : > { %v2242_v3 = vsel %vm2192_vm0, %v2789_v8, 0.0 }
 0x82b   : > { %2790 = vpow2.f32 %v2229_v54  ;;  %2251 = vadd.xlane.f32.xlu0 %v2242_v3 }
 0x82e   : > { %v4401_v9 = vpop.xlane.xlu1 %2207 }
 0x82f   : > { %v2220_v44 = vsub.f32 %v4360_v29, %v4401_v9 }
 0x831   : > { %v2791_v16 = vpop.eup %2790  ;;  %v2231_v40 = vmul.f32 1.442695, %v2220_v44 }
 0x832   : > { %v2243_v1 = vsel %vm2192_vm0, %v2791_v16, 0.0 }
 0x833   : > { %2792 = vpow2.f32 %v2231_v40  ;;  %2253 = vadd.xlane.f32.xlu1 %v2243_v1 }
 0x836   : > { %v4407_v58 = vpop.xlane.xlu2 %2209 }
 0x837   : > { %v2221_v19 = vsub.f32 %v4365_v14, %v4407_v58 }
 0x839   : > { %v2793_v30 = vpop.eup %2792  ;;  %v2233_v61 = vmul.f32 1.442695, %v2221_v19 }
 0x83a   : > { %v2244_v4 = vsel %vm2192_vm0, %v2793_v30, 0.0 }
 0x83b   : > { %2794 = vpow2.f32 %v2233_v61  ;;  %2255 = vadd.xlane.f32.xlu2 %v2244_v4 }
 0x83e   : > { %v4413_v11 = vpop.xlane.xlu2 %2211 }
 0x83f   : > { %v2222_v12 = vsub.f32 %v4370_v32, %v4413_v11 }
 0x841   : > { %v2795_v50 = vpop.eup %2794  ;;  %v2235_v21 = vmul.f32 1.442695, %v2222_v12 }
 0x842   : > { %v2245_v5 = vsel %vm2192_vm0, %v2795_v50, 0.0 }
 0x843   : > { %2796 = vpow2.f32 %v2235_v21  ;;  %2257 = vadd.xlane.f32.xlu0 %v2245_v5 }
 0x846   : > { %v4419_v24 = vpop.xlane.xlu0 %2213 }
 0x847   : > { %v2223_v35 = vsub.f32 %v4375_v51, %v4419_v24 }
 0x849   : > { %v2797_v22 = vpop.eup %2796  ;;  %v2237_v27 = vmul.f32 1.442695, %v2223_v35 }
 0x84a   : > { %v2246_v38 = vsel %vm2192_vm0, %v2797_v22, 0.0 }
 0x84b   : > { %2798 = vpow2.f32 %v2237_v27  ;;  %2259 = vadd.xlane.f32.xlu1 %v2246_v38 }
 0x84e   : > { %v4425_v43 = vpop.xlane.xlu1 %2215 }
 0x84f   : > { %v2224_v63 = vsub.f32 %v4380_v6, %v4425_v43 }
 0x851   : > { %v2799_v53 = vpop.eup %2798  ;;  %v2239_v0 = vmul.f32 1.442695, %v2224_v63 }
 0x852   : > { %v2247_v13 = vsel %vm2192_vm0, %v2799_v53, 0.0 }
 0x853   : > { %2800 = vpow2.f32 %v2239_v0  ;;  %2261 = vadd.xlane.f32.xlu2 %v2247_v13 }
 0x859   : > { %v2801_v55 = vpop.eup %2800 }
 0x85a   : > { %v2248_v34 = vsel %vm2192_vm0, %v2801_v55, 0.0 }
 0x85b   : > { %2263 = vadd.xlane.f32.xlu0 %v2248_v34 }
 0x85c   : > { %3074 = shalt.err (!%p3071_p10)
}
 0x85d   : > { %2617 = dma.vmem_to_hbm [thread:$0]  (%p3310_p13), %s2349_s3, 128, %s2351_s25, %s2319_s23  }
 0x85e   : > { %s2531_s5 = sshll.u32 %s3341_s19, 6  ;;  %s2585_s21 = sshll.u32 %s3248_s16, 6 }
 0x85f   : > { %s4455_s0 = scalar_lea.vmem [#allocation15], %s2531_s5  ;;  %s2330_s13 = scalar_lea.hbm %s4542_s8, %s2585_s21 }
 0x860   : > { %s2331_s3 = sshll.u32 %s4455_s0, 4  ;;  %s2333_s25 = sshll.u32 %s2330_s13, 4  ;;  %s2332_s3 = int_to_ptr.vmem [resolvable:$true] %s2331_s3  ;;  %s2334_s25 = int_to_ptr.hbm [resolvable:$true] %s2333_s25 }
 0x861   : > { %s2314_s16 = scalar_lea.sflag [#allocation6], %s3341_s19  ;;  %s3089_s23 = sshra.s32 %s2334_s25, 4  ;;  %s3090_s23 = int_to_ptr.hbm [resolvable:$true] %s3089_s23 }
 0x862   : > { %s3091_s29 = scalar_lea.hbm %s3090_s23, 64  ;;  %s3095_s14 = scalar_lea.hbm %s4542_s8, 128 }
 0x863   : > { %p3092_p11 = scmp.ne.s32.totalorder %s3090_s23, %s3091_s29  ;;  %p3096_p6 = scmp.lt.s32.totalorder %s3090_s23, %s4542_s8 }
 0x864   : > { %p3097_p3 = scmp.lt.s32.totalorder %s3095_s14, %s3091_s29 }
 0x865   : > { %p3093_p0 = pnand %p3092_p11, %p3310_p13 }
 0x866   : > { %p3098_p1 = por %p3097_p3, %p3096_p6 }
 0x867   : > { %p3094_p2 = pneg %p3093_p0 }
 0x869   : > { %p3099_p5 = pnand %p3098_p1, %p3094_p2 }
 0x896   : > { %v2250_v25 = vpop.xlane.xlu2 %2249 }
 0x897   : > { %2802 = vlog2.f32 %v2250_v25 }
 0x89d   : > { %v2803_v28 = vpop.eup %2802 }
 0x89e   : > { %v2266_v26 = vmul.f32 0.6931472, %v2803_v28  ;;  %v2252_v33 = vpop.xlane.xlu0 %2251 }
 0x89f   : > { %2804 = vlog2.f32 %v2252_v33 }
 0x8a0   : > { %v2281_v39 = vadd.f32 %v2266_v26, %v4385_v23 }
 0x8a2   : > { %v2289_v42 = vsub.f32 %v4345_v7, %v2281_v39 }
 0x8a4   : > { %v2297_v46 = vsel %vm2192_vm0, %v2289_v42, %v4345_v7 }
 0x8a5   : > { %v2805_v18 = vpop.eup %2804  ;;  %2305 = vst [vmem:[%s4455_s0] sm:$0xff] %v2297_v46 }
 0x8a6   : > { %v2268_v47 = vmul.f32 0.6931472, %v2805_v18  ;;  %v2254_v60 = vpop.xlane.xlu1 %2253 }
 0x8a7   : > { %2806 = vlog2.f32 %v2254_v60 }
 0x8a8   : > { %v2282_v52 = vadd.f32 %v2268_v47, %v4389_v59 }
 0x8aa   : > { %v2290_v56 = vsub.f32 %v4350_v62, %v2282_v52 }
 0x8ac   : > { %v2298_v57 = vsel %vm2192_vm0, %v2290_v56, %v4350_v62 }
 0x8ad   : > { %v2807_v2 = vpop.eup %2806  ;;  %2306 = vst [vmem:[%s4455_s0 + $0x8] sm:$0xff] %v2298_v57 }
 0x8ae   : > { %v2270_v7 = vmul.f32 0.6931472, %v2807_v2  ;;  %v2256_v15 = vpop.xlane.xlu2 %2255 }
 0x8af   : > { %2808 = vlog2.f32 %v2256_v15 }
 0x8b0   : > { %v2283_v23 = vadd.f32 %v2270_v7, %v4395_v10 }
 0x8b2   : > { %v2291_v20 = vsub.f32 %v4355_v49, %v2283_v23 }
 0x8b4   : > { %v2299_v37 = vsel %vm2192_vm0, %v2291_v20, %v4355_v49 }
 0x8b5   : > { %v2809_v59 = vpop.eup %2808  ;;  %2307 = vst [vmem:[%s4455_s0 + $0x10] sm:$0xff] %v2299_v37 }
 0x8b6   : > { %v2272_v31 = vmul.f32 0.6931472, %v2809_v59  ;;  %v2258_v17 = vpop.xlane.xlu0 %2257 }
 0x8b7   : > { %2810 = vlog2.f32 %v2258_v17 }
 0x8b8   : > { %v2284_v62 = vadd.f32 %v2272_v31, %v4401_v9 }
 0x8ba   : > { %v2292_v41 = vsub.f32 %v4360_v29, %v2284_v62 }
 0x8bc   : > { %v2300_v48 = vsel %vm2192_vm0, %v2292_v41, %v4360_v29 }
 0x8bd   : > { %v2811_v10 = vpop.eup %2810  ;;  %2308 = vst [vmem:[%s4455_s0 + $0x18] sm:$0xff] %v2300_v48 }
 0x8be   : > { %v2274_v45 = vmul.f32 0.6931472, %v2811_v10  ;;  %v2260_v8 = vpop.xlane.xlu1 %2259 }
 0x8bf   : > { %2812 = vlog2.f32 %v2260_v8 }
 0x8c0   : > { %v2285_v49 = vadd.f32 %v2274_v45, %v4407_v58 }
 0x8c2   : > { %v2293_v54 = vsub.f32 %v4365_v14, %v2285_v49 }
 0x8c4   : > { %v2301_v3 = vsel %vm2192_vm0, %v2293_v54, %v4365_v14 }
 0x8c5   : > { %v2813_v9 = vpop.eup %2812  ;;  %2309 = vst [vmem:[%s4455_s0 + $0x20] sm:$0xff] %v2301_v3 }
 0x8c6   : > { %v2276_v44 = vmul.f32 0.6931472, %v2813_v9  ;;  %v2262_v16 = vpop.xlane.xlu2 %2261 }
 0x8c7   : > { %2814 = vlog2.f32 %v2262_v16 }
 0x8c8   : > { %v2286_v29 = vadd.f32 %v2276_v44, %v4413_v11 }
 0x8ca   : > { %v2294_v40 = vsub.f32 %v4370_v32, %v2286_v29 }
 0x8cc   : > { %v2302_v1 = vsel %vm2192_vm0, %v2294_v40, %v4370_v32 }
 0x8cd   : > { %v2815_v58 = vpop.eup %2814  ;;  %2310 = vst [vmem:[%s4455_s0 + $0x28] sm:$0xff] %v2302_v1 }
 0x8ce   : > { %v2278_v19 = vmul.f32 0.6931472, %v2815_v58  ;;  %v2264_v30 = vpop.xlane.xlu0 %2263 }
 0x8cf   : > { %2816 = vlog2.f32 %v2264_v30 }
 0x8d0   : > { %v2287_v14 = vadd.f32 %v2278_v19, %v4419_v24 }
 0x8d2   : > { %v2295_v61 = vsub.f32 %v4375_v51, %v2287_v14 }
 0x8d4   : > { %v2303_v4 = vsel %vm2192_vm0, %v2295_v61, %v4375_v51 }
 0x8d5   : > { %v2817_v32 = vpop.eup %2816  ;;  %2311 = vst [vmem:[%s4455_s0 + $0x30] sm:$0xff] %v2303_v4 }
 0x8d6   : > { %v2280_v11 = vmul.f32 0.6931472, %v2817_v32 }
 0x8d8   : > { %v2288_v12 = vadd.f32 %v2280_v11, %v4425_v43 }
 0x8da   : > { %v2296_v50 = vsub.f32 %v4380_v6, %v2288_v12 }
 0x8dc   : > { %v2304_v51 = vsel %vm2192_vm0, %v2296_v50, %v4380_v6 }
 0x8dd   : > { %2312 = vst [vmem:[%s4455_s0 + $0x38] sm:$0xff] %v2304_v51 }
 0x8de   : > { %3102 = shalt.err (!%p3099_p5)
}
 0x8df   : > { %s3172_s19 = smov 128   ;;  %s3173_s5 = smov 8  }
 0x8e0   : > { %2616 = dma.vmem_to_hbm [thread:$0]  (%p3310_p13), %s2332_s3, 1024, %s2334_s25, %s2314_s16, %s3172_s19, %s3172_s19, %s3173_s5  }
 0x8e1 PF: > { %s2362_s0 = sand.u32 1, %s3145_s30   ;;  %p4663_p12 = scmp.ge.s32.totalorder %s3157_s12, 2 }
 0x8e2   : > { %s2363_s21 = scalar_lea.sflag [#allocation6], %s2362_s0 }
 0x8e3   : > { %p2641_p8 = pnand %p4663_p12, %p3315_p4 }
 0x8e5   : > { %p2642_p7 = pneg %p2641_p8 }
 0x8e7   : > { %3136 = dma.done.wait (%p2642_p7), %s2363_s21, 1024  }
 0x8e8   : > { %3138 = vsyncadd (%p2642_p7), %s2363_s21, 4294966272  ;;  %s2373_s27 = scalar_lea.sflag [#allocation17], %s2362_s0 }
 0x8e9   : > { %3140 = dma.done.wait (%p2642_p7), %s2373_s27, 128  }
 0x8ea   : > { %3142 = vsyncadd (%p2642_p7), %s2373_s27, 4294967168  ;;  %p29_p13 = scmp.ge.s32.totalorder %s3290_s18, 4   ;;  %s4664_s30 = smov %s3149_s10 }
 0x8eb   : > { %s4665_s10 = smov %s3153_s11  ;;  %s4666_s11 = smov %s3302_s24 }
 0x8ec   : > { %s4667_s12 = smov %s3290_s18  ;;  %31 = sbr.rel (!%p29_p13) target bundleno = 15 (0xf), region = 152 }
 0x8f1   :  { %2379 = vsyncpa [#allocation5], 1 }
 0x8f2   :  { %2381 = vsyncpa [#allocation5 + $0x1], 1 }
 0x8f3   :  { %2382 = vsyncpa [#allocation8], 1 }
 0x8f4   :  { %2383 = vsyncpa [#allocation11], 1 }
 0x8f5   :  { %2384 = vsyncpa [#allocation14], 1 }
 0x8f6   :  { %2385 = vsyncpa [#allocation6], 1 }
 0x8f7   :  { %2387 = vsyncpa [#allocation6 + $0x1], 1 }
 0x8f8   :  { %2388 = vsyncpa [#allocation17], 1 }
 0x8f9   :  { %2390 = vsyncpa [#allocation17 + $0x1], 1 }

</bundles_post_ra>
